<compile_context>
chip_gen: v5e
topology: v5e:2x2
jax: 0.10.0
libtpu: 0.0.40
codegen_flags: <defaults>
</compile_context>

<pallas_src>
import functools
import math

import jax
import jax.numpy as jnp
from jax import lax
from jax.experimental import pallas as pl
from jax.experimental.pallas import tpu as pltpu


# ----------------------------------------------------------------------------
# In-kernel helpers
# ----------------------------------------------------------------------------

def _layer_norm(x, g, b, eps=1e-6):
    # Annotated-Transformer LayerNorm: g * (x - mean) / (std + eps) + b, unbiased std.
    d = x.shape[-1]
    mean = jnp.mean(x, axis=-1, keepdims=True)
    xc = x - mean
    var = jnp.sum(xc * xc, axis=-1, keepdims=True) / (d - 1)
    return g * xc / (jnp.sqrt(var) + eps) + b


def _attend(q, k, v, bias, n_heads):
    """q: (Sq, D), k/v: (Sk, D), bias: (Sq, Sk) additive mask.  Heads unrolled in-kernel."""
    d = q.shape[-1]
    dk = d // n_heads
    outs = []
    for h in range(n_heads):
        sl = slice(h * dk, (h + 1) * dk)
        # scores: 'qd,kd->qk' (scale already folded into Wq)
        s = lax.dot_general(q[:, sl], k[:, sl], (((1,), (1,)), ((), ())),
                            preferred_element_type=jnp.float32)
        s = s + bias
        s = s - jnp.max(s, axis=-1, keepdims=True)
        p = jnp.exp(s)
        p = p * pl.reciprocal(jnp.sum(p, axis=-1, keepdims=True), approx=True)
        outs.append(jnp.dot(p, v[:, sl], preferred_element_type=jnp.float32))
    return jnp.concatenate(outs, axis=-1)


# ----------------------------------------------------------------------------
# Fused sublayer kernels
# ----------------------------------------------------------------------------

def _self_attn_kernel(x_ref, bias_ref, g_ref, b_ref, wqkv_ref, bqkv_ref,
                      wo_ref, bo_ref, o_ref, *, n_heads):
    x = x_ref[...]                                   # (S, D)
    d = x.shape[-1]
    xn = _layer_norm(x, g_ref[...], b_ref[...])
    qkv = jnp.dot(xn, wqkv_ref[...], preferred_element_type=jnp.float32) + bqkv_ref[...]
    q, k, v = qkv[:, :d], qkv[:, d:2 * d], qkv[:, 2 * d:]
    attn = _attend(q, k, v, bias_ref[...], n_heads)
    o_ref[...] = x + jnp.dot(attn, wo_ref[...], preferred_element_type=jnp.float32) + bo_ref[...]


def _cross_attn_kernel(x_ref, mem_ref, bias_ref, g_ref, b_ref, wq_ref, bq_ref,
                       wkv_ref, bkv_ref, wo_ref, bo_ref, o_ref, *, n_heads):
    x = x_ref[...]                                   # (Sq, D)
    d = x.shape[-1]
    xn = _layer_norm(x, g_ref[...], b_ref[...])
    q = jnp.dot(xn, wq_ref[...], preferred_element_type=jnp.float32) + bq_ref[...]
    kv = jnp.dot(mem_ref[...], wkv_ref[...], preferred_element_type=jnp.float32) + bkv_ref[...]
    k, v = kv[:, :d], kv[:, d:]
    attn = _attend(q, k, v, bias_ref[...], n_heads)
    o_ref[...] = x + jnp.dot(attn, wo_ref[...], preferred_element_type=jnp.float32) + bo_ref[...]


def _ffn_kernel(x_ref, g_ref, b_ref, w1_ref, b1_ref, w2_ref, b2_ref, o_ref):
    x = x_ref[...]
    xn = _layer_norm(x, g_ref[...], b_ref[...])
    h = jnp.dot(xn, w1_ref[...], preferred_element_type=jnp.float32) + b1_ref[...]
    h = jnp.maximum(h, 0.0)
    o_ref[...] = x + jnp.dot(h, w2_ref[...], preferred_element_type=jnp.float32) + b2_ref[...]


def _final_norm_kernel(x_ref, g_ref, b_ref, o_ref):
    o_ref[...] = _layer_norm(x_ref[...], g_ref[...], b_ref[...])


def _generator_kernel(x_ref, g_ref, b_ref, w_ref, bv_ref, o_ref):
    # final LayerNorm + vocab projection + log_softmax, fused
    xn = _layer_norm(x_ref[...], g_ref[...], b_ref[...])
    y = jnp.dot(xn, w_ref[...], preferred_element_type=jnp.float32) + bv_ref[...]
    y = y - jnp.max(y, axis=-1, keepdims=True)
    o_ref[...] = y - jnp.log(jnp.sum(jnp.exp(y), axis=-1, keepdims=True))


# ----------------------------------------------------------------------------
# pallas_call wrappers (grid over batch, "parallel" for megacore / 2-TC v7x)
# ----------------------------------------------------------------------------

_PAR = pltpu.CompilerParams(dimension_semantics=("parallel",))


def _rep(shape):
    # weight / bias block: same block for every grid step -> stays resident in VMEM
    return pl.BlockSpec(shape, lambda b: (0,) * len(shape))


def self_attn_sublayer(x, bias, p, g, b, *, n_heads):
    B, S, D = x.shape
    return pl.pallas_call(
        functools.partial(_self_attn_kernel, n_heads=n_heads),
        out_shape=jax.ShapeDtypeStruct((B, S, D), jnp.float32),
        grid=(B,),
        in_specs=[
            pl.BlockSpec((None, S, D), lambda i: (i, 0, 0)),      # x (residual)
            pl.BlockSpec((None, S, S), lambda i: (i, 0, 0)),      # additive mask bias
            _rep((1, D)), _rep((1, D)),                           # LN gamma / beta
            _rep((D, 3 * D)), _rep((1, 3 * D)),                   # fused Wqkv / bqkv
            _rep((D, D)), _rep((1, D)),                           # Wo / bo
        ],
        out_specs=pl.BlockSpec((None, S, D), lambda i: (i, 0, 0)),
        compiler_params=_PAR,
    )(x, bias, g, b, p["wqkv"], p["bqkv"], p["wo"], p["bo"])


def cross_attn_sublayer(x, memory, bias, p, g, b, *, n_heads):
    B, Sq, D = x.shape
    Sk = memory.shape[1]
    return pl.pallas_call(
        functools.partial(_cross_attn_kernel, n_heads=n_heads),
        out_shape=jax.ShapeDtypeStruct((B, Sq, D), jnp.float32),
        grid=(B,),
        in_specs=[
            pl.BlockSpec((None, Sq, D), lambda i: (i, 0, 0)),     # x (residual / query)
            pl.BlockSpec((None, Sk, D), lambda i: (i, 0, 0)),     # encoder memory
            pl.BlockSpec((None, Sq, Sk), lambda i: (i, 0, 0)),    # additive mask bias
            _rep((1, D)), _rep((1, D)),                           # LN gamma / beta
            _rep((D, D)), _rep((1, D)),                           # Wq / bq (scale folded in)
            _rep((D, 2 * D)), _rep((1, 2 * D)),                   # fused Wkv / bkv
            _rep((D, D)), _rep((1, D)),                           # Wo / bo
        ],
        out_specs=pl.BlockSpec((None, Sq, D), lambda i: (i, 0, 0)),
        compiler_params=_PAR,
    )(x, memory, bias, g, b, p["wq"], p["bq"], p["wkv"], p["bkv"], p["wo"], p["bo"])


def ffn_sublayer(x, p, g, b):
    B, S, D = x.shape
    Dff = p["w1"].shape[1]
    return pl.pallas_call(
        _ffn_kernel,
        out_shape=jax.ShapeDtypeStruct((B, S, D), jnp.float32),
        grid=(B,),
        in_specs=[
            pl.BlockSpec((None, S, D), lambda i: (i, 0, 0)),
            _rep((1, D)), _rep((1, D)),
            _rep((D, Dff)), _rep((1, Dff)),
            _rep((Dff, D)), _rep((1, D)),
        ],
        out_specs=pl.BlockSpec((None, S, D), lambda i: (i, 0, 0)),
        compiler_params=_PAR,
    )(x, g, b, p["w1"], p["b1"], p["w2"], p["b2"])


def final_layer_norm(x, g, b):
    B, S, D = x.shape
    return pl.pallas_call(
        _final_norm_kernel,
        out_shape=jax.ShapeDtypeStruct((B, S, D), jnp.float32),
        grid=(B,),
        in_specs=[pl.BlockSpec((None, S, D), lambda i: (i, 0, 0)),
                  _rep((1, D)), _rep((1, D))],
        out_specs=pl.BlockSpec((None, S, D), lambda i: (i, 0, 0)),
        compiler_params=_PAR,
    )(x, g, b)


def generator(x, g, b, w, bv):
    B, S, D = x.shape
    V = w.shape[1]
    return pl.pallas_call(
        _generator_kernel,
        out_shape=jax.ShapeDtypeStruct((B, S, V), jnp.float32),
        grid=(B,),
        in_specs=[pl.BlockSpec((None, S, D), lambda i: (i, 0, 0)),
                  _rep((1, D)), _rep((1, D)),
                  _rep((D, V)), _rep((1, V))],
        out_specs=pl.BlockSpec((None, S, V), lambda i: (i, 0, 0)),
        compiler_params=_PAR,
    )(x, g, b, w, bv)


# ----------------------------------------------------------------------------
# Model glue (gather embedding, mask->bias, layer stacking) in plain JAX
# ----------------------------------------------------------------------------

def embed(table, tokens, pe):
    # table is pre-scaled by sqrt(d_model) at init.  Gather (O(B*S*D)) instead of one-hot matmul.
    # TODO(synk): could become a Pallas DMA-gather kernel via PrefetchScalarGridSpec + pl.Element.
    e = jnp.take(table, tokens, axis=0)                  # (B, S, D)
    return e + pe[None, :tokens.shape[1], :]


def mask_to_bias(mask, sq, sk):
    # (B, 1, {1,Sq}, Sk) float mask (nonzero == keep) -> (B, Sq, Sk) additive bias.
    m = jnp.broadcast_to(mask[:, 0], (mask.shape[0], sq, sk))
    return jnp.where(m != 0, 0.0, -1e9).astype(jnp.float32)


def encode(params, src, src_bias, *, n_heads):
    x = embed(params["src_emb"], src, params["pe"])
    for lyr in params["enc_layers"]:
        x = self_attn_sublayer(x, src_bias, lyr["self_attn"], lyr["ln1_g"], lyr["ln1_b"], n_heads=n_heads)
        x = ffn_sublayer(x, lyr["ff"], lyr["ln2_g"], lyr["ln2_b"])
    return final_layer_norm(x, params["enc_norm_g"], params["enc_norm_b"])


def decode(params, memory, src_bias, tgt, tgt_bias, *, n_heads):
    x = embed(params["tgt_emb"], tgt, params["pe"])
    for lyr in params["dec_layers"]:
        x = self_attn_sublayer(x, tgt_bias, lyr["self_attn"], lyr["ln1_g"], lyr["ln1_b"], n_heads=n_heads)
        x = cross_attn_sublayer(x, memory, src_bias, lyr["src_attn"], lyr["ln2_g"], lyr["ln2_b"],
                                n_heads=n_heads)
        x = ffn_sublayer(x, lyr["ff"], lyr["ln3_g"], lyr["ln3_b"])
    return generator(x, params["dec_norm_g"], params["dec_norm_b"], params["gen_w"], params["gen_b"])


def encoder_decoder_forward(params, src, tgt, src_mask, tgt_mask, *, n_heads):
    s_src = src.shape[1]
    s_tgt = tgt.shape[1]
    src_bias_enc = mask_to_bias(src_mask, s_src, s_src)
    src_bias_dec = mask_to_bias(src_mask, s_tgt, s_src)
    tgt_bias = mask_to_bias(tgt_mask, s_tgt, s_tgt)
    memory = encode(params, src, src_bias_enc, n_heads=n_heads)
    return decode(params, memory, src_bias_dec, tgt, tgt_bias, n_heads=n_heads)


# ----------------------------------------------------------------------------
# Deterministic parameter construction (no python scalars in the pytree)
# ----------------------------------------------------------------------------

def init_params(*, vocab, d_model, d_ff, n_heads, n_layers, max_len):
    keys = iter(jax.random.split(jax.random.PRNGKey(0), 512))
    q_scale = 1.0 / math.sqrt(d_model // n_heads)        # fold 1/sqrt(dk) into Wq

    def dense(k_in, k_out, scale=1.0):
        w = jax.random.normal(next(keys), (k_in, k_out), jnp.float32) * (scale / math.sqrt(k_in))
        return w, jnp.zeros((1, k_out), jnp.float32)

    def self_attn_block():
        wq, bq = dense(d_model, d_model, q_scale)
        wk, bk = dense(d_model, d_model)
        wv, bv = dense(d_model, d_model)
        wo, bo = dense(d_model, d_model)
        return {"wqkv": jnp.concatenate([wq, wk, wv], axis=1),
                "bqkv": jnp.concatenate([bq, bk, bv], axis=1),
                "wo": wo, "bo": bo}

    def cross_attn_block():
        wq, bq = dense(d_model, d_model, q_scale)
        wk, bk = dense(d_model, d_model)
        wv, bv = dense(d_model, d_model)
        wo, bo = dense(d_model, d_model)
        return {"wq": wq, "bq": bq,
                "wkv": jnp.concatenate([wk, wv], axis=1),
                "bkv": jnp.concatenate([bk, bv], axis=1),
                "wo": wo, "bo": bo}

    def ff_block():
        w1, b1 = dense(d_model, d_ff)
        w2, b2 = dense(d_ff, d_model)
        return {"w1": w1, "b1": b1, "w2": w2, "b2": b2}

    def ln_pair():
        return jnp.ones((1, d_model), jnp.float32), jnp.zeros((1, d_model), jnp.float32)

    def embedding_table():
        w = jax.random.normal(next(keys), (vocab, d_model), jnp.float32) / math.sqrt(d_model)
        return w * math.sqrt(d_model)                     # fold the sqrt(d_model) embedding scale

    # sinusoidal positional encoding
    pos = jnp.arange(max_len, dtype=jnp.float32)[:, None]
    div = jnp.exp(jnp.arange(0, d_model, 2, dtype=jnp.float32) * (-math.log(10000.0) / d_model))
    pe = jnp.zeros((max_len, d_model), jnp.float32)
    pe = pe.at[:, 0::2].set(jnp.sin(pos * div))
    pe = pe.at[:, 1::2].set(jnp.cos(pos * div))

    enc_layers = []
    for _ in range(n_layers):
        g1, b1 = ln_pair()
        g2, b2 = ln_pair()
        enc_layers.append({"self_attn": self_attn_block(), "ff": ff_block(),
                           "ln1_g": g1, "ln1_b": b1, "ln2_g": g2, "ln2_b": b2})

    dec_layers = []
    for _ in range(n_layers):
        g1, b1 = ln_pair()
        g2, b2 = ln_pair()
        g3, b3 = ln_pair()
        dec_layers.append({"self_attn": self_attn_block(), "src_attn": cross_attn_block(),
                           "ff": ff_block(),
                           "ln1_g": g1, "ln1_b": b1, "ln2_g": g2, "ln2_b": b2,
                           "ln3_g": g3, "ln3_b": b3})

    gen_w, gen_b = dense(d_model, vocab)
    eng, enb = ln_pair()
    dng, dnb = ln_pair()

    return {
        "pe": pe,
        "src_emb": embedding_table(), "tgt_emb": embedding_table(),
        "enc_layers": enc_layers, "dec_layers": dec_layers,
        "enc_norm_g": eng, "enc_norm_b": enb,
        "dec_norm_g": dng, "dec_norm_b": dnb,
        "gen_w": gen_w, "gen_b": gen_b,
    }


# ----------------------------------------------------------------------------
# Driver
# ----------------------------------------------------------------------------

if __name__ == "__main__":
    # lane-dense dims: d_model = vocab = 128, d_ff = 256 (multiples of 128)
    B, S, VOCAB = 2, 8, 128
    D_MODEL, D_FF, N_HEADS, N_LAYERS = 128, 256, 4, 2

    params = init_params(vocab=VOCAB, d_model=D_MODEL, d_ff=D_FF,
                         n_heads=N_HEADS, n_layers=N_LAYERS, max_len=64)

    key = jax.random.PRNGKey(0)
    k_src, k_tgt = jax.random.split(key)
    src = jax.random.randint(k_src, (B, S), 0, VOCAB, dtype=jnp.int32)
    tgt = jax.random.randint(k_tgt, (B, S), 0, VOCAB, dtype=jnp.int32)
    src_mask = jnp.ones((B, 1, 1, S), jnp.float32)                               # all source positions visible
    tgt_mask = jnp.tril(jnp.ones((S, S), jnp.float32))[None, None, :, :]         # causal mask
    tgt_mask = jnp.broadcast_to(tgt_mask, (B, 1, S, S))

    fwd = jax.jit(functools.partial(encoder_decoder_forward, n_heads=N_HEADS))
    out = fwd(params, src, tgt, src_mask, tgt_mask)   # (B, S, VOCAB) log-probabilities
    out = jax.block_until_ready(out)

    assert out.shape == (B, S, VOCAB)
    assert bool(jnp.all(jnp.isfinite(out)))
    # rows of log_softmax must sum to 1 in prob space
    assert bool(jnp.allclose(jnp.sum(jnp.exp(out), axis=-1), 1.0, atol=1e-4))
    print("KERNEL_OK")
</pallas_src>

<mosaic_0001>
module attributes {stable_mosaic.version = 11 : i64} {
  func.func @_ffn_kernel(%arg0: i32, %arg1: memref<1x8x128xf32, #tpu.memory_space<vmem>>, %arg2: memref<1x128xf32, #tpu.memory_space<vmem>>, %arg3: memref<1x128xf32, #tpu.memory_space<vmem>>, %arg4: memref<128x256xf32, #tpu.memory_space<vmem>>, %arg5: memref<1x256xf32, #tpu.memory_space<vmem>>, %arg6: memref<256x128xf32, #tpu.memory_space<vmem>>, %arg7: memref<1x128xf32, #tpu.memory_space<vmem>>, %arg8: memref<1x8x128xf32, #tpu.memory_space<vmem>>) attributes {dimension_semantics = [#tpu.dimension_semantics<parallel>], iteration_bounds = array<i64: 2>, scalar_prefetch = 0 : i64, scratch_operands = 0 : i64, tpu.core_type = #tpu.core_type<tc>, window_params = [{transform_indices = @transform_0, window_bounds = array<i64: 1, 8, 128>}, {pipeline_mode = #tpu.pipeline_mode<synchronous>, transform_indices = @transform_1, window_bounds = array<i64: 1, 128>}, {pipeline_mode = #tpu.pipeline_mode<synchronous>, transform_indices = @transform_2, window_bounds = array<i64: 1, 128>}, {pipeline_mode = #tpu.pipeline_mode<synchronous>, transform_indices = @transform_3, window_bounds = array<i64: 128, 256>}, {pipeline_mode = #tpu.pipeline_mode<synchronous>, transform_indices = @transform_4, window_bounds = array<i64: 1, 256>}, {pipeline_mode = #tpu.pipeline_mode<synchronous>, transform_indices = @transform_5, window_bounds = array<i64: 256, 128>}, {pipeline_mode = #tpu.pipeline_mode<synchronous>, transform_indices = @transform_6, window_bounds = array<i64: 1, 128>}, {transform_indices = @transform_7, window_bounds = array<i64: 1, 8, 128>}]} {
    %c0 = arith.constant 0 : index
    %c0_0 = arith.constant 0 : index
    %c0_1 = arith.constant 0 : index
    %0 = vector.load %arg1[%c0, %c0_0, %c0_1] : memref<1x8x128xf32, #tpu.memory_space<vmem>>, vector<1x8x128xf32>
    %1 = vector.shape_cast %0 : vector<1x8x128xf32> to vector<8x128xf32>
    %c0_2 = arith.constant 0 : index
    %c0_3 = arith.constant 0 : index
    %2 = vector.load %arg2[%c0_2, %c0_3] : memref<1x128xf32, #tpu.memory_space<vmem>>, vector<1x128xf32>
    %c0_4 = arith.constant 0 : index
    %c0_5 = arith.constant 0 : index
    %3 = vector.load %arg3[%c0_4, %c0_5] : memref<1x128xf32, #tpu.memory_space<vmem>>, vector<1x128xf32>
    %cst = arith.constant dense<0.000000e+00> : vector<8xf32>
    %4 = vector.multi_reduction <add>, %1, %cst [1] : vector<8x128xf32> to vector<8xf32>
    %5 = vector.shape_cast %4 : vector<8xf32> to vector<8x1xf32>
    %cst_6 = arith.constant 1.280000e+02 : f32
    %6 = vector.broadcast %cst_6 : f32 to vector<8x1xf32>
    %7 = arith.divf %5, %6 : vector<8x1xf32>
    %8 = vector.broadcast %7 : vector<8x1xf32> to vector<8x128xf32>
    %9 = arith.subf %1, %8 : vector<8x128xf32>
    %10 = arith.mulf %9, %9 : vector<8x128xf32>
    %cst_7 = arith.constant dense<0.000000e+00> : vector<8xf32>
    %11 = vector.multi_reduction <add>, %10, %cst_7 [1] : vector<8x128xf32> to vector<8xf32>
    %12 = vector.shape_cast %11 : vector<8xf32> to vector<8x1xf32>
    %cst_8 = arith.constant 1.270000e+02 : f32
    %13 = vector.broadcast %cst_8 : f32 to vector<8x1xf32>
    %14 = arith.divf %12, %13 : vector<8x1xf32>
    %15 = vector.broadcast %2 : vector<1x128xf32> to vector<8x128xf32>
    %16 = arith.mulf %15, %9 : vector<8x128xf32>
    %17 = math.sqrt %14 : vector<8x1xf32>
    %cst_9 = arith.constant 9.99999997E-7 : f32
    %18 = vector.broadcast %cst_9 : f32 to vector<8x1xf32>
    %19 = arith.addf %17, %18 : vector<8x1xf32>
    %20 = vector.broadcast %19 : vector<8x1xf32> to vector<8x128xf32>
    %21 = arith.divf %16, %20 : vector<8x128xf32>
    %22 = vector.broadcast %3 : vector<1x128xf32> to vector<8x128xf32>
    %23 = arith.addf %21, %22 : vector<8x128xf32>
    %c0_10 = arith.constant 0 : index
    %c0_11 = arith.constant 0 : index
    %24 = vector.load %arg4[%c0_10, %c0_11] : memref<128x256xf32, #tpu.memory_space<vmem>>, vector<128x256xf32>
    %cst_12 = arith.constant dense<0.000000e+00> : vector<8x256xf32>
    %25 = tpu.matmul %23, %24, %cst_12 {dimension_numbers = #tpu.dot_dimension_numbers<[1], [0], [0], [1], [0, 0, 1, 1], [], []>} : vector<8x128xf32>, vector<128x256xf32>, vector<8x256xf32> -> vector<8x256xf32>
    %c0_13 = arith.constant 0 : index
    %c0_14 = arith.constant 0 : index
    %26 = vector.load %arg5[%c0_13, %c0_14] : memref<1x256xf32, #tpu.memory_space<vmem>>, vector<1x256xf32>
    %27 = vector.broadcast %26 : vector<1x256xf32> to vector<8x256xf32>
    %28 = arith.addf %25, %27 : vector<8x256xf32>
    %cst_15 = arith.constant 0.000000e+00 : f32
    %29 = vector.broadcast %cst_15 : f32 to vector<8x256xf32>
    %30 = arith.maximumf %28, %29 : vector<8x256xf32>
    %c0_16 = arith.constant 0 : index
    %c0_17 = arith.constant 0 : index
    %31 = vector.load %arg6[%c0_16, %c0_17] : memref<256x128xf32, #tpu.memory_space<vmem>>, vector<256x128xf32>
    %cst_18 = arith.constant dense<0.000000e+00> : vector<8x128xf32>
    %32 = tpu.matmul %30, %31, %cst_18 {dimension_numbers = #tpu.dot_dimension_numbers<[1], [0], [0], [1], [0, 0, 1, 1], [], []>} : vector<8x256xf32>, vector<256x128xf32>, vector<8x128xf32> -> vector<8x128xf32>
    %33 = arith.addf %1, %32 : vector<8x128xf32>
    %c0_19 = arith.constant 0 : index
    %c0_20 = arith.constant 0 : index
    %34 = vector.load %arg7[%c0_19, %c0_20] : memref<1x128xf32, #tpu.memory_space<vmem>>, vector<1x128xf32>
    %35 = vector.broadcast %34 : vector<1x128xf32> to vector<8x128xf32>
    %36 = arith.addf %33, %35 : vector<8x128xf32>
    %c0_21 = arith.constant 0 : index
    %c0_22 = arith.constant 0 : index
    %c0_23 = arith.constant 0 : index
    %37 = vector.load %arg8[%c0_21, %c0_22, %c0_23] : memref<1x8x128xf32, #tpu.memory_space<vmem>>, vector<1x8x128xf32>
    %38 = vector.shape_cast %37 : vector<1x8x128xf32> to vector<8x128xf32>
    %39 = vector.shape_cast %36 : vector<8x128xf32> to vector<1x8x128xf32>
    tpu.vector_store %arg8[%c0_21, %c0_22, %c0_23], %39 {strides = array<i32>} : memref<1x8x128xf32, #tpu.memory_space<vmem>>, vector<1x8x128xf32>,
    return
  }
  func.func @transform_0(%arg0: i32) -> (i32, i32, i32) {
    %c0_i32 = arith.constant 0 : i32
    %c0_i32_0 = arith.constant 0 : i32
    %c0_i32_1 = arith.constant 0 : i32
    return %arg0, %c0_i32, %c0_i32_0 : i32, i32, i32
  }
  func.func @transform_1(%arg0: i32) -> (i32, i32) {
    %c0_i32 = arith.constant 0 : i32
    %c0_i32_0 = arith.constant 0 : i32
    %c0_i32_1 = arith.constant 0 : i32
    return %c0_i32, %c0_i32_0 : i32, i32
  }
  func.func @transform_2(%arg0: i32) -> (i32, i32) {
    %c0_i32 = arith.constant 0 : i32
    %c0_i32_0 = arith.constant 0 : i32
    %c0_i32_1 = arith.constant 0 : i32
    return %c0_i32, %c0_i32_0 : i32, i32
  }
  func.func @transform_3(%arg0: i32) -> (i32, i32) {
    %c0_i32 = arith.constant 0 : i32
    %c0_i32_0 = arith.constant 0 : i32
    %c0_i32_1 = arith.constant 0 : i32
    return %c0_i32, %c0_i32_0 : i32, i32
  }
  func.func @transform_4(%arg0: i32) -> (i32, i32) {
    %c0_i32 = arith.constant 0 : i32
    %c0_i32_0 = arith.constant 0 : i32
    %c0_i32_1 = arith.constant 0 : i32
    return %c0_i32, %c0_i32_0 : i32, i32
  }
  func.func @transform_5(%arg0: i32) -> (i32, i32) {
    %c0_i32 = arith.constant 0 : i32
    %c0_i32_0 = arith.constant 0 : i32
    %c0_i32_1 = arith.constant 0 : i32
    return %c0_i32, %c0_i32_0 : i32, i32
  }
  func.func @transform_6(%arg0: i32) -> (i32, i32) {
    %c0_i32 = arith.constant 0 : i32
    %c0_i32_0 = arith.constant 0 : i32
    %c0_i32_1 = arith.constant 0 : i32
    return %c0_i32, %c0_i32_0 : i32, i32
  }
  func.func @transform_7(%arg0: i32) -> (i32, i32, i32) {
    %c0_i32 = arith.constant 0 : i32
    %c0_i32_0 = arith.constant 0 : i32
    %c0_i32_1 = arith.constant 0 : i32
    return %arg0, %c0_i32, %c0_i32_0 : i32, i32, i32
  }
}

module attributes {stable_mosaic.version = 11 : i64} {
  func.func @_ffn_kernel(%arg0: i32, %arg1: memref<1x8x128xf32, #tpu.memory_space<vmem>>, %arg2: memref<1x128xf32, #tpu.memory_space<vmem>>, %arg3: memref<1x128xf32, #tpu.memory_space<vmem>>, %arg4: memref<128x256xf32, #tpu.memory_space<vmem>>, %arg5: memref<1x256xf32, #tpu.memory_space<vmem>>, %arg6: memref<256x128xf32, #tpu.memory_space<vmem>>, %arg7: memref<1x128xf32, #tpu.memory_space<vmem>>, %arg8: memref<1x8x128xf32, #tpu.memory_space<vmem>>) attributes {dimension_semantics = [#tpu.dimension_semantics<parallel>], iteration_bounds = array<i64: 2>, scalar_prefetch = 0 : i64, scratch_operands = 0 : i64, tpu.core_type = #tpu.core_type<tc>, window_params = [{transform_indices = @transform_0, window_bounds = array<i64: 1, 8, 128>}, {pipeline_mode = #tpu.pipeline_mode<synchronous>, transform_indices = @transform_1, window_bounds = array<i64: 1, 128>}, {pipeline_mode = #tpu.pipeline_mode<synchronous>, transform_indices = @transform_2, window_bounds = array<i64: 1, 128>}, {pipeline_mode = #tpu.pipeline_mode<synchronous>, transform_indices = @transform_3, window_bounds = array<i64: 128, 256>}, {pipeline_mode = #tpu.pipeline_mode<synchronous>, transform_indices = @transform_4, window_bounds = array<i64: 1, 256>}, {pipeline_mode = #tpu.pipeline_mode<synchronous>, transform_indices = @transform_5, window_bounds = array<i64: 256, 128>}, {pipeline_mode = #tpu.pipeline_mode<synchronous>, transform_indices = @transform_6, window_bounds = array<i64: 1, 128>}, {transform_indices = @transform_7, window_bounds = array<i64: 1, 8, 128>}]} {
    %c0 = arith.constant 0 : index
    %c0_0 = arith.constant 0 : index
    %c0_1 = arith.constant 0 : index
    %0 = vector.load %arg1[%c0, %c0_0, %c0_1] : memref<1x8x128xf32, #tpu.memory_space<vmem>>, vector<1x8x128xf32>
    %1 = vector.shape_cast %0 : vector<1x8x128xf32> to vector<8x128xf32>
    %c0_2 = arith.constant 0 : index
    %c0_3 = arith.constant 0 : index
    %2 = vector.load %arg2[%c0_2, %c0_3] : memref<1x128xf32, #tpu.memory_space<vmem>>, vector<1x128xf32>
    %c0_4 = arith.constant 0 : index
    %c0_5 = arith.constant 0 : index
    %3 = vector.load %arg3[%c0_4, %c0_5] : memref<1x128xf32, #tpu.memory_space<vmem>>, vector<1x128xf32>
    %cst = arith.constant dense<0.000000e+00> : vector<8xf32>
    %4 = vector.multi_reduction <add>, %1, %cst [1] : vector<8x128xf32> to vector<8xf32>
    %5 = vector.shape_cast %4 : vector<8xf32> to vector<8x1xf32>
    %cst_6 = arith.constant 1.280000e+02 : f32
    %6 = vector.broadcast %cst_6 : f32 to vector<8x1xf32>
    %7 = arith.divf %5, %6 : vector<8x1xf32>
    %8 = vector.broadcast %7 : vector<8x1xf32> to vector<8x128xf32>
    %9 = arith.subf %1, %8 : vector<8x128xf32>
    %10 = arith.mulf %9, %9 : vector<8x128xf32>
    %cst_7 = arith.constant dense<0.000000e+00> : vector<8xf32>
    %11 = vector.multi_reduction <add>, %10, %cst_7 [1] : vector<8x128xf32> to vector<8xf32>
    %12 = vector.shape_cast %11 : vector<8xf32> to vector<8x1xf32>
    %cst_8 = arith.constant 1.270000e+02 : f32
    %13 = vector.broadcast %cst_8 : f32 to vector<8x1xf32>
    %14 = arith.divf %12, %13 : vector<8x1xf32>
    %15 = vector.broadcast %2 : vector<1x128xf32> to vector<8x128xf32>
    %16 = arith.mulf %15, %9 : vector<8x128xf32>
    %17 = math.sqrt %14 : vector<8x1xf32>
    %cst_9 = arith.constant 9.99999997E-7 : f32
    %18 = vector.broadcast %cst_9 : f32 to vector<8x1xf32>
    %19 = arith.addf %17, %18 : vector<8x1xf32>
    %20 = vector.broadcast %19 : vector<8x1xf32> to vector<8x128xf32>
    %21 = arith.divf %16, %20 : vector<8x128xf32>
    %22 = vector.broadcast %3 : vector<1x128xf32> to vector<8x128xf32>
    %23 = arith.addf %21, %22 : vector<8x128xf32>
    %c0_10 = arith.constant 0 : index
    %c0_11 = arith.constant 0 : index
    %24 = vector.load %arg4[%c0_10, %c0_11] : memref<128x256xf32, #tpu.memory_space<vmem>>, vector<128x256xf32>
    %cst_12 = arith.constant dense<0.000000e+00> : vector<8x256xf32>
    %25 = tpu.matmul %23, %24, %cst_12 {dimension_numbers = #tpu.dot_dimension_numbers<[1], [0], [0], [1], [0, 0, 1, 1], [], []>} : vector<8x128xf32>, vector<128x256xf32>, vector<8x256xf32> -> vector<8x256xf32>
    %c0_13 = arith.constant 0 : index
    %c0_14 = arith.constant 0 : index
    %26 = vector.load %arg5[%c0_13, %c0_14] : memref<1x256xf32, #tpu.memory_space<vmem>>, vector<1x256xf32>
    %27 = vector.broadcast %26 : vector<1x256xf32> to vector<8x256xf32>
    %28 = arith.addf %25, %27 : vector<8x256xf32>
    %cst_15 = arith.constant 0.000000e+00 : f32
    %29 = vector.broadcast %cst_15 : f32 to vector<8x256xf32>
    %30 = arith.maximumf %28, %29 : vector<8x256xf32>
    %c0_16 = arith.constant 0 : index
    %c0_17 = arith.constant 0 : index
    %31 = vector.load %arg6[%c0_16, %c0_17] : memref<256x128xf32, #tpu.memory_space<vmem>>, vector<256x128xf32>
    %cst_18 = arith.constant dense<0.000000e+00> : vector<8x128xf32>
    %32 = tpu.matmul %30, %31, %cst_18 {dimension_numbers = #tpu.dot_dimension_numbers<[1], [0], [0], [1], [0, 0, 1, 1], [], []>} : vector<8x256xf32>, vector<256x128xf32>, vector<8x128xf32> -> vector<8x128xf32>
    %33 = arith.addf %1, %32 : vector<8x128xf32>
    %c0_19 = arith.constant 0 : index
    %c0_20 = arith.constant 0 : index
    %34 = vector.load %arg7[%c0_19, %c0_20] : memref<1x128xf32, #tpu.memory_space<vmem>>, vector<1x128xf32>
    %35 = vector.broadcast %34 : vector<1x128xf32> to vector<8x128xf32>
    %36 = arith.addf %33, %35 : vector<8x128xf32>
    %c0_21 = arith.constant 0 : index
    %c0_22 = arith.constant 0 : index
    %c0_23 = arith.constant 0 : index
    %37 = vector.load %arg8[%c0_21, %c0_22, %c0_23] : memref<1x8x128xf32, #tpu.memory_space<vmem>>, vector<1x8x128xf32>
    %38 = vector.shape_cast %37 : vector<1x8x128xf32> to vector<8x128xf32>
    %39 = vector.shape_cast %36 : vector<8x128xf32> to vector<1x8x128xf32>
    tpu.vector_store %arg8[%c0_21, %c0_22, %c0_23], %39 {strides = array<i32>} : memref<1x8x128xf32, #tpu.memory_space<vmem>>, vector<1x8x128xf32>,
    return
  }
  func.func @transform_0(%arg0: i32) -> (i32, i32, i32) {
    %c0_i32 = arith.constant 0 : i32
    %c0_i32_0 = arith.constant 0 : i32
    %c0_i32_1 = arith.constant 0 : i32
    return %arg0, %c0_i32, %c0_i32_0 : i32, i32, i32
  }
  func.func @transform_1(%arg0: i32) -> (i32, i32) {
    %c0_i32 = arith.constant 0 : i32
    %c0_i32_0 = arith.constant 0 : i32
    %c0_i32_1 = arith.constant 0 : i32
    return %c0_i32, %c0_i32_0 : i32, i32
  }
  func.func @transform_2(%arg0: i32) -> (i32, i32) {
    %c0_i32 = arith.constant 0 : i32
    %c0_i32_0 = arith.constant 0 : i32
    %c0_i32_1 = arith.constant 0 : i32
    return %c0_i32, %c0_i32_0 : i32, i32
  }
  func.func @transform_3(%arg0: i32) -> (i32, i32) {
    %c0_i32 = arith.constant 0 : i32
    %c0_i32_0 = arith.constant 0 : i32
    %c0_i32_1 = arith.constant 0 : i32
    return %c0_i32, %c0_i32_0 : i32, i32
  }
  func.func @transform_4(%arg0: i32) -> (i32, i32) {
    %c0_i32 = arith.constant 0 : i32
    %c0_i32_0 = arith.constant 0 : i32
    %c0_i32_1 = arith.constant 0 : i32
    return %c0_i32, %c0_i32_0 : i32, i32
  }
  func.func @transform_5(%arg0: i32) -> (i32, i32) {
    %c0_i32 = arith.constant 0 : i32
    %c0_i32_0 = arith.constant 0 : i32
    %c0_i32_1 = arith.constant 0 : i32
    return %c0_i32, %c0_i32_0 : i32, i32
  }
  func.func @transform_6(%arg0: i32) -> (i32, i32) {
    %c0_i32 = arith.constant 0 : i32
    %c0_i32_0 = arith.constant 0 : i32
    %c0_i32_1 = arith.constant 0 : i32
    return %c0_i32, %c0_i32_0 : i32, i32
  }
  func.func @transform_7(%arg0: i32) -> (i32, i32, i32) {
    %c0_i32 = arith.constant 0 : i32
    %c0_i32_0 = arith.constant 0 : i32
    %c0_i32_1 = arith.constant 0 : i32
    return %arg0, %c0_i32, %c0_i32_0 : i32, i32, i32
  }
}

module attributes {stable_mosaic.version = 11 : i64} {
  func.func @_final_norm_kernel(%arg0: i32, %arg1: memref<1x8x128xf32, #tpu.memory_space<vmem>>, %arg2: memref<1x128xf32, #tpu.memory_space<vmem>>, %arg3: memref<1x128xf32, #tpu.memory_space<vmem>>, %arg4: memref<1x8x128xf32, #tpu.memory_space<vmem>>) attributes {dimension_semantics = [#tpu.dimension_semantics<parallel>], iteration_bounds = array<i64: 2>, scalar_prefetch = 0 : i64, scratch_operands = 0 : i64, tpu.core_type = #tpu.core_type<tc>, window_params = [{transform_indices = @transform_0, window_bounds = array<i64: 1, 8, 128>}, {pipeline_mode = #tpu.pipeline_mode<synchronous>, transform_indices = @transform_1, window_bounds = array<i64: 1, 128>}, {pipeline_mode = #tpu.pipeline_mode<synchronous>, transform_indices = @transform_2, window_bounds = array<i64: 1, 128>}, {transform_indices = @transform_3, window_bounds = array<i64: 1, 8, 128>}]} {
    %c0 = arith.constant 0 : index
    %c0_0 = arith.constant 0 : index
    %c0_1 = arith.constant 0 : index
    %0 = vector.load %arg1[%c0, %c0_0, %c0_1] : memref<1x8x128xf32, #tpu.memory_space<vmem>>, vector<1x8x128xf32>
    %1 = vector.shape_cast %0 : vector<1x8x128xf32> to vector<8x128xf32>
    %c0_2 = arith.constant 0 : index
    %c0_3 = arith.constant 0 : index
    %2 = vector.load %arg2[%c0_2, %c0_3] : memref<1x128xf32, #tpu.memory_space<vmem>>, vector<1x128xf32>
    %c0_4 = arith.constant 0 : index
    %c0_5 = arith.constant 0 : index
    %3 = vector.load %arg3[%c0_4, %c0_5] : memref<1x128xf32, #tpu.memory_space<vmem>>, vector<1x128xf32>
    %cst = arith.constant dense<0.000000e+00> : vector<8xf32>
    %4 = vector.multi_reduction <add>, %1, %cst [1] : vector<8x128xf32> to vector<8xf32>
    %5 = vector.shape_cast %4 : vector<8xf32> to vector<8x1xf32>
    %cst_6 = arith.constant 1.280000e+02 : f32
    %6 = vector.broadcast %cst_6 : f32 to vector<8x1xf32>
    %7 = arith.divf %5, %6 : vector<8x1xf32>
    %8 = vector.broadcast %7 : vector<8x1xf32> to vector<8x128xf32>
    %9 = arith.subf %1, %8 : vector<8x128xf32>
    %10 = arith.mulf %9, %9 : vector<8x128xf32>
    %cst_7 = arith.constant dense<0.000000e+00> : vector<8xf32>
    %11 = vector.multi_reduction <add>, %10, %cst_7 [1] : vector<8x128xf32> to vector<8xf32>
    %12 = vector.shape_cast %11 : vector<8xf32> to vector<8x1xf32>
    %cst_8 = arith.constant 1.270000e+02 : f32
    %13 = vector.broadcast %cst_8 : f32 to vector<8x1xf32>
    %14 = arith.divf %12, %13 : vector<8x1xf32>
    %15 = vector.broadcast %2 : vector<1x128xf32> to vector<8x128xf32>
    %16 = arith.mulf %15, %9 : vector<8x128xf32>
    %17 = math.sqrt %14 : vector<8x1xf32>
    %cst_9 = arith.constant 9.99999997E-7 : f32
    %18 = vector.broadcast %cst_9 : f32 to vector<8x1xf32>
    %19 = arith.addf %17, %18 : vector<8x1xf32>
    %20 = vector.broadcast %19 : vector<8x1xf32> to vector<8x128xf32>
    %21 = arith.divf %16, %20 : vector<8x128xf32>
    %22 = vector.broadcast %3 : vector<1x128xf32> to vector<8x128xf32>
    %23 = arith.addf %21, %22 : vector<8x128xf32>
    %c0_10 = arith.constant 0 : index
    %c0_11 = arith.constant 0 : index
    %c0_12 = arith.constant 0 : index
    %24 = vector.load %arg4[%c0_10, %c0_11, %c0_12] : memref<1x8x128xf32, #tpu.memory_space<vmem>>, vector<1x8x128xf32>
    %25 = vector.shape_cast %24 : vector<1x8x128xf32> to vector<8x128xf32>
    %26 = vector.shape_cast %23 : vector<8x128xf32> to vector<1x8x128xf32>
    tpu.vector_store %arg4[%c0_10, %c0_11, %c0_12], %26 {strides = array<i32>} : memref<1x8x128xf32, #tpu.memory_space<vmem>>, vector<1x8x128xf32>,
    return
  }
  func.func @transform_0(%arg0: i32) -> (i32, i32, i32) {
    %c0_i32 = arith.constant 0 : i32
    %c0_i32_0 = arith.constant 0 : i32
    %c0_i32_1 = arith.constant 0 : i32
    return %arg0, %c0_i32, %c0_i32_0 : i32, i32, i32
  }
  func.func @transform_1(%arg0: i32) -> (i32, i32) {
    %c0_i32 = arith.constant 0 : i32
    %c0_i32_0 = arith.constant 0 : i32
    %c0_i32_1 = arith.constant 0 : i32
    return %c0_i32, %c0_i32_0 : i32, i32
  }
  func.func @transform_2(%arg0: i32) -> (i32, i32) {
    %c0_i32 = arith.constant 0 : i32
    %c0_i32_0 = arith.constant 0 : i32
    %c0_i32_1 = arith.constant 0 : i32
    return %c0_i32, %c0_i32_0 : i32, i32
  }
  func.func @transform_3(%arg0: i32) -> (i32, i32, i32) {
    %c0_i32 = arith.constant 0 : i32
    %c0_i32_0 = arith.constant 0 : i32
    %c0_i32_1 = arith.constant 0 : i32
    return %arg0, %c0_i32, %c0_i32_0 : i32, i32, i32
  }
}

module attributes {stable_mosaic.version = 11 : i64} {
  func.func @_self_attn_kernel(%arg0: i32, %arg1: memref<1x8x128xf32, #tpu.memory_space<vmem>>, %arg2: memref<1x8x8xf32, #tpu.memory_space<vmem>>, %arg3: memref<1x128xf32, #tpu.memory_space<vmem>>, %arg4: memref<1x128xf32, #tpu.memory_space<vmem>>, %arg5: memref<128x384xf32, #tpu.memory_space<vmem>>, %arg6: memref<1x384xf32, #tpu.memory_space<vmem>>, %arg7: memref<128x128xf32, #tpu.memory_space<vmem>>, %arg8: memref<1x128xf32, #tpu.memory_space<vmem>>, %arg9: memref<1x8x128xf32, #tpu.memory_space<vmem>>) attributes {dimension_semantics = [#tpu.dimension_semantics<parallel>], iteration_bounds = array<i64: 2>, scalar_prefetch = 0 : i64, scratch_operands = 0 : i64, tpu.core_type = #tpu.core_type<tc>, window_params = [{transform_indices = @transform_0, window_bounds = array<i64: 1, 8, 128>}, {transform_indices = @transform_1, window_bounds = array<i64: 1, 8, 8>}, {pipeline_mode = #tpu.pipeline_mode<synchronous>, transform_indices = @transform_2, window_bounds = array<i64: 1, 128>}, {pipeline_mode = #tpu.pipeline_mode<synchronous>, transform_indices = @transform_3, window_bounds = array<i64: 1, 128>}, {pipeline_mode = #tpu.pipeline_mode<synchronous>, transform_indices = @transform_4, window_bounds = array<i64: 128, 384>}, {pipeline_mode = #tpu.pipeline_mode<synchronous>, transform_indices = @transform_5, window_bounds = array<i64: 1, 384>}, {pipeline_mode = #tpu.pipeline_mode<synchronous>, transform_indices = @transform_6, window_bounds = array<i64: 128, 128>}, {pipeline_mode = #tpu.pipeline_mode<synchronous>, transform_indices = @transform_7, window_bounds = array<i64: 1, 128>}, {transform_indices = @transform_8, window_bounds = array<i64: 1, 8, 128>}]} {
    %c0 = arith.constant 0 : index
    %c0_0 = arith.constant 0 : index
    %c0_1 = arith.constant 0 : index
    %0 = vector.load %arg1[%c0, %c0_0, %c0_1] : memref<1x8x128xf32, #tpu.memory_space<vmem>>, vector<1x8x128xf32>
    %1 = vector.shape_cast %0 : vector<1x8x128xf32> to vector<8x128xf32>
    %c0_2 = arith.constant 0 : index
    %c0_3 = arith.constant 0 : index
    %2 = vector.load %arg3[%c0_2, %c0_3] : memref<1x128xf32, #tpu.memory_space<vmem>>, vector<1x128xf32>
    %c0_4 = arith.constant 0 : index
    %c0_5 = arith.constant 0 : index
    %3 = vector.load %arg4[%c0_4, %c0_5] : memref<1x128xf32, #tpu.memory_space<vmem>>, vector<1x128xf32>
    %cst = arith.constant dense<0.000000e+00> : vector<8xf32>
    %4 = vector.multi_reduction <add>, %1, %cst [1] : vector<8x128xf32> to vector<8xf32>
    %5 = vector.shape_cast %4 : vector<8xf32> to vector<8x1xf32>
    %cst_6 = arith.constant 1.280000e+02 : f32
    %6 = vector.broadcast %cst_6 : f32 to vector<8x1xf32>
    %7 = arith.divf %5, %6 : vector<8x1xf32>
    %8 = vector.broadcast %7 : vector<8x1xf32> to vector<8x128xf32>
    %9 = arith.subf %1, %8 : vector<8x128xf32>
    %10 = arith.mulf %9, %9 : vector<8x128xf32>
    %cst_7 = arith.constant dense<0.000000e+00> : vector<8xf32>
    %11 = vector.multi_reduction <add>, %10, %cst_7 [1] : vector<8x128xf32> to vector<8xf32>
    %12 = vector.shape_cast %11 : vector<8xf32> to vector<8x1xf32>
    %cst_8 = arith.constant 1.270000e+02 : f32
    %13 = vector.broadcast %cst_8 : f32 to vector<8x1xf32>
    %14 = arith.divf %12, %13 : vector<8x1xf32>
    %15 = vector.broadcast %2 : vector<1x128xf32> to vector<8x128xf32>
    %16 = arith.mulf %15, %9 : vector<8x128xf32>
    %17 = math.sqrt %14 : vector<8x1xf32>
    %cst_9 = arith.constant 9.99999997E-7 : f32
    %18 = vector.broadcast %cst_9 : f32 to vector<8x1xf32>
    %19 = arith.addf %17, %18 : vector<8x1xf32>
    %20 = vector.broadcast %19 : vector<8x1xf32> to vector<8x128xf32>
    %21 = arith.divf %16, %20 : vector<8x128xf32>
    %22 = vector.broadcast %3 : vector<1x128xf32> to vector<8x128xf32>
    %23 = arith.addf %21, %22 : vector<8x128xf32>
    %c0_10 = arith.constant 0 : index
    %c0_11 = arith.constant 0 : index
    %24 = vector.load %arg5[%c0_10, %c0_11] : memref<128x384xf32, #tpu.memory_space<vmem>>, vector<128x384xf32>
    %cst_12 = arith.constant dense<0.000000e+00> : vector<8x384xf32>
    %25 = tpu.matmul %23, %24, %cst_12 {dimension_numbers = #tpu.dot_dimension_numbers<[1], [0], [0], [1], [0, 0, 1, 1], [], []>} : vector<8x128xf32>, vector<128x384xf32>, vector<8x384xf32> -> vector<8x384xf32>
    %c0_13 = arith.constant 0 : index
    %c0_14 = arith.constant 0 : index
    %26 = vector.load %arg6[%c0_13, %c0_14] : memref<1x384xf32, #tpu.memory_space<vmem>>, vector<1x384xf32>
    %27 = vector.broadcast %26 : vector<1x384xf32> to vector<8x384xf32>
    %28 = arith.addf %25, %27 : vector<8x384xf32>
    %29 = vector.extract_strided_slice %28 {offsets = [0, 0], sizes = [8, 128], strides = [1, 1]} : vector<8x384xf32> to vector<8x128xf32>
    %30 = vector.extract_strided_slice %28 {offsets = [0, 128], sizes = [8, 128], strides = [1, 1]} : vector<8x384xf32> to vector<8x128xf32>
    %31 = vector.extract_strided_slice %28 {offsets = [0, 256], sizes = [8, 128], strides = [1, 1]} : vector<8x384xf32> to vector<8x128xf32>
    %c0_15 = arith.constant 0 : index
    %c0_16 = arith.constant 0 : index
    %c0_17 = arith.constant 0 : index
    %32 = vector.load %arg2[%c0_15, %c0_16, %c0_17] : memref<1x8x8xf32, #tpu.memory_space<vmem>>, vector<1x8x8xf32>
    %33 = vector.shape_cast %32 : vector<1x8x8xf32> to vector<8x8xf32>
    %34 = vector.extract_strided_slice %29 {offsets = [0, 0], sizes = [8, 32], strides = [1, 1]} : vector<8x128xf32> to vector<8x32xf32>
    %35 = vector.extract_strided_slice %30 {offsets = [0, 0], sizes = [8, 32], strides = [1, 1]} : vector<8x128xf32> to vector<8x32xf32>
    %cst_18 = arith.constant dense<0.000000e+00> : vector<8x8xf32>
    %36 = tpu.matmul %34, %35, %cst_18 {dimension_numbers = #tpu.dot_dimension_numbers<[1], [1], [0], [0], [0, 0, 1, 0], [], []>} : vector<8x32xf32>, vector<8x32xf32>, vector<8x8xf32> -> vector<8x8xf32>
    %37 = arith.addf %36, %33 : vector<8x8xf32>
    %cst_19 = arith.constant dense<0xFF800000> : vector<8xf32>
    %38 = vector.multi_reduction <maximumf>, %37, %cst_19 [1] : vector<8x8xf32> to vector<8xf32>
    %39 = vector.shape_cast %38 : vector<8xf32> to vector<8x1xf32>
    %40 = vector.broadcast %39 : vector<8x1xf32> to vector<8x8xf32>
    %41 = arith.subf %37, %40 : vector<8x8xf32>
    %42 = math.exp %41 : vector<8x8xf32>
    %cst_20 = arith.constant dense<0.000000e+00> : vector<8xf32>
    %43 = vector.multi_reduction <add>, %42, %cst_20 [1] : vector<8x8xf32> to vector<8xf32>
    %44 = vector.shape_cast %43 : vector<8xf32> to vector<8x1xf32>
    %45 = tpu.reciprocal %44 {approx = true} : vector<8x1xf32> -> vector<8x1xf32>
    %46 = vector.broadcast %45 : vector<8x1xf32> to vector<8x8xf32>
    %47 = arith.mulf %42, %46 : vector<8x8xf32>
    %48 = vector.extract_strided_slice %31 {offsets = [0, 0], sizes = [8, 32], strides = [1, 1]} : vector<8x128xf32> to vector<8x32xf32>
    %cst_21 = arith.constant dense<0.000000e+00> : vector<8x32xf32>
    %49 = tpu.matmul %47, %48, %cst_21 {dimension_numbers = #tpu.dot_dimension_numbers<[1], [0], [0], [1], [0, 0, 1, 1], [], []>} : vector<8x8xf32>, vector<8x32xf32>, vector<8x32xf32> -> vector<8x32xf32>
    %50 = vector.extract_strided_slice %29 {offsets = [0, 32], sizes = [8, 32], strides = [1, 1]} : vector<8x128xf32> to vector<8x32xf32>
    %51 = vector.extract_strided_slice %30 {offsets = [0, 32], sizes = [8, 32], strides = [1, 1]} : vector<8x128xf32> to vector<8x32xf32>
    %cst_22 = arith.constant dense<0.000000e+00> : vector<8x8xf32>
    %52 = tpu.matmul %50, %51, %cst_22 {dimension_numbers = #tpu.dot_dimension_numbers<[1], [1], [0], [0], [0, 0, 1, 0], [], []>} : vector<8x32xf32>, vector<8x32xf32>, vector<8x8xf32> -> vector<8x8xf32>
    %53 = arith.addf %52, %33 : vector<8x8xf32>
    %cst_23 = arith.constant dense<0xFF800000> : vector<8xf32>
    %54 = vector.multi_reduction <maximumf>, %53, %cst_23 [1] : vector<8x8xf32> to vector<8xf32>
    %55 = vector.shape_cast %54 : vector<8xf32> to vector<8x1xf32>
    %56 = vector.broadcast %55 : vector<8x1xf32> to vector<8x8xf32>
    %57 = arith.subf %53, %56 : vector<8x8xf32>
    %58 = math.exp %57 : vector<8x8xf32>
    %cst_24 = arith.constant dense<0.000000e+00> : vector<8xf32>
    %59 = vector.multi_reduction <add>, %58, %cst_24 [1] : vector<8x8xf32> to vector<8xf32>
    %60 = vector.shape_cast %59 : vector<8xf32> to vector<8x1xf32>
    %61 = tpu.reciprocal %60 {approx = true} : vector<8x1xf32> -> vector<8x1xf32>
    %62 = vector.broadcast %61 : vector<8x1xf32> to vector<8x8xf32>
    %63 = arith.mulf %58, %62 : vector<8x8xf32>
    %64 = vector.extract_strided_slice %31 {offsets = [0, 32], sizes = [8, 32], strides = [1, 1]} : vector<8x128xf32> to vector<8x32xf32>
    %cst_25 = arith.constant dense<0.000000e+00> : vector<8x32xf32>
    %65 = tpu.matmul %63, %64, %cst_25 {dimension_numbers = #tpu.dot_dimension_numbers<[1], [0], [0], [1], [0, 0, 1, 1], [], []>} : vector<8x8xf32>, vector<8x32xf32>, vector<8x32xf32> -> vector<8x32xf32>
    %66 = vector.extract_strided_slice %29 {offsets = [0, 64], sizes = [8, 32], strides = [1, 1]} : vector<8x128xf32> to vector<8x32xf32>
    %67 = vector.extract_strided_slice %30 {offsets = [0, 64], sizes = [8, 32], strides = [1, 1]} : vector<8x128xf32> to vector<8x32xf32>
    %cst_26 = arith.constant dense<0.000000e+00> : vector<8x8xf32>
    %68 = tpu.matmul %66, %67, %cst_26 {dimension_numbers = #tpu.dot_dimension_numbers<[1], [1], [0], [0], [0, 0, 1, 0], [], []>} : vector<8x32xf32>, vector<8x32xf32>, vector<8x8xf32> -> vector<8x8xf32>
    %69 = arith.addf %68, %33 : vector<8x8xf32>
    %cst_27 = arith.constant dense<0xFF800000> : vector<8xf32>
    %70 = vector.multi_reduction <maximumf>, %69, %cst_27 [1] : vector<8x8xf32> to vector<8xf32>
    %71 = vector.shape_cast %70 : vector<8xf32> to vector<8x1xf32>
    %72 = vector.broadcast %71 : vector<8x1xf32> to vector<8x8xf32>
    %73 = arith.subf %69, %72 : vector<8x8xf32>
    %74 = math.exp %73 : vector<8x8xf32>
    %cst_28 = arith.constant dense<0.000000e+00> : vector<8xf32>
    %75 = vector.multi_reduction <add>, %74, %cst_28 [1] : vector<8x8xf32> to vector<8xf32>
    %76 = vector.shape_cast %75 : vector<8xf32> to vector<8x1xf32>
    %77 = tpu.reciprocal %76 {approx = true} : vector<8x1xf32> -> vector<8x1xf32>
    %78 = vector.broadcast %77 : vector<8x1xf32> to vector<8x8xf32>
    %79 = arith.mulf %74, %78 : vector<8x8xf32>
    %80 = vector.extract_strided_slice %31 {offsets = [0, 64], sizes = [8, 32], strides = [1, 1]} : vector<8x128xf32> to vector<8x32xf32>
    %cst_29 = arith.constant dense<0.000000e+00> : vector<8x32xf32>
    %81 = tpu.matmul %79, %80, %cst_29 {dimension_numbers = #tpu.dot_dimension_numbers<[1], [0], [0], [1], [0, 0, 1, 1], [], []>} : vector<8x8xf32>, vector<8x32xf32>, vector<8x32xf32> -> vector<8x32xf32>
    %82 = vector.extract_strided_slice %29 {offsets = [0, 96], sizes = [8, 32], strides = [1, 1]} : vector<8x128xf32> to vector<8x32xf32>
    %83 = vector.extract_strided_slice %30 {offsets = [0, 96], sizes = [8, 32], strides = [1, 1]} : vector<8x128xf32> to vector<8x32xf32>
    %cst_30 = arith.constant dense<0.000000e+00> : vector<8x8xf32>
    %84 = tpu.matmul %82, %83, %cst_30 {dimension_numbers = #tpu.dot_dimension_numbers<[1], [1], [0], [0], [0, 0, 1, 0], [], []>} : vector<8x32xf32>, vector<8x32xf32>, vector<8x8xf32> -> vector<8x8xf32>
    %85 = arith.addf %84, %33 : vector<8x8xf32>
    %cst_31 = arith.constant dense<0xFF800000> : vector<8xf32>
    %86 = vector.multi_reduction <maximumf>, %85, %cst_31 [1] : vector<8x8xf32> to vector<8xf32>
    %87 = vector.shape_cast %86 : vector<8xf32> to vector<8x1xf32>
    %88 = vector.broadcast %87 : vector<8x1xf32> to vector<8x8xf32>
    %89 = arith.subf %85, %88 : vector<8x8xf32>
    %90 = math.exp %89 : vector<8x8xf32>
    %cst_32 = arith.constant dense<0.000000e+00> : vector<8xf32>
    %91 = vector.multi_reduction <add>, %90, %cst_32 [1] : vector<8x8xf32> to vector<8xf32>
    %92 = vector.shape_cast %91 : vector<8xf32> to vector<8x1xf32>
    %93 = tpu.reciprocal %92 {approx = true} : vector<8x1xf32> -> vector<8x1xf32>
    %94 = vector.broadcast %93 : vector<8x1xf32> to vector<8x8xf32>
    %95 = arith.mulf %90, %94 : vector<8x8xf32>
    %96 = vector.extract_strided_slice %31 {offsets = [0, 96], sizes = [8, 32], strides = [1, 1]} : vector<8x128xf32> to vector<8x32xf32>
    %cst_33 = arith.constant dense<0.000000e+00> : vector<8x32xf32>
    %97 = tpu.matmul %95, %96, %cst_33 {dimension_numbers = #tpu.dot_dimension_numbers<[1], [0], [0], [1], [0, 0, 1, 1], [], []>} : vector<8x8xf32>, vector<8x32xf32>, vector<8x32xf32> -> vector<8x32xf32>
    %98 = tpu.concatenate %49, %65, %81, %97 in 1 : vector<8x32xf32>, vector<8x32xf32>, vector<8x32xf32>, vector<8x32xf32> -> vector<8x128xf32>
    %c0_34 = arith.constant 0 : index
    %c0_35 = arith.constant 0 : index
    %99 = vector.load %arg7[%c0_34, %c0_35] : memref<128x128xf32, #tpu.memory_space<vmem>>, vector<128x128xf32>
    %cst_36 = arith.constant dense<0.000000e+00> : vector<8x128xf32>
    %100 = tpu.matmul %98, %99, %cst_36 {dimension_numbers = #tpu.dot_dimension_numbers<[1], [0], [0], [1], [0, 0, 1, 1], [], []>} : vector<8x128xf32>, vector<128x128xf32>, vector<8x128xf32> -> vector<8x128xf32>
    %101 = arith.addf %1, %100 : vector<8x128xf32>
    %c0_37 = arith.constant 0 : index
    %c0_38 = arith.constant 0 : index
    %102 = vector.load %arg8[%c0_37, %c0_38] : memref<1x128xf32, #tpu.memory_space<vmem>>, vector<1x128xf32>
    %103 = vector.broadcast %102 : vector<1x128xf32> to vector<8x128xf32>
    %104 = arith.addf %101, %103 : vector<8x128xf32>
    %c0_39 = arith.constant 0 : index
    %c0_40 = arith.constant 0 : index
    %c0_41 = arith.constant 0 : index
    %105 = vector.load %arg9[%c0_39, %c0_40, %c0_41] : memref<1x8x128xf32, #tpu.memory_space<vmem>>, vector<1x8x128xf32>
    %106 = vector.shape_cast %105 : vector<1x8x128xf32> to vector<8x128xf32>
    %107 = vector.shape_cast %104 : vector<8x128xf32> to vector<1x8x128xf32>
    tpu.vector_store %arg9[%c0_39, %c0_40, %c0_41], %107 {strides = array<i32>} : memref<1x8x128xf32, #tpu.memory_space<vmem>>, vector<1x8x128xf32>,
    return
  }
  func.func @transform_0(%arg0: i32) -> (i32, i32, i32) {
    %c0_i32 = arith.constant 0 : i32
    %c0_i32_0 = arith.constant 0 : i32
    %c0_i32_1 = arith.constant 0 : i32
    return %arg0, %c0_i32, %c0_i32_0 : i32, i32, i32
  }
  func.func @transform_1(%arg0: i32) -> (i32, i32, i32) {
    %c0_i32 = arith.constant 0 : i32
    %c0_i32_0 = arith.constant 0 : i32
    %c0_i32_1 = arith.constant 0 : i32
    return %arg0, %c0_i32, %c0_i32_0 : i32, i32, i32
  }
  func.func @transform_2(%arg0: i32) -> (i32, i32) {
    %c0_i32 = arith.constant 0 : i32
    %c0_i32_0 = arith.constant 0 : i32
    %c0_i32_1 = arith.constant 0 : i32
    return %c0_i32, %c0_i32_0 : i32, i32
  }
  func.func @transform_3(%arg0: i32) -> (i32, i32) {
    %c0_i32 = arith.constant 0 : i32
    %c0_i32_0 = arith.constant 0 : i32
    %c0_i32_1 = arith.constant 0 : i32
    return %c0_i32, %c0_i32_0 : i32, i32
  }
  func.func @transform_4(%arg0: i32) -> (i32, i32) {
    %c0_i32 = arith.constant 0 : i32
    %c0_i32_0 = arith.constant 0 : i32
    %c0_i32_1 = arith.constant 0 : i32
    return %c0_i32, %c0_i32_0 : i32, i32
  }
  func.func @transform_5(%arg0: i32) -> (i32, i32) {
    %c0_i32 = arith.constant 0 : i32
    %c0_i32_0 = arith.constant 0 : i32
    %c0_i32_1 = arith.constant 0 : i32
    return %c0_i32, %c0_i32_0 : i32, i32
  }
  func.func @transform_6(%arg0: i32) -> (i32, i32) {
    %c0_i32 = arith.constant 0 : i32
    %c0_i32_0 = arith.constant 0 : i32
    %c0_i32_1 = arith.constant 0 : i32
    return %c0_i32, %c0_i32_0 : i32, i32
  }
  func.func @transform_7(%arg0: i32) -> (i32, i32) {
    %c0_i32 = arith.constant 0 : i32
    %c0_i32_0 = arith.constant 0 : i32
    %c0_i32_1 = arith.constant 0 : i32
    return %c0_i32, %c0_i32_0 : i32, i32
  }
  func.func @transform_8(%arg0: i32) -> (i32, i32, i32) {
    %c0_i32 = arith.constant 0 : i32
    %c0_i32_0 = arith.constant 0 : i32
    %c0_i32_1 = arith.constant 0 : i32
    return %arg0, %c0_i32, %c0_i32_0 : i32, i32, i32
  }
}

module attributes {stable_mosaic.version = 11 : i64} {
  func.func @_cross_attn_kernel(%arg0: i32, %arg1: memref<1x8x128xf32, #tpu.memory_space<vmem>>, %arg2: memref<1x8x128xf32, #tpu.memory_space<vmem>>, %arg3: memref<1x8x8xf32, #tpu.memory_space<vmem>>, %arg4: memref<1x128xf32, #tpu.memory_space<vmem>>, %arg5: memref<1x128xf32, #tpu.memory_space<vmem>>, %arg6: memref<128x128xf32, #tpu.memory_space<vmem>>, %arg7: memref<1x128xf32, #tpu.memory_space<vmem>>, %arg8: memref<128x256xf32, #tpu.memory_space<vmem>>, %arg9: memref<1x256xf32, #tpu.memory_space<vmem>>, %arg10: memref<128x128xf32, #tpu.memory_space<vmem>>, %arg11: memref<1x128xf32, #tpu.memory_space<vmem>>, %arg12: memref<1x8x128xf32, #tpu.memory_space<vmem>>) attributes {dimension_semantics = [#tpu.dimension_semantics<parallel>], iteration_bounds = array<i64: 2>, scalar_prefetch = 0 : i64, scratch_operands = 0 : i64, tpu.core_type = #tpu.core_type<tc>, window_params = [{transform_indices = @transform_0, window_bounds = array<i64: 1, 8, 128>}, {transform_indices = @transform_1, window_bounds = array<i64: 1, 8, 128>}, {transform_indices = @transform_2, window_bounds = array<i64: 1, 8, 8>}, {pipeline_mode = #tpu.pipeline_mode<synchronous>, transform_indices = @transform_3, window_bounds = array<i64: 1, 128>}, {pipeline_mode = #tpu.pipeline_mode<synchronous>, transform_indices = @transform_4, window_bounds = array<i64: 1, 128>}, {pipeline_mode = #tpu.pipeline_mode<synchronous>, transform_indices = @transform_5, window_bounds = array<i64: 128, 128>}, {pipeline_mode = #tpu.pipeline_mode<synchronous>, transform_indices = @transform_6, window_bounds = array<i64: 1, 128>}, {pipeline_mode = #tpu.pipeline_mode<synchronous>, transform_indices = @transform_7, window_bounds = array<i64: 128, 256>}, {pipeline_mode = #tpu.pipeline_mode<synchronous>, transform_indices = @transform_8, window_bounds = array<i64: 1, 256>}, {pipeline_mode = #tpu.pipeline_mode<synchronous>, transform_indices = @transform_9, window_bounds = array<i64: 128, 128>}, {pipeline_mode = #tpu.pipeline_mode<synchronous>, transform_indices = @transform_10, window_bounds = array<i64: 1, 128>}, {transform_indices = @transform_11, window_bounds = array<i64: 1, 8, 128>}]} {
    %c0 = arith.constant 0 : index
    %c0_0 = arith.constant 0 : index
    %c0_1 = arith.constant 0 : index
    %0 = vector.load %arg1[%c0, %c0_0, %c0_1] : memref<1x8x128xf32, #tpu.memory_space<vmem>>, vector<1x8x128xf32>
    %1 = vector.shape_cast %0 : vector<1x8x128xf32> to vector<8x128xf32>
    %c0_2 = arith.constant 0 : index
    %c0_3 = arith.constant 0 : index
    %2 = vector.load %arg4[%c0_2, %c0_3] : memref<1x128xf32, #tpu.memory_space<vmem>>, vector<1x128xf32>
    %c0_4 = arith.constant 0 : index
    %c0_5 = arith.constant 0 : index
    %3 = vector.load %arg5[%c0_4, %c0_5] : memref<1x128xf32, #tpu.memory_space<vmem>>, vector<1x128xf32>
    %cst = arith.constant dense<0.000000e+00> : vector<8xf32>
    %4 = vector.multi_reduction <add>, %1, %cst [1] : vector<8x128xf32> to vector<8xf32>
    %5 = vector.shape_cast %4 : vector<8xf32> to vector<8x1xf32>
    %cst_6 = arith.constant 1.280000e+02 : f32
    %6 = vector.broadcast %cst_6 : f32 to vector<8x1xf32>
    %7 = arith.divf %5, %6 : vector<8x1xf32>
    %8 = vector.broadcast %7 : vector<8x1xf32> to vector<8x128xf32>
    %9 = arith.subf %1, %8 : vector<8x128xf32>
    %10 = arith.mulf %9, %9 : vector<8x128xf32>
    %cst_7 = arith.constant dense<0.000000e+00> : vector<8xf32>
    %11 = vector.multi_reduction <add>, %10, %cst_7 [1] : vector<8x128xf32> to vector<8xf32>
    %12 = vector.shape_cast %11 : vector<8xf32> to vector<8x1xf32>
    %cst_8 = arith.constant 1.270000e+02 : f32
    %13 = vector.broadcast %cst_8 : f32 to vector<8x1xf32>
    %14 = arith.divf %12, %13 : vector<8x1xf32>
    %15 = vector.broadcast %2 : vector<1x128xf32> to vector<8x128xf32>
    %16 = arith.mulf %15, %9 : vector<8x128xf32>
    %17 = math.sqrt %14 : vector<8x1xf32>
    %cst_9 = arith.constant 9.99999997E-7 : f32
    %18 = vector.broadcast %cst_9 : f32 to vector<8x1xf32>
    %19 = arith.addf %17, %18 : vector<8x1xf32>
    %20 = vector.broadcast %19 : vector<8x1xf32> to vector<8x128xf32>
    %21 = arith.divf %16, %20 : vector<8x128xf32>
    %22 = vector.broadcast %3 : vector<1x128xf32> to vector<8x128xf32>
    %23 = arith.addf %21, %22 : vector<8x128xf32>
    %c0_10 = arith.constant 0 : index
    %c0_11 = arith.constant 0 : index
    %24 = vector.load %arg6[%c0_10, %c0_11] : memref<128x128xf32, #tpu.memory_space<vmem>>, vector<128x128xf32>
    %cst_12 = arith.constant dense<0.000000e+00> : vector<8x128xf32>
    %25 = tpu.matmul %23, %24, %cst_12 {dimension_numbers = #tpu.dot_dimension_numbers<[1], [0], [0], [1], [0, 0, 1, 1], [], []>} : vector<8x128xf32>, vector<128x128xf32>, vector<8x128xf32> -> vector<8x128xf32>
    %c0_13 = arith.constant 0 : index
    %c0_14 = arith.constant 0 : index
    %26 = vector.load %arg7[%c0_13, %c0_14] : memref<1x128xf32, #tpu.memory_space<vmem>>, vector<1x128xf32>
    %27 = vector.broadcast %26 : vector<1x128xf32> to vector<8x128xf32>
    %28 = arith.addf %25, %27 : vector<8x128xf32>
    %c0_15 = arith.constant 0 : index
    %c0_16 = arith.constant 0 : index
    %c0_17 = arith.constant 0 : index
    %29 = vector.load %arg2[%c0_15, %c0_16, %c0_17] : memref<1x8x128xf32, #tpu.memory_space<vmem>>, vector<1x8x128xf32>
    %30 = vector.shape_cast %29 : vector<1x8x128xf32> to vector<8x128xf32>
    %c0_18 = arith.constant 0 : index
    %c0_19 = arith.constant 0 : index
    %31 = vector.load %arg8[%c0_18, %c0_19] : memref<128x256xf32, #tpu.memory_space<vmem>>, vector<128x256xf32>
    %cst_20 = arith.constant dense<0.000000e+00> : vector<8x256xf32>
    %32 = tpu.matmul %30, %31, %cst_20 {dimension_numbers = #tpu.dot_dimension_numbers<[1], [0], [0], [1], [0, 0, 1, 1], [], []>} : vector<8x128xf32>, vector<128x256xf32>, vector<8x256xf32> -> vector<8x256xf32>
    %c0_21 = arith.constant 0 : index
    %c0_22 = arith.constant 0 : index
    %33 = vector.load %arg9[%c0_21, %c0_22] : memref<1x256xf32, #tpu.memory_space<vmem>>, vector<1x256xf32>
    %34 = vector.broadcast %33 : vector<1x256xf32> to vector<8x256xf32>
    %35 = arith.addf %32, %34 : vector<8x256xf32>
    %36 = vector.extract_strided_slice %35 {offsets = [0, 0], sizes = [8, 128], strides = [1, 1]} : vector<8x256xf32> to vector<8x128xf32>
    %37 = vector.extract_strided_slice %35 {offsets = [0, 128], sizes = [8, 128], strides = [1, 1]} : vector<8x256xf32> to vector<8x128xf32>
    %c0_23 = arith.constant 0 : index
    %c0_24 = arith.constant 0 : index
    %c0_25 = arith.constant 0 : index
    %38 = vector.load %arg3[%c0_23, %c0_24, %c0_25] : memref<1x8x8xf32, #tpu.memory_space<vmem>>, vector<1x8x8xf32>
    %39 = vector.shape_cast %38 : vector<1x8x8xf32> to vector<8x8xf32>
    %40 = vector.extract_strided_slice %28 {offsets = [0, 0], sizes = [8, 32], strides = [1, 1]} : vector<8x128xf32> to vector<8x32xf32>
    %41 = vector.extract_strided_slice %36 {offsets = [0, 0], sizes = [8, 32], strides = [1, 1]} : vector<8x128xf32> to vector<8x32xf32>
    %cst_26 = arith.constant dense<0.000000e+00> : vector<8x8xf32>
    %42 = tpu.matmul %40, %41, %cst_26 {dimension_numbers = #tpu.dot_dimension_numbers<[1], [1], [0], [0], [0, 0, 1, 0], [], []>} : vector<8x32xf32>, vector<8x32xf32>, vector<8x8xf32> -> vector<8x8xf32>
    %43 = arith.addf %42, %39 : vector<8x8xf32>
    %cst_27 = arith.constant dense<0xFF800000> : vector<8xf32>
    %44 = vector.multi_reduction <maximumf>, %43, %cst_27 [1] : vector<8x8xf32> to vector<8xf32>
    %45 = vector.shape_cast %44 : vector<8xf32> to vector<8x1xf32>
    %46 = vector.broadcast %45 : vector<8x1xf32> to vector<8x8xf32>
    %47 = arith.subf %43, %46 : vector<8x8xf32>
    %48 = math.exp %47 : vector<8x8xf32>
    %cst_28 = arith.constant dense<0.000000e+00> : vector<8xf32>
    %49 = vector.multi_reduction <add>, %48, %cst_28 [1] : vector<8x8xf32> to vector<8xf32>
    %50 = vector.shape_cast %49 : vector<8xf32> to vector<8x1xf32>
    %51 = tpu.reciprocal %50 {approx = true} : vector<8x1xf32> -> vector<8x1xf32>
    %52 = vector.broadcast %51 : vector<8x1xf32> to vector<8x8xf32>
    %53 = arith.mulf %48, %52 : vector<8x8xf32>
    %54 = vector.extract_strided_slice %37 {offsets = [0, 0], sizes = [8, 32], strides = [1, 1]} : vector<8x128xf32> to vector<8x32xf32>
    %cst_29 = arith.constant dense<0.000000e+00> : vector<8x32xf32>
    %55 = tpu.matmul %53, %54, %cst_29 {dimension_numbers = #tpu.dot_dimension_numbers<[1], [0], [0], [1], [0, 0, 1, 1], [], []>} : vector<8x8xf32>, vector<8x32xf32>, vector<8x32xf32> -> vector<8x32xf32>
    %56 = vector.extract_strided_slice %28 {offsets = [0, 32], sizes = [8, 32], strides = [1, 1]} : vector<8x128xf32> to vector<8x32xf32>
    %57 = vector.extract_strided_slice %36 {offsets = [0, 32], sizes = [8, 32], strides = [1, 1]} : vector<8x128xf32> to vector<8x32xf32>
    %cst_30 = arith.constant dense<0.000000e+00> : vector<8x8xf32>
    %58 = tpu.matmul %56, %57, %cst_30 {dimension_numbers = #tpu.dot_dimension_numbers<[1], [1], [0], [0], [0, 0, 1, 0], [], []>} : vector<8x32xf32>, vector<8x32xf32>, vector<8x8xf32> -> vector<8x8xf32>
    %59 = arith.addf %58, %39 : vector<8x8xf32>
    %cst_31 = arith.constant dense<0xFF800000> : vector<8xf32>
    %60 = vector.multi_reduction <maximumf>, %59, %cst_31 [1] : vector<8x8xf32> to vector<8xf32>
    %61 = vector.shape_cast %60 : vector<8xf32> to vector<8x1xf32>
    %62 = vector.broadcast %61 : vector<8x1xf32> to vector<8x8xf32>
    %63 = arith.subf %59, %62 : vector<8x8xf32>
    %64 = math.exp %63 : vector<8x8xf32>
    %cst_32 = arith.constant dense<0.000000e+00> : vector<8xf32>
    %65 = vector.multi_reduction <add>, %64, %cst_32 [1] : vector<8x8xf32> to vector<8xf32>
    %66 = vector.shape_cast %65 : vector<8xf32> to vector<8x1xf32>
    %67 = tpu.reciprocal %66 {approx = true} : vector<8x1xf32> -> vector<8x1xf32>
    %68 = vector.broadcast %67 : vector<8x1xf32> to vector<8x8xf32>
    %69 = arith.mulf %64, %68 : vector<8x8xf32>
    %70 = vector.extract_strided_slice %37 {offsets = [0, 32], sizes = [8, 32], strides = [1, 1]} : vector<8x128xf32> to vector<8x32xf32>
    %cst_33 = arith.constant dense<0.000000e+00> : vector<8x32xf32>
    %71 = tpu.matmul %69, %70, %cst_33 {dimension_numbers = #tpu.dot_dimension_numbers<[1], [0], [0], [1], [0, 0, 1, 1], [], []>} : vector<8x8xf32>, vector<8x32xf32>, vector<8x32xf32> -> vector<8x32xf32>
    %72 = vector.extract_strided_slice %28 {offsets = [0, 64], sizes = [8, 32], strides = [1, 1]} : vector<8x128xf32> to vector<8x32xf32>
    %73 = vector.extract_strided_slice %36 {offsets = [0, 64], sizes = [8, 32], strides = [1, 1]} : vector<8x128xf32> to vector<8x32xf32>
    %cst_34 = arith.constant dense<0.000000e+00> : vector<8x8xf32>
    %74 = tpu.matmul %72, %73, %cst_34 {dimension_numbers = #tpu.dot_dimension_numbers<[1], [1], [0], [0], [0, 0, 1, 0], [], []>} : vector<8x32xf32>, vector<8x32xf32>, vector<8x8xf32> -> vector<8x8xf32>
    %75 = arith.addf %74, %39 : vector<8x8xf32>
    %cst_35 = arith.constant dense<0xFF800000> : vector<8xf32>
    %76 = vector.multi_reduction <maximumf>, %75, %cst_35 [1] : vector<8x8xf32> to vector<8xf32>
    %77 = vector.shape_cast %76 : vector<8xf32> to vector<8x1xf32>
    %78 = vector.broadcast %77 : vector<8x1xf32> to vector<8x8xf32>
    %79 = arith.subf %75, %78 : vector<8x8xf32>
    %80 = math.exp %79 : vector<8x8xf32>
    %cst_36 = arith.constant dense<0.000000e+00> : vector<8xf32>
    %81 = vector.multi_reduction <add>, %80, %cst_36 [1] : vector<8x8xf32> to vector<8xf32>
    %82 = vector.shape_cast %81 : vector<8xf32> to vector<8x1xf32>
    %83 = tpu.reciprocal %82 {approx = true} : vector<8x1xf32> -> vector<8x1xf32>
    %84 = vector.broadcast %83 : vector<8x1xf32> to vector<8x8xf32>
    %85 = arith.mulf %80, %84 : vector<8x8xf32>
    %86 = vector.extract_strided_slice %37 {offsets = [0, 64], sizes = [8, 32], strides = [1, 1]} : vector<8x128xf32> to vector<8x32xf32>
    %cst_37 = arith.constant dense<0.000000e+00> : vector<8x32xf32>
    %87 = tpu.matmul %85, %86, %cst_37 {dimension_numbers = #tpu.dot_dimension_numbers<[1], [0], [0], [1], [0, 0, 1, 1], [], []>} : vector<8x8xf32>, vector<8x32xf32>, vector<8x32xf32> -> vector<8x32xf32>
    %88 = vector.extract_strided_slice %28 {offsets = [0, 96], sizes = [8, 32], strides = [1, 1]} : vector<8x128xf32> to vector<8x32xf32>
    %89 = vector.extract_strided_slice %36 {offsets = [0, 96], sizes = [8, 32], strides = [1, 1]} : vector<8x128xf32> to vector<8x32xf32>
    %cst_38 = arith.constant dense<0.000000e+00> : vector<8x8xf32>
    %90 = tpu.matmul %88, %89, %cst_38 {dimension_numbers = #tpu.dot_dimension_numbers<[1], [1], [0], [0], [0, 0, 1, 0], [], []>} : vector<8x32xf32>, vector<8x32xf32>, vector<8x8xf32> -> vector<8x8xf32>
    %91 = arith.addf %90, %39 : vector<8x8xf32>
    %cst_39 = arith.constant dense<0xFF800000> : vector<8xf32>
    %92 = vector.multi_reduction <maximumf>, %91, %cst_39 [1] : vector<8x8xf32> to vector<8xf32>
    %93 = vector.shape_cast %92 : vector<8xf32> to vector<8x1xf32>
    %94 = vector.broadcast %93 : vector<8x1xf32> to vector<8x8xf32>
    %95 = arith.subf %91, %94 : vector<8x8xf32>
    %96 = math.exp %95 : vector<8x8xf32>
    %cst_40 = arith.constant dense<0.000000e+00> : vector<8xf32>
    %97 = vector.multi_reduction <add>, %96, %cst_40 [1] : vector<8x8xf32> to vector<8xf32>
    %98 = vector.shape_cast %97 : vector<8xf32> to vector<8x1xf32>
    %99 = tpu.reciprocal %98 {approx = true} : vector<8x1xf32> -> vector<8x1xf32>
    %100 = vector.broadcast %99 : vector<8x1xf32> to vector<8x8xf32>
    %101 = arith.mulf %96, %100 : vector<8x8xf32>
    %102 = vector.extract_strided_slice %37 {offsets = [0, 96], sizes = [8, 32], strides = [1, 1]} : vector<8x128xf32> to vector<8x32xf32>
    %cst_41 = arith.constant dense<0.000000e+00> : vector<8x32xf32>
    %103 = tpu.matmul %101, %102, %cst_41 {dimension_numbers = #tpu.dot_dimension_numbers<[1], [0], [0], [1], [0, 0, 1, 1], [], []>} : vector<8x8xf32>, vector<8x32xf32>, vector<8x32xf32> -> vector<8x32xf32>
    %104 = tpu.concatenate %55, %71, %87, %103 in 1 : vector<8x32xf32>, vector<8x32xf32>, vector<8x32xf32>, vector<8x32xf32> -> vector<8x128xf32>
    %c0_42 = arith.constant 0 : index
    %c0_43 = arith.constant 0 : index
    %105 = vector.load %arg10[%c0_42, %c0_43] : memref<128x128xf32, #tpu.memory_space<vmem>>, vector<128x128xf32>
    %cst_44 = arith.constant dense<0.000000e+00> : vector<8x128xf32>
    %106 = tpu.matmul %104, %105, %cst_44 {dimension_numbers = #tpu.dot_dimension_numbers<[1], [0], [0], [1], [0, 0, 1, 1], [], []>} : vector<8x128xf32>, vector<128x128xf32>, vector<8x128xf32> -> vector<8x128xf32>
    %107 = arith.addf %1, %106 : vector<8x128xf32>
    %c0_45 = arith.constant 0 : index
    %c0_46 = arith.constant 0 : index
    %108 = vector.load %arg11[%c0_45, %c0_46] : memref<1x128xf32, #tpu.memory_space<vmem>>, vector<1x128xf32>
    %109 = vector.broadcast %108 : vector<1x128xf32> to vector<8x128xf32>
    %110 = arith.addf %107, %109 : vector<8x128xf32>
    %c0_47 = arith.constant 0 : index
    %c0_48 = arith.constant 0 : index
    %c0_49 = arith.constant 0 : index
    %111 = vector.load %arg12[%c0_47, %c0_48, %c0_49] : memref<1x8x128xf32, #tpu.memory_space<vmem>>, vector<1x8x128xf32>
    %112 = vector.shape_cast %111 : vector<1x8x128xf32> to vector<8x128xf32>
    %113 = vector.shape_cast %110 : vector<8x128xf32> to vector<1x8x128xf32>
    tpu.vector_store %arg12[%c0_47, %c0_48, %c0_49], %113 {strides = array<i32>} : memref<1x8x128xf32, #tpu.memory_space<vmem>>, vector<1x8x128xf32>,
    return
  }
  func.func @transform_0(%arg0: i32) -> (i32, i32, i32) {
    %c0_i32 = arith.constant 0 : i32
    %c0_i32_0 = arith.constant 0 : i32
    %c0_i32_1 = arith.constant 0 : i32
    return %arg0, %c0_i32, %c0_i32_0 : i32, i32, i32
  }
  func.func @transform_1(%arg0: i32) -> (i32, i32, i32) {
    %c0_i32 = arith.constant 0 : i32
    %c0_i32_0 = arith.constant 0 : i32
    %c0_i32_1 = arith.constant 0 : i32
    return %arg0, %c0_i32, %c0_i32_0 : i32, i32, i32
  }
  func.func @transform_2(%arg0: i32) -> (i32, i32, i32) {
    %c0_i32 = arith.constant 0 : i32
    %c0_i32_0 = arith.constant 0 : i32
    %c0_i32_1 = arith.constant 0 : i32
    return %arg0, %c0_i32, %c0_i32_0 : i32, i32, i32
  }
  func.func @transform_3(%arg0: i32) -> (i32, i32) {
    %c0_i32 = arith.constant 0 : i32
    %c0_i32_0 = arith.constant 0 : i32
    %c0_i32_1 = arith.constant 0 : i32
    return %c0_i32, %c0_i32_0 : i32, i32
  }
  func.func @transform_4(%arg0: i32) -> (i32, i32) {
    %c0_i32 = arith.constant 0 : i32
    %c0_i32_0 = arith.constant 0 : i32
    %c0_i32_1 = arith.constant 0 : i32
    return %c0_i32, %c0_i32_0 : i32, i32
  }
  func.func @transform_5(%arg0: i32) -> (i32, i32) {
    %c0_i32 = arith.constant 0 : i32
    %c0_i32_0 = arith.constant 0 : i32
    %c0_i32_1 = arith.constant 0 : i32
    return %c0_i32, %c0_i32_0 : i32, i32
  }
  func.func @transform_6(%arg0: i32) -> (i32, i32) {
    %c0_i32 = arith.constant 0 : i32
    %c0_i32_0 = arith.constant 0 : i32
    %c0_i32_1 = arith.constant 0 : i32
    return %c0_i32, %c0_i32_0 : i32, i32
  }
  func.func @transform_7(%arg0: i32) -> (i32, i32) {
    %c0_i32 = arith.constant 0 : i32
    %c0_i32_0 = arith.constant 0 : i32
    %c0_i32_1 = arith.constant 0 : i32
    return %c0_i32, %c0_i32_0 : i32, i32
  }
  func.func @transform_8(%arg0: i32) -> (i32, i32) {
    %c0_i32 = arith.constant 0 : i32
    %c0_i32_0 = arith.constant 0 : i32
    %c0_i32_1 = arith.constant 0 : i32
    return %c0_i32, %c0_i32_0 : i32, i32
  }
  func.func @transform_9(%arg0: i32) -> (i32, i32) {
    %c0_i32 = arith.constant 0 : i32
    %c0_i32_0 = arith.constant 0 : i32
    %c0_i32_1 = arith.constant 0 : i32
    return %c0_i32, %c0_i32_0 : i32, i32
  }
  func.func @transform_10(%arg0: i32) -> (i32, i32) {
    %c0_i32 = arith.constant 0 : i32
    %c0_i32_0 = arith.constant 0 : i32
    %c0_i32_1 = arith.constant 0 : i32
    return %c0_i32, %c0_i32_0 : i32, i32
  }
  func.func @transform_11(%arg0: i32) -> (i32, i32, i32) {
    %c0_i32 = arith.constant 0 : i32
    %c0_i32_0 = arith.constant 0 : i32
    %c0_i32_1 = arith.constant 0 : i32
    return %arg0, %c0_i32, %c0_i32_0 : i32, i32, i32
  }
}

module attributes {stable_mosaic.version = 11 : i64} {
  func.func @_generator_kernel(%arg0: i32, %arg1: memref<1x8x128xf32, #tpu.memory_space<vmem>>, %arg2: memref<1x128xf32, #tpu.memory_space<vmem>>, %arg3: memref<1x128xf32, #tpu.memory_space<vmem>>, %arg4: memref<128x128xf32, #tpu.memory_space<vmem>>, %arg5: memref<1x128xf32, #tpu.memory_space<vmem>>, %arg6: memref<1x8x128xf32, #tpu.memory_space<vmem>>) attributes {dimension_semantics = [#tpu.dimension_semantics<parallel>], iteration_bounds = array<i64: 2>, scalar_prefetch = 0 : i64, scratch_operands = 0 : i64, tpu.core_type = #tpu.core_type<tc>, window_params = [{transform_indices = @transform_0, window_bounds = array<i64: 1, 8, 128>}, {pipeline_mode = #tpu.pipeline_mode<synchronous>, transform_indices = @transform_1, window_bounds = array<i64: 1, 128>}, {pipeline_mode = #tpu.pipeline_mode<synchronous>, transform_indices = @transform_2, window_bounds = array<i64: 1, 128>}, {pipeline_mode = #tpu.pipeline_mode<synchronous>, transform_indices = @transform_3, window_bounds = array<i64: 128, 128>}, {pipeline_mode = #tpu.pipeline_mode<synchronous>, transform_indices = @transform_4, window_bounds = array<i64: 1, 128>}, {transform_indices = @transform_5, window_bounds = array<i64: 1, 8, 128>}]} {
    %c0 = arith.constant 0 : index
    %c0_0 = arith.constant 0 : index
    %c0_1 = arith.constant 0 : index
    %0 = vector.load %arg1[%c0, %c0_0, %c0_1] : memref<1x8x128xf32, #tpu.memory_space<vmem>>, vector<1x8x128xf32>
    %1 = vector.shape_cast %0 : vector<1x8x128xf32> to vector<8x128xf32>
    %c0_2 = arith.constant 0 : index
    %c0_3 = arith.constant 0 : index
    %2 = vector.load %arg2[%c0_2, %c0_3] : memref<1x128xf32, #tpu.memory_space<vmem>>, vector<1x128xf32>
    %c0_4 = arith.constant 0 : index
    %c0_5 = arith.constant 0 : index
    %3 = vector.load %arg3[%c0_4, %c0_5] : memref<1x128xf32, #tpu.memory_space<vmem>>, vector<1x128xf32>
    %cst = arith.constant dense<0.000000e+00> : vector<8xf32>
    %4 = vector.multi_reduction <add>, %1, %cst [1] : vector<8x128xf32> to vector<8xf32>
    %5 = vector.shape_cast %4 : vector<8xf32> to vector<8x1xf32>
    %cst_6 = arith.constant 1.280000e+02 : f32
    %6 = vector.broadcast %cst_6 : f32 to vector<8x1xf32>
    %7 = arith.divf %5, %6 : vector<8x1xf32>
    %8 = vector.broadcast %7 : vector<8x1xf32> to vector<8x128xf32>
    %9 = arith.subf %1, %8 : vector<8x128xf32>
    %10 = arith.mulf %9, %9 : vector<8x128xf32>
    %cst_7 = arith.constant dense<0.000000e+00> : vector<8xf32>
    %11 = vector.multi_reduction <add>, %10, %cst_7 [1] : vector<8x128xf32> to vector<8xf32>
    %12 = vector.shape_cast %11 : vector<8xf32> to vector<8x1xf32>
    %cst_8 = arith.constant 1.270000e+02 : f32
    %13 = vector.broadcast %cst_8 : f32 to vector<8x1xf32>
    %14 = arith.divf %12, %13 : vector<8x1xf32>
    %15 = vector.broadcast %2 : vector<1x128xf32> to vector<8x128xf32>
    %16 = arith.mulf %15, %9 : vector<8x128xf32>
    %17 = math.sqrt %14 : vector<8x1xf32>
    %cst_9 = arith.constant 9.99999997E-7 : f32
    %18 = vector.broadcast %cst_9 : f32 to vector<8x1xf32>
    %19 = arith.addf %17, %18 : vector<8x1xf32>
    %20 = vector.broadcast %19 : vector<8x1xf32> to vector<8x128xf32>
    %21 = arith.divf %16, %20 : vector<8x128xf32>
    %22 = vector.broadcast %3 : vector<1x128xf32> to vector<8x128xf32>
    %23 = arith.addf %21, %22 : vector<8x128xf32>
    %c0_10 = arith.constant 0 : index
    %c0_11 = arith.constant 0 : index
    %24 = vector.load %arg4[%c0_10, %c0_11] : memref<128x128xf32, #tpu.memory_space<vmem>>, vector<128x128xf32>
    %cst_12 = arith.constant dense<0.000000e+00> : vector<8x128xf32>
    %25 = tpu.matmul %23, %24, %cst_12 {dimension_numbers = #tpu.dot_dimension_numbers<[1], [0], [0], [1], [0, 0, 1, 1], [], []>} : vector<8x128xf32>, vector<128x128xf32>, vector<8x128xf32> -> vector<8x128xf32>
    %c0_13 = arith.constant 0 : index
    %c0_14 = arith.constant 0 : index
    %26 = vector.load %arg5[%c0_13, %c0_14] : memref<1x128xf32, #tpu.memory_space<vmem>>, vector<1x128xf32>
    %27 = vector.broadcast %26 : vector<1x128xf32> to vector<8x128xf32>
    %28 = arith.addf %25, %27 : vector<8x128xf32>
    %cst_15 = arith.constant dense<0xFF800000> : vector<8xf32>
    %29 = vector.multi_reduction <maximumf>, %28, %cst_15 [1] : vector<8x128xf32> to vector<8xf32>
    %30 = vector.shape_cast %29 : vector<8xf32> to vector<8x1xf32>
    %31 = vector.broadcast %30 : vector<8x1xf32> to vector<8x128xf32>
    %32 = arith.subf %28, %31 : vector<8x128xf32>
    %33 = math.exp %32 : vector<8x128xf32>
    %cst_16 = arith.constant dense<0.000000e+00> : vector<8xf32>
    %34 = vector.multi_reduction <add>, %33, %cst_16 [1] : vector<8x128xf32> to vector<8xf32>
    %35 = vector.shape_cast %34 : vector<8xf32> to vector<8x1xf32>
    %36 = math.log %35 : vector<8x1xf32>
    %37 = vector.broadcast %36 : vector<8x1xf32> to vector<8x128xf32>
    %38 = arith.subf %32, %37 : vector<8x128xf32>
    %c0_17 = arith.constant 0 : index
    %c0_18 = arith.constant 0 : index
    %c0_19 = arith.constant 0 : index
    %39 = vector.load %arg6[%c0_17, %c0_18, %c0_19] : memref<1x8x128xf32, #tpu.memory_space<vmem>>, vector<1x8x128xf32>
    %40 = vector.shape_cast %39 : vector<1x8x128xf32> to vector<8x128xf32>
    %41 = vector.shape_cast %38 : vector<8x128xf32> to vector<1x8x128xf32>
    tpu.vector_store %arg6[%c0_17, %c0_18, %c0_19], %41 {strides = array<i32>} : memref<1x8x128xf32, #tpu.memory_space<vmem>>, vector<1x8x128xf32>,
    return
  }
  func.func @transform_0(%arg0: i32) -> (i32, i32, i32) {
    %c0_i32 = arith.constant 0 : i32
    %c0_i32_0 = arith.constant 0 : i32
    %c0_i32_1 = arith.constant 0 : i32
    return %arg0, %c0_i32, %c0_i32_0 : i32, i32, i32
  }
  func.func @transform_1(%arg0: i32) -> (i32, i32) {
    %c0_i32 = arith.constant 0 : i32
    %c0_i32_0 = arith.constant 0 : i32
    %c0_i32_1 = arith.constant 0 : i32
    return %c0_i32, %c0_i32_0 : i32, i32
  }
  func.func @transform_2(%arg0: i32) -> (i32, i32) {
    %c0_i32 = arith.constant 0 : i32
    %c0_i32_0 = arith.constant 0 : i32
    %c0_i32_1 = arith.constant 0 : i32
    return %c0_i32, %c0_i32_0 : i32, i32
  }
  func.func @transform_3(%arg0: i32) -> (i32, i32) {
    %c0_i32 = arith.constant 0 : i32
    %c0_i32_0 = arith.constant 0 : i32
    %c0_i32_1 = arith.constant 0 : i32
    return %c0_i32, %c0_i32_0 : i32, i32
  }
  func.func @transform_4(%arg0: i32) -> (i32, i32) {
    %c0_i32 = arith.constant 0 : i32
    %c0_i32_0 = arith.constant 0 : i32
    %c0_i32_1 = arith.constant 0 : i32
    return %c0_i32, %c0_i32_0 : i32, i32
  }
  func.func @transform_5(%arg0: i32) -> (i32, i32, i32) {
    %c0_i32 = arith.constant 0 : i32
    %c0_i32_0 = arith.constant 0 : i32
    %c0_i32_1 = arith.constant 0 : i32
    return %arg0, %c0_i32, %c0_i32_0 : i32, i32, i32
  }
}

</mosaic_0001>

<bundles_post_ra>
// kernel: encoder_decoder_forward.16
= control target key start
LH: loop header
LB: loop body
LE: loop exit
PB: predicated region body
PF: predicated region fallthrough
CT: control target
= control target key end

     0   :  { %s340_s12 = smov 0   ;;  %s370_s0 = inlined_call_operand.vmem [shape: f32[2,8,128], index: 0, kind: input, shape index: {}]   ;;  %s371_s1 = inlined_call_operand.vmem [shape: f32[1,128], index: 1, kind: input, shape index: {}]   ;;  %s372_s2 = inlined_call_operand.vmem [shape: f32[1,128], index: 2, kind: input, shape index: {}]   ;;  %s373_s3 = inlined_call_operand.vmem [shape: f32[2,8,128], index: 3, kind: output, shape index: {}]  }
   0x1 LB: > { %s281_s13 = sadd.s32 4294967295, %s316_s12   ;;  %p285_p0 = scmp.ge.s32.totalorder %s316_s12, 1  ;;  %s316_s12 = sphi %s340_s12, %s13_s12  }
   0x2   : > { %p136_p1 = scmp.lt.s32.totalorder %s316_s12, 3 }
   0x4   : > { %p137_p2 = pnand %p285_p0, %p136_p1 }
   0x5   : > { %p158_p3 = scmp.lt.s32.totalorder (!%p137_p2), %s281_s13, 1 }
   0x6   : > { %140 = sbr.rel (%p137_p2) target bundleno = 300 (0x12c), region = 32 }
   0xb   : > { %s375_s13 = smov (!%p158_p3, %s281_s13), 1  ;;  %v318_v1 = vmov 128.0   ;;  %v319_v12 = vmov 127.0   ;;  %v300_v36 = vld [vmem:[%s371_s1] ss:$0 sm:$0xff] }
   0xc   : > { %s286_s14 = sshll.u32 %s375_s13, 3  ;;  %302 = vrcp.f32 %v318_v1  ;;  %v301_v42 = vld [vmem:[%s372_s2] ss:$0 sm:$0xff] }
   0xd   : > { %s161_s17 = scalar_lea.vmem %s370_s0, %s286_s14  ;;  %304 = vrcp.f32 %v319_v12  ;;  %s165_s24 = scalar_lea.vmem %s373_s3, %s286_s14 }
   0xe   : > { %v166_v0 = vld [vmem:[%s161_s17] sm:$0xff] }
   0xf   : > { %169 = vadd.xlane.f32.xlu0 %v166_v0 }
  0x12   : > { %v303_v2 = vpop.eup %302 }
  0x13   : > { %v172_v3 = vmul.f32 128.0, %v303_v2  ;;  %vm176_vm0 = vweird.f32 %v303_v2  ;;  %v305_v13 = vpop.eup %304 }
  0x14   : > { %v184_v14 = vmul.f32 127.0, %v305_v13  ;;  %vm188_vm1 = vweird.f32 %v305_v13 }
  0x15   : > { %v173_v4 = vsub.f32 1.0, %v172_v3 }
  0x16   : > { %v185_v15 = vsub.f32 1.0, %v184_v14 }
  0x17   : > { %v174_v5 = vmul.f32 %v303_v2, %v173_v4 }
  0x18   : > { %v186_v16 = vmul.f32 %v305_v13, %v185_v15 }
  0x19   : > { %v175_v6 = vadd.f32 %v303_v2, %v174_v5 }
  0x1a   : > { %v187_v17 = vadd.f32 %v305_v13, %v186_v16 }
  0x1b   : > { %v177_v7 = vsel %vm176_vm0, %v303_v2, %v175_v6 }
  0x1c   : > { %v189_v18 = vsel %vm188_vm1, %v305_v13, %v187_v17 }
  0x82   : > { %v170_v8 = vpop.xlane.xlu0 %169 }
  0x83   : > { %v178_v9 = vmul.f32 %v177_v7, %v170_v8 }
  0x85   : > { %v179_v10 = vsub.f32 %v166_v0, %v178_v9 }
  0x87   : > { %v180_v11 = vmul.f32 %v179_v10, %v179_v10  ;;  %v194_v41 = vmul.f32 %v300_v36, %v179_v10 }
  0x89   : > { %181 = vadd.xlane.f32.xlu0 %v180_v11 }
  0xfc   : > { %v182_v19 = vpop.xlane.xlu0 %181 }
  0xfd   : > { %v190_v20 = vmul.f32 %v189_v18, %v182_v19 }
  0xff   : > { %306 = vrsqrt.f32 %v190_v20  ;;  %vm202_vm2 = vcmp.eq.f32.partialorder %v190_v20, inf  ;;  %v205_v28 = vand.u32 2147483648, %v190_v20  ;;  %vm204_vm3 = vcmp.eq.f32.partialorder %v190_v20, 0.0 }
 0x105   : > { %v307_v21 = vpop.eup %306 }
 0x106   : > { %v196_v22 = vmul.f32 %v307_v21, %v190_v20 }
 0x108   : > { %v197_v23 = vmul.f32 %v307_v21, %v196_v22 }
 0x10a   : > { %v198_v24 = vmul.f32 0.5, %v197_v23 }
 0x10c   : > { %v199_v25 = vsub.f32 1.5, %v198_v24 }
 0x10e   : > { %v200_v26 = vmul.f32 %v307_v21, %v199_v25 }
 0x110   : > { %v201_v27 = vmul.f32 %v200_v26, %v190_v20 }
 0x112   : > { %v203_v29 = vsel %vm202_vm2, %v190_v20, %v201_v27 }
 0x113   : > { %v206_v30 = vsel %vm204_vm3, %v205_v28, %v203_v29 }
 0x114   : > { %v207_v31 = vadd.f32 1e-06, %v206_v30 }
 0x116   : > { %308 = vrcp.f32 %v207_v31  ;;  %v219_v35 = vand.u32 2147483648, %v207_v31  ;;  %v217_v38 = vand.u32 2147483647, %v207_v31  ;;  %vm213_vm5 = vweird.f32 %v207_v31 }
 0x118   : > { %v220_v40 = vor.u32 1.1754944e-38, %v219_v35  ;;  %vm218_vm7 = vcmp.eq.f32.partialorder %v217_v38, 8.507059e+37 }
 0x11c   : > { %v309_v32 = vpop.eup %308 }
 0x11d   : > { %v209_v33 = vmul.f32 %v309_v32, %v207_v31  ;;  %vm214_vm4 = vweird.f32 %v309_v32 }
 0x11e   : > { %vm215_vm6 = vmor %vm213_vm5, %vm214_vm4 }
 0x11f   : > { %v210_v34 = vsub.f32 1.0, %v209_v33 }
 0x121   : > { %v211_v37 = vmul.f32 %v309_v32, %v210_v34 }
 0x123   : > { %v212_v39 = vadd.f32 %v309_v32, %v211_v37 }
 0x125   : > { %v216_v43 = vsel %vm215_vm6, %v309_v32, %v212_v39 }
 0x126   : > { %v221_v44 = vsel %vm218_vm7, %v220_v40, %v216_v43 }
 0x127   : > { %v222_v45 = vmul.f32 %v221_v44, %v194_v41 }
 0x129   : > { %v226_v46 = vadd.f32 %v301_v42, %v222_v45 }
 0x12b   : > { %227 = vst [vmem:[%s165_s24] sm:$0xff] %v226_v46 }
 0x12c PF: > { %s13_s12 = sadd.s32 1, %s316_s12  }
 0x12d   : > { %p10_p4 = scmp.ge.s32.totalorder %s13_s12, 4  }
 0x12f   :  { %12 = sbr.rel (!%p10_p4) target bundleno = 1 (0x1), region = 62 }

// kernel: encoder_decoder_forward.15
= control target key start
LH: loop header
LB: loop body
LE: loop exit
PB: predicated region body
PF: predicated region fallthrough
CT: control target
= control target key end

     0   :  { %12 = vsyncpa [#allocation3], 0  ;;  %s851_s0 = inlined_call_operand.vmem [shape: f32[2,8,128], index: 0, kind: input, shape index: {}]   ;;  %s852_s1 = inlined_call_operand.vmem [shape: f32[1,128], index: 1, kind: input, shape index: {}]   ;;  %s853_s2 = inlined_call_operand.vmem [shape: f32[1,128], index: 2, kind: input, shape index: {}]   ;;  %s854_s3 = inlined_call_operand.hbm [shape: f32[128,256], index: 3, kind: input, shape index: {}]   ;;  %s855_s4 = inlined_call_operand.vmem [shape: f32[1,256], index: 4, kind: input, shape index: {}]   ;;  %s856_s5 = inlined_call_operand.hbm [shape: f32[256,128], index: 5, kind: input, shape index: {}]   ;;  %s857_s6 = inlined_call_operand.vmem [shape: f32[1,128], index: 6, kind: input, shape index: {}]   ;;  %s858_s7 = inlined_call_operand.vmem [shape: f32[2,8,128], index: 7, kind: output, shape index: {}]  }
   0x1   :  { %13 = vsyncpa [#allocation5], 0  ;;  %s786_s24 = smov 0  }
   0x2 LB: > { %s219_s27 = sshll.u32 %s854_s3, 4  ;;  %s603_s28 = sadd.s32 4294967295, %s736_s24   ;;  %s736_s24 = sphi %s786_s24, %s19_s24   ;;  %s220_s27 = int_to_ptr.hbm [resolvable:$true] %s219_s27 }
   0x3   : > { %p605_p0 = scmp.ge.s32.totalorder %s736_s24, 1  ;;  %p202_p1 = scmp.lt.s32.totalorder %s736_s24, 3 }
   0x4   : > { %p631_p2 = scmp.eq.s32.totalorder %s603_s28, 0  ;;  %s738_s30 = smov [#allocation2]  }
   0x5   : > { %p797_p3 = pnand %p605_p0, %p202_p1  ;;  %s221_s8 = sshll.u32 %s738_s30, 4  ;;  %s222_s8 = int_to_ptr.vmem [resolvable:$true] %s221_s8 }
   0x6   : > { %s236_s11 = sshll.u32 %s856_s5, 4  ;;  %s739_s12 = smov [#allocation4]   ;;  %s237_s11 = int_to_ptr.hbm [resolvable:$true] %s236_s11 }
   0x7   : > { %p624_p4 = pneg %p797_p3  ;;  %s238_s13 = sshll.u32 %s739_s12, 4  ;;  %s239_s13 = int_to_ptr.vmem [resolvable:$true] %s238_s13 }
   0x8   : > { %s740_s14 = smov 256   ;;  %s741_s15 = smov 16  }
   0x9   : > { %p625_p5 = pnand %p631_p2, %p624_p4  ;;  %s742_s16 = smov 128  }
   0xa   : > { %s743_s17 = smov 8   ;;  %264 = sbr.rel (%p797_p3) target bundleno = 577 (0x241), region = 48 }
   0xb   : > { %627 = dma.hbm_to_vmem [thread:$0]  (!%p625_p5), %s220_s27, 4096, %s222_s8, [#allocation3], %s740_s14, %s740_s14, %s741_s15  }
   0xc   : > { %630 = dma.hbm_to_vmem [thread:$0]  (!%p625_p5), %s237_s11, 4096, %s239_s13, [#allocation5], %s742_s16, %s742_s16, %s743_s17  }
   0xf   : > { %727 = dma.done.wait (%p631_p2), [#allocation3], 4096  }
  0x10   : > { %729 = vsyncadd (%p631_p2), [#allocation3], 4294963200 }
  0x11   : > { %731 = dma.done.wait (%p631_p2), [#allocation5], 4096  }
  0x12   : > { %733 = vsyncadd (%p631_p2), [#allocation5], 4294963200  ;;  %p300_p6 = scmp.lt.s32.totalorder %s603_s28, 1  ;;  %v744_v1 = vmov 128.0   ;;  %v745_v12 = vmov 127.0   ;;  %v399_v15 = vld [vmem:[#allocation2 + $0xf0] sm:$0xff] }
  0x13   : > { %654 = vrcp.f32 %v744_v1  ;;  %v400_v16 = vld [vmem:[#allocation2 + $0xf8] sm:$0xff]  ;;  %407 = vmatpush.msra.mxu0 %v399_v15  ;;  %v397_v17 = vld [vmem:[#allocation2 + $0xe0] sm:$0xff]  ;;  %v398_v18 = vld [vmem:[#allocation2 + $0xe8] sm:$0xff] }
  0x14   : > { %s861_s28 = smov (!%p300_p6, %s603_s28), 1  ;;  %656 = vrcp.f32 %v745_v12  ;;  %427 = vmatpush.msra.mxu1 %v400_v16  ;;  %v395_v20 = vld [vmem:[#allocation2 + $0xd0] sm:$0xff]  ;;  %v396_v21 = vld [vmem:[#allocation2 + $0xd8] sm:$0xff]  ;;  %v393_v22 = vld [vmem:[#allocation2 + $0xc0] sm:$0xff] }
  0x15   : > { %s612_s18 = sshll.u32 %s861_s28, 3  ;;  %408 = vmatpush.msra.mxu0 %v397_v17  ;;  %v394_v23 = vld [vmem:[#allocation2 + $0xc8] sm:$0xff]  ;;  %v391_v24 = vld [vmem:[#allocation2 + $0xb0] sm:$0xff]  ;;  %v392_v25 = vld [vmem:[#allocation2 + $0xb8] sm:$0xff] }
  0x16   : > { %s303_s21 = scalar_lea.vmem %s851_s0, %s612_s18  ;;  %428 = vmatpush.msra.mxu1 %v398_v18  ;;  %v389_v27 = vld [vmem:[#allocation2 + $0xa0] sm:$0xff]  ;;  %v390_v28 = vld [vmem:[#allocation2 + $0xa8] sm:$0xff]  ;;  %v387_v29 = vld [vmem:[#allocation2 + $0x90] sm:$0xff]  ;;  %s307_s11 = scalar_lea.vmem %s858_s7, %s612_s18 }
  0x17   : > { %v821_v0 = vld [vmem:[%s303_s21] sm:$0xff]  ;;  %409 = vmatpush.msra.mxu0 %v395_v20  ;;  %v388_v30 = vld [vmem:[#allocation2 + $0x98] sm:$0xff]  ;;  %v386_v33 = vld [vmem:[#allocation2 + $0x88] sm:$0xff] }
  0x18   : > { %311 = vadd.xlane.f32.xlu0 %v821_v0  ;;  %429 = vmatpush.msra.mxu1 %v396_v21  ;;  %v385_v32 = vld [vmem:[#allocation2 + $0x80] sm:$0xff]  ;;  %v383_v34 = vld [vmem:[#allocation2 + $0x70] sm:$0xff]  ;;  %v384_v35 = vld [vmem:[#allocation2 + $0x78] sm:$0xff] }
  0x19   : > { %v655_v2 = vpop.eup %654  ;;  %410 = vmatpush.msra.mxu0 %v393_v22  ;;  %v381_v37 = vld [vmem:[#allocation2 + $0x60] sm:$0xff]  ;;  %v382_v38 = vld [vmem:[#allocation2 + $0x68] sm:$0xff]  ;;  %v379_v41 = vld [vmem:[#allocation2 + $0x50] sm:$0xff] }
  0x1a   : > { %v314_v3 = vmul.f32 128.0, %v655_v2  ;;  %vm318_vm0 = vweird.f32 %v655_v2  ;;  %v657_v13 = vpop.eup %656  ;;  %430 = vmatpush.msra.mxu1 %v394_v23  ;;  %v380_v42 = vld [vmem:[#allocation2 + $0x58] sm:$0xff]  ;;  %v377_v43 = vld [vmem:[#allocation2 + $0x40] sm:$0xff]  ;;  %v378_v44 = vld [vmem:[#allocation2 + $0x48] sm:$0xff] }
  0x1b   : > { %v326_v14 = vmul.f32 127.0, %v657_v13  ;;  %411 = vmatpush.msra.mxu0 %v391_v24  ;;  %vm330_vm1 = vweird.f32 %v657_v13  ;;  %v375_v45 = vld [vmem:[#allocation2 + $0x30] sm:$0xff]  ;;  %v376_v46 = vld [vmem:[#allocation2 + $0x38] sm:$0xff]  ;;  %v373_v47 = vld [vmem:[#allocation2 + $0x20] sm:$0xff] }
  0x1c   : > { %v315_v4 = vsub.f32 1.0, %v314_v3  ;;  %431 = vmatpush.msra.mxu1 %v392_v25  ;;  %v374_v48 = vld [vmem:[#allocation2 + $0x28] sm:$0xff]  ;;  %v371_v50 = vld [vmem:[#allocation2 + $0x10] sm:$0xff]  ;;  %v372_v51 = vld [vmem:[#allocation2 + $0x18] sm:$0xff] }
  0x1d   : > { %v327_v19 = vsub.f32 1.0, %v326_v14  ;;  %412 = vmatpush.msra.mxu0 %v389_v27  ;;  %v369_v53 = vld [vmem:[#allocation2] sm:$0xff]  ;;  %v370_v54 = vld [vmem:[#allocation2 + $0x8] sm:$0xff]  ;;  %v464_v57 = vld [vmem:[#allocation4 + $0x78] sm:$0xff] }
  0x1e   : > { %v316_v5 = vmul.f32 %v655_v2, %v315_v4  ;;  %432 = vmatpush.msra.mxu1 %v390_v28  ;;  %v480_v58 = vld [vmem:[#allocation4 + $0xf8] sm:$0xff]  ;;  %v463_v59 = vld [vmem:[#allocation4 + $0x70] sm:$0xff]  ;;  %481 = vmatpush.msra.mxu2 %v464_v57  ;;  %v462_v62 = vld [vmem:[#allocation4 + $0x68] sm:$0xff] }
  0x1f   : > { %v328_v26 = vmul.f32 %v657_v13, %v327_v19  ;;  %413 = vmatpush.msra.mxu0 %v387_v29  ;;  %501 = vmatpush.msra.mxu3 %v480_v58  ;;  %v479_v61 = vld [vmem:[#allocation4 + $0xf0] sm:$0xff]  ;;  %v478_v63 = vld [vmem:[#allocation4 + $0xe8] sm:$0xff]  ;;  %v477_v3 = vld [vmem:[#allocation4 + $0xe0] sm:$0xff] }
  0x20   : > { %v317_v6 = vadd.f32 %v655_v2, %v316_v5  ;;  %433 = vmatpush.msra.mxu1 %v388_v30  ;;  %482 = vmatpush.msra.mxu2 %v463_v59  ;;  %v475_v12 = vld [vmem:[#allocation4 + $0xd0] sm:$0xff]  ;;  %v458_v14 = vld [vmem:[#allocation4 + $0x48] sm:$0xff]  ;;  %v457_v16 = vld [vmem:[#allocation4 + $0x40] sm:$0xff] }
  0x21   : > { %v329_v31 = vadd.f32 %v657_v13, %v328_v26  ;;  %414 = vmatpush.msra.mxu0 %v385_v32  ;;  %502 = vmatpush.msra.mxu3 %v479_v61  ;;  %v474_v15 = vld [vmem:[#allocation4 + $0xc8] sm:$0xff]  ;;  %v473_v17 = vld [vmem:[#allocation4 + $0xc0] sm:$0xff]  ;;  %v456_v18 = vld [vmem:[#allocation4 + $0x38] sm:$0xff] }
  0x22   : > { %v319_v7 = vsel %vm318_vm0, %v655_v2, %v317_v6  ;;  %434 = vmatpush.msra.mxu1 %v386_v33  ;;  %v461_v2 = vld [vmem:[#allocation4 + $0x60] sm:$0xff]  ;;  %483 = vmatpush.msra.mxu2 %v462_v62  ;;  %v460_v6 = vld [vmem:[#allocation4 + $0x58] sm:$0xff]  ;;  %v455_v20 = vld [vmem:[#allocation4 + $0x30] sm:$0xff] }
  0x23   : > { %v331_v36 = vsel %vm330_vm1, %v657_v13, %v329_v31  ;;  %415 = vmatpush.msra.mxu0 %v383_v34  ;;  %503 = vmatpush.msra.mxu3 %v478_v63  ;;  %v472_v19 = vld [vmem:[#allocation4 + $0xb8] sm:$0xff]  ;;  %v471_v21 = vld [vmem:[#allocation4 + $0xb0] sm:$0xff]  ;;  %v454_v24 = vld [vmem:[#allocation4 + $0x28] sm:$0xff] }
  0x24   : > { %435 = vmatpush.msra.mxu1 %v384_v35  ;;  %484 = vmatpush.msra.mxu2 %v461_v2  ;;  %v470_v25 = vld [vmem:[#allocation4 + $0xa8] sm:$0xff]  ;;  %v453_v27 = vld [vmem:[#allocation4 + $0x20] sm:$0xff]  ;;  %v452_v33 = vld [vmem:[#allocation4 + $0x18] sm:$0xff] }
  0x25   : > { %416 = vmatpush.msra.mxu0 %v381_v37  ;;  %504 = vmatpush.msra.mxu3 %v477_v3  ;;  %v469_v28 = vld [vmem:[#allocation4 + $0xa0] sm:$0xff]  ;;  %v468_v34 = vld [vmem:[#allocation4 + $0x98] sm:$0xff] }
  0x26   : > { %436 = vmatpush.msra.mxu1 %v382_v38  ;;  %485 = vmatpush.msra.mxu2 %v460_v6  ;;  %v651_v30 = vld [vmem:[%s852_s1] ss:$0 sm:$0xff] }
  0x27   : > { %417 = vmatpush.msra.mxu0 %v379_v41 }
  0x28   : > { %437 = vmatpush.msra.mxu1 %v380_v42 }
  0x29   : > { %418 = vmatpush.msra.mxu0 %v377_v43  ;;  %v451_v43 = vld [vmem:[#allocation4 + $0x10] sm:$0xff] }
  0x2a   : > { %438 = vmatpush.msra.mxu1 %v378_v44  ;;  %v467_v44 = vld [vmem:[#allocation4 + $0x90] sm:$0xff] }
  0x2b   : > { %419 = vmatpush.msra.mxu0 %v375_v45  ;;  %v450_v45 = vld [vmem:[#allocation4 + $0x8] sm:$0xff] }
  0x2c   : > { %439 = vmatpush.msra.mxu1 %v376_v46  ;;  %v466_v46 = vld [vmem:[#allocation4 + $0x88] sm:$0xff] }
  0x2d   : > { %420 = vmatpush.msra.mxu0 %v373_v47  ;;  %v465_v47 = vld [vmem:[#allocation4 + $0x80] sm:$0xff] }
  0x2e   : > { %440 = vmatpush.msra.mxu1 %v374_v48  ;;  %v401_v48 = vld [vmem:[%s855_s4] sm:$0x3] }
  0x2f   : > { %421 = vmatpush.msra.mxu0 %v371_v50  ;;  %v404_v50 = vperm.slane %v401_v48, 1 }
  0x30   : > { %441 = vmatpush.msra.mxu1 %v372_v51 }
  0x31   : > { %422 = vmatpush.msra.mxu0 %v369_v53 }
  0x32   : > { %442 = vmatpush.msra.mxu1 %v370_v54 }
  0x8b   : > { %v312_v8 = vpop.xlane.xlu0 %311 }
  0x8c   : > { %v320_v9 = vmul.f32 %v319_v7, %v312_v8  ;;  %v476_v7 = vld [vmem:[#allocation4 + $0xd8] sm:$0xff] }
  0x8d   : > { %505 = vmatpush.msra.mxu3 %v476_v7 }
  0x8e   : > { %v825_v10 = vsub.f32 %v821_v0, %v320_v9 }
  0x8f   : > { %506 = vmatpush.msra.mxu3 %v475_v12 }
  0x90   : > { %v322_v11 = vmul.f32 %v825_v10, %v825_v10  ;;  %v336_v37 = vmul.f32 %v651_v30, %v825_v10  ;;  %v449_v10 = vld [vmem:[#allocation4] sm:$0xff] }
  0x91   : > { %507 = vmatpush.msra.mxu3 %v474_v15 }
  0x92   : > { %323 = vadd.xlane.f32.xlu0 %v322_v11  ;;  %v459_v11 = vld [vmem:[#allocation4 + $0x50] sm:$0xff] }
  0x93   : > { %486 = vmatpush.msra.mxu2 %v459_v11  ;;  %508 = vmatpush.msra.mxu3 %v473_v17 }
  0x95   : > { %487 = vmatpush.msra.mxu2 %v458_v14  ;;  %509 = vmatpush.msra.mxu3 %v472_v19 }
  0x97   : > { %488 = vmatpush.msra.mxu2 %v457_v16  ;;  %510 = vmatpush.msra.mxu3 %v471_v21 }
  0x99   : > { %489 = vmatpush.msra.mxu2 %v456_v18  ;;  %511 = vmatpush.msra.mxu3 %v470_v25 }
  0x9b   : > { %490 = vmatpush.msra.mxu2 %v455_v20  ;;  %512 = vmatpush.msra.mxu3 %v469_v28 }
  0x9d   : > { %491 = vmatpush.msra.mxu2 %v454_v24  ;;  %513 = vmatpush.msra.mxu3 %v468_v34 }
  0x9f   : > { %492 = vmatpush.msra.mxu2 %v453_v27  ;;  %514 = vmatpush.msra.mxu3 %v467_v44 }
  0xa1   : > { %493 = vmatpush.msra.mxu2 %v452_v33  ;;  %515 = vmatpush.msra.mxu3 %v466_v46 }
  0xa3   : > { %494 = vmatpush.msra.mxu2 %v451_v43  ;;  %516 = vmatpush.msra.mxu3 %v465_v47 }
  0xa5   : > { %495 = vmatpush.msra.mxu2 %v450_v45 }
  0xa7   : > { %496 = vmatpush.msra.mxu2 %v449_v10 }
 0x105   : > { %v324_v39 = vpop.xlane.xlu0 %323 }
 0x106   : > { %v332_v40 = vmul.f32 %v331_v36, %v324_v39  ;;  %v652_v39 = vld [vmem:[%s853_s2] ss:$0 sm:$0xff] }
 0x108   : > { %658 = vrsqrt.f32 %v332_v40  ;;  %vm344_vm2 = vcmp.eq.f32.partialorder %v332_v40, inf  ;;  %v347_v5 = vand.u32 2147483648, %v332_v40  ;;  %vm346_vm3 = vcmp.eq.f32.partialorder %v332_v40, 0.0 }
 0x10e   : > { %v659_v49 = vpop.eup %658 }
 0x10f   : > { %v338_v52 = vmul.f32 %v659_v49, %v332_v40 }
 0x111   : > { %v339_v55 = vmul.f32 %v659_v49, %v338_v52 }
 0x113   : > { %v340_v56 = vmul.f32 0.5, %v339_v55 }
 0x115   : > { %v341_v60 = vsub.f32 1.5, %v340_v56 }
 0x117   : > { %v342_v1 = vmul.f32 %v659_v49, %v341_v60  ;;  %v403_v49 = vperm.slane %v401_v48, 0  ;;  %v653_v60 = vld [vmem:[%s857_s6] ss:$0 sm:$0xff] }
 0x119   : > { %v343_v4 = vmul.f32 %v342_v1, %v332_v40 }
 0x11b   : > { %v345_v8 = vsel %vm344_vm2, %v332_v40, %v343_v4 }
 0x11c   : > { %v348_v9 = vsel %vm346_vm3, %v347_v5, %v345_v8 }
 0x11d   : > { %v349_v13 = vadd.f32 1e-06, %v348_v9 }
 0x11f   : > { %660 = vrcp.f32 %v349_v13  ;;  %v361_v29 = vand.u32 2147483648, %v349_v13  ;;  %v359_v32 = vand.u32 2147483647, %v349_v13  ;;  %vm355_vm5 = vweird.f32 %v349_v13 }
 0x121   : > { %v362_v36 = vor.u32 1.1754944e-38, %v361_v29  ;;  %vm360_vm7 = vcmp.eq.f32.partialorder %v359_v32, 8.507059e+37 }
 0x125   : > { %v661_v22 = vpop.eup %660 }
 0x126   : > { %v351_v23 = vmul.f32 %v661_v22, %v349_v13  ;;  %vm356_vm4 = vweird.f32 %v661_v22 }
 0x127   : > { %vm357_vm6 = vmor %vm355_vm5, %vm356_vm4 }
 0x128   : > { %v352_v26 = vsub.f32 1.0, %v351_v23 }
 0x12a   : > { %v353_v31 = vmul.f32 %v661_v22, %v352_v26 }
 0x12c   : > { %v354_v35 = vadd.f32 %v661_v22, %v353_v31 }
 0x12e   : > { %v358_v38 = vsel %vm357_vm6, %v661_v22, %v354_v35 }
 0x12f   : > { %v363_v40 = vsel %vm360_vm7, %v362_v36, %v358_v38 }
 0x130   : > { %v364_v41 = vmul.f32 %v363_v40, %v336_v37 }
 0x132   : > { %v368_v42 = vadd.f32 %v652_v39, %v364_v41 }
 0x134   : > { %423 = vmatmul.f32.vlgmr.msra.gmra.mxu0 %v368_v42  ;;  %443 = vmatmul.f32.vlgmr.msra.gmra.mxu1 %v368_v42 }
 0x1b1   : > { %v424_v51 = vpop.f32.mrf.mxu0  ;;  %v444_v52 = vpop.f32.mrf.mxu1 }
 0x1b2   : > { %v425_v53 = vadd.f32 %v424_v51, %v403_v49  ;;  %v445_v54 = vadd.f32 %v444_v52, %v404_v50 }
 0x1b4   : > { %v447_v55 = vmax.f32 %v425_v53, 0.0  ;;  %v448_v56 = vmax.f32 %v445_v54, 0.0 }
 0x1b6   : > { %497 = vmatmul.f32.vlgmr.msra.gmra.mxu2 %v447_v55  ;;  %517 = vmatmul.f32.vlgmr.msra.gmra.mxu3 %v448_v56 }
 0x239   : > { %v498_v57 = vpop.f32.mrf.mxu2  ;;  %v518_v58 = vpop.f32.mrf.mxu3 }
 0x23a   : > { %v519_v59 = vadd.f32 %v518_v58, %v498_v57 }
 0x23c   : > { %v521_v61 = vadd.f32 %v519_v59, %v821_v0 }
 0x23e   : > { %v526_v62 = vadd.f32 %v653_v60, %v521_v61 }
 0x240   : > { %527 = vst [vmem:[%s307_s11] sm:$0xff] %v526_v62 }
 0x241 PF: > { %s19_s24 = sadd.s32 1, %s736_s24  }
 0x242   : > { %p16_p7 = scmp.ge.s32.totalorder %s19_s24, 4  }
 0x244   :  { %18 = sbr.rel (!%p16_p7) target bundleno = 2 (0x2), region = 87 }
 0x249   :  { %547 = vsyncpa [#allocation3], 1 }
 0x24a   :  { %549 = vsyncpa [#allocation3 + $0x1], 1 }
 0x24b   :  { %550 = vsyncpa [#allocation5], 1 }

// kernel: encoder_decoder_forward.13
= control target key start
LH: loop header
LB: loop body
LE: loop exit
PB: predicated region body
PF: predicated region fallthrough
CT: control target
= control target key end

     0   :  { %12 = vsyncpa [#allocation3], 0  ;;  %s708_s24 = smov 0   ;;  %s853_s0 = inlined_call_operand.vmem [shape: f32[2,8,128], index: 0, kind: input, shape index: {}]   ;;  %s854_s1 = inlined_call_operand.vmem [shape: f32[1,128], index: 1, kind: input, shape index: {}]   ;;  %s855_s2 = inlined_call_operand.vmem [shape: f32[1,128], index: 2, kind: input, shape index: {}]   ;;  %s856_s3 = inlined_call_operand.vmem [shape: f32[128,256], index: 3, kind: input, shape index: {}]   ;;  %s857_s4 = inlined_call_operand.vmem [shape: f32[1,256], index: 4, kind: input, shape index: {}]   ;;  %s858_s5 = inlined_call_operand.hbm [shape: f32[256,128], index: 5, kind: input, shape index: {}]   ;;  %s859_s6 = inlined_call_operand.vmem [shape: f32[1,128], index: 6, kind: input, shape index: {}]   ;;  %s860_s7 = inlined_call_operand.vmem [shape: f32[2,8,128], index: 7, kind: output, shape index: {}]  }
   0x1 LB: > { %s224_s27 = sshll.u32 %s858_s5, 4  ;;  %s576_s28 = sadd.s32 4294967295, %s661_s24   ;;  %s661_s24 = sphi %s708_s24, %s18_s24   ;;  %s225_s27 = int_to_ptr.hbm [resolvable:$true] %s224_s27 }
   0x2   : > { %p578_p0 = scmp.ge.s32.totalorder %s661_s24, 1  ;;  %p201_p1 = scmp.lt.s32.totalorder %s661_s24, 3 }
   0x3   : > { %p595_p2 = scmp.eq.s32.totalorder %s576_s28, 0  ;;  %s663_s29 = smov [#allocation2]  }
   0x4   : > { %p202_p3 = pnand %p578_p0, %p201_p1  ;;  %s226_s30 = sshll.u32 %s663_s29, 4  ;;  %s227_s30 = int_to_ptr.vmem [resolvable:$true] %s226_s30 }
   0x5   : > { %s664_s8 = smov 128   ;;  %s665_s9 = smov 8  }
   0x6   : > { %p591_p4 = pneg %p202_p3  ;;  %252 = sbr.rel (%p202_p3) target bundleno = 571 (0x23b), region = 48 }
   0x8   : > { %p592_p5 = pnand %p595_p2, %p591_p4 }
   0xa   : > { %594 = dma.hbm_to_vmem [thread:$0]  (!%p592_p5), %s225_s27, 4096, %s227_s30, [#allocation3], %s664_s8, %s664_s8, %s665_s9  }
   0xb   : > { %656 = dma.done.wait (%p595_p2), [#allocation3], 4096  }
   0xc   : > { %658 = vsyncadd (%p595_p2), [#allocation3], 4294963200  ;;  %p283_p6 = scmp.lt.s32.totalorder %s576_s28, 1  ;;  %v666_v1 = vmov 128.0   ;;  %v667_v12 = vmov 127.0   ;;  %v382_v15 = vld [vmem:[%s856_s3 + $0xf0] sm:$0xff] }
   0xd   : > { %613 = vrcp.f32 %v666_v1  ;;  %v383_v16 = vld [vmem:[%s856_s3 + $0xf8] sm:$0xff]  ;;  %390 = vmatpush.msra.mxu0 %v382_v15  ;;  %v380_v17 = vld [vmem:[%s856_s3 + $0xe0] sm:$0xff]  ;;  %v381_v18 = vld [vmem:[%s856_s3 + $0xe8] sm:$0xff] }
   0xe   : > { %s862_s28 = smov (!%p283_p6, %s576_s28), 1  ;;  %615 = vrcp.f32 %v667_v12  ;;  %410 = vmatpush.msra.mxu1 %v383_v16  ;;  %v378_v20 = vld [vmem:[%s856_s3 + $0xd0] sm:$0xff]  ;;  %v379_v21 = vld [vmem:[%s856_s3 + $0xd8] sm:$0xff]  ;;  %v376_v22 = vld [vmem:[%s856_s3 + $0xc0] sm:$0xff] }
   0xf   : > { %s583_s10 = sshll.u32 %s862_s28, 3  ;;  %391 = vmatpush.msra.mxu0 %v380_v17  ;;  %v377_v23 = vld [vmem:[%s856_s3 + $0xc8] sm:$0xff]  ;;  %v374_v24 = vld [vmem:[%s856_s3 + $0xb0] sm:$0xff]  ;;  %v375_v25 = vld [vmem:[%s856_s3 + $0xb8] sm:$0xff] }
  0x10   : > { %s286_s13 = scalar_lea.vmem %s853_s0, %s583_s10  ;;  %411 = vmatpush.msra.mxu1 %v381_v18  ;;  %v372_v27 = vld [vmem:[%s856_s3 + $0xa0] sm:$0xff]  ;;  %v373_v28 = vld [vmem:[%s856_s3 + $0xa8] sm:$0xff]  ;;  %v370_v29 = vld [vmem:[%s856_s3 + $0x90] sm:$0xff]  ;;  %s290_s30 = scalar_lea.vmem %s860_s7, %s583_s10 }
  0x11   : > { %v727_v0 = vld [vmem:[%s286_s13] sm:$0xff]  ;;  %392 = vmatpush.msra.mxu0 %v378_v20  ;;  %v371_v30 = vld [vmem:[%s856_s3 + $0x98] sm:$0xff]  ;;  %v369_v33 = vld [vmem:[%s856_s3 + $0x88] sm:$0xff] }
  0x12   : > { %294 = vadd.xlane.f32.xlu0 %v727_v0  ;;  %412 = vmatpush.msra.mxu1 %v379_v21  ;;  %v368_v32 = vld [vmem:[%s856_s3 + $0x80] sm:$0xff]  ;;  %v366_v34 = vld [vmem:[%s856_s3 + $0x70] sm:$0xff]  ;;  %v367_v35 = vld [vmem:[%s856_s3 + $0x78] sm:$0xff] }
  0x13   : > { %v614_v2 = vpop.eup %613  ;;  %393 = vmatpush.msra.mxu0 %v376_v22  ;;  %v364_v37 = vld [vmem:[%s856_s3 + $0x60] sm:$0xff]  ;;  %v365_v38 = vld [vmem:[%s856_s3 + $0x68] sm:$0xff]  ;;  %v362_v41 = vld [vmem:[%s856_s3 + $0x50] sm:$0xff] }
  0x14   : > { %v297_v3 = vmul.f32 128.0, %v614_v2  ;;  %vm301_vm0 = vweird.f32 %v614_v2  ;;  %v616_v13 = vpop.eup %615  ;;  %413 = vmatpush.msra.mxu1 %v377_v23  ;;  %v363_v42 = vld [vmem:[%s856_s3 + $0x58] sm:$0xff]  ;;  %v360_v43 = vld [vmem:[%s856_s3 + $0x40] sm:$0xff]  ;;  %v361_v44 = vld [vmem:[%s856_s3 + $0x48] sm:$0xff] }
  0x15   : > { %v309_v14 = vmul.f32 127.0, %v616_v13  ;;  %394 = vmatpush.msra.mxu0 %v374_v24  ;;  %vm313_vm1 = vweird.f32 %v616_v13  ;;  %v358_v45 = vld [vmem:[%s856_s3 + $0x30] sm:$0xff]  ;;  %v359_v46 = vld [vmem:[%s856_s3 + $0x38] sm:$0xff]  ;;  %v356_v47 = vld [vmem:[%s856_s3 + $0x20] sm:$0xff] }
  0x16   : > { %v298_v4 = vsub.f32 1.0, %v297_v3  ;;  %414 = vmatpush.msra.mxu1 %v375_v25  ;;  %v357_v48 = vld [vmem:[%s856_s3 + $0x28] sm:$0xff]  ;;  %v354_v50 = vld [vmem:[%s856_s3 + $0x10] sm:$0xff]  ;;  %v355_v51 = vld [vmem:[%s856_s3 + $0x18] sm:$0xff] }
  0x17   : > { %v310_v19 = vsub.f32 1.0, %v309_v14  ;;  %395 = vmatpush.msra.mxu0 %v372_v27  ;;  %v352_v53 = vld [vmem:[%s856_s3] sm:$0xff]  ;;  %v353_v54 = vld [vmem:[%s856_s3 + $0x8] sm:$0xff]  ;;  %v447_v57 = vld [vmem:[#allocation2 + $0x78] sm:$0xff] }
  0x18   : > { %v299_v5 = vmul.f32 %v614_v2, %v298_v4  ;;  %415 = vmatpush.msra.mxu1 %v373_v28  ;;  %v463_v58 = vld [vmem:[#allocation2 + $0xf8] sm:$0xff]  ;;  %v446_v59 = vld [vmem:[#allocation2 + $0x70] sm:$0xff]  ;;  %464 = vmatpush.msra.mxu2 %v447_v57  ;;  %v445_v62 = vld [vmem:[#allocation2 + $0x68] sm:$0xff] }
  0x19   : > { %v311_v26 = vmul.f32 %v616_v13, %v310_v19  ;;  %396 = vmatpush.msra.mxu0 %v370_v29  ;;  %484 = vmatpush.msra.mxu3 %v463_v58  ;;  %v462_v61 = vld [vmem:[#allocation2 + $0xf0] sm:$0xff]  ;;  %v461_v63 = vld [vmem:[#allocation2 + $0xe8] sm:$0xff]  ;;  %v460_v3 = vld [vmem:[#allocation2 + $0xe0] sm:$0xff] }
  0x1a   : > { %v300_v6 = vadd.f32 %v614_v2, %v299_v5  ;;  %416 = vmatpush.msra.mxu1 %v371_v30  ;;  %465 = vmatpush.msra.mxu2 %v446_v59  ;;  %v458_v12 = vld [vmem:[#allocation2 + $0xd0] sm:$0xff]  ;;  %v441_v14 = vld [vmem:[#allocation2 + $0x48] sm:$0xff]  ;;  %v440_v16 = vld [vmem:[#allocation2 + $0x40] sm:$0xff] }
  0x1b   : > { %v312_v31 = vadd.f32 %v616_v13, %v311_v26  ;;  %397 = vmatpush.msra.mxu0 %v368_v32  ;;  %485 = vmatpush.msra.mxu3 %v462_v61  ;;  %v457_v15 = vld [vmem:[#allocation2 + $0xc8] sm:$0xff]  ;;  %v456_v17 = vld [vmem:[#allocation2 + $0xc0] sm:$0xff]  ;;  %v439_v18 = vld [vmem:[#allocation2 + $0x38] sm:$0xff] }
  0x1c   : > { %v302_v7 = vsel %vm301_vm0, %v614_v2, %v300_v6  ;;  %417 = vmatpush.msra.mxu1 %v369_v33  ;;  %v444_v2 = vld [vmem:[#allocation2 + $0x60] sm:$0xff]  ;;  %466 = vmatpush.msra.mxu2 %v445_v62  ;;  %v443_v6 = vld [vmem:[#allocation2 + $0x58] sm:$0xff]  ;;  %v438_v20 = vld [vmem:[#allocation2 + $0x30] sm:$0xff] }
  0x1d   : > { %v314_v36 = vsel %vm313_vm1, %v616_v13, %v312_v31  ;;  %398 = vmatpush.msra.mxu0 %v366_v34  ;;  %486 = vmatpush.msra.mxu3 %v461_v63  ;;  %v455_v19 = vld [vmem:[#allocation2 + $0xb8] sm:$0xff]  ;;  %v454_v21 = vld [vmem:[#allocation2 + $0xb0] sm:$0xff]  ;;  %v437_v24 = vld [vmem:[#allocation2 + $0x28] sm:$0xff] }
  0x1e   : > { %418 = vmatpush.msra.mxu1 %v367_v35  ;;  %467 = vmatpush.msra.mxu2 %v444_v2  ;;  %v453_v25 = vld [vmem:[#allocation2 + $0xa8] sm:$0xff]  ;;  %v436_v27 = vld [vmem:[#allocation2 + $0x20] sm:$0xff]  ;;  %v435_v33 = vld [vmem:[#allocation2 + $0x18] sm:$0xff] }
  0x1f   : > { %399 = vmatpush.msra.mxu0 %v364_v37  ;;  %487 = vmatpush.msra.mxu3 %v460_v3  ;;  %v452_v28 = vld [vmem:[#allocation2 + $0xa0] sm:$0xff]  ;;  %v451_v34 = vld [vmem:[#allocation2 + $0x98] sm:$0xff] }
  0x20   : > { %419 = vmatpush.msra.mxu1 %v365_v38  ;;  %468 = vmatpush.msra.mxu2 %v443_v6  ;;  %v610_v30 = vld [vmem:[%s854_s1] ss:$0 sm:$0xff] }
  0x21   : > { %400 = vmatpush.msra.mxu0 %v362_v41 }
  0x22   : > { %420 = vmatpush.msra.mxu1 %v363_v42 }
  0x23   : > { %401 = vmatpush.msra.mxu0 %v360_v43  ;;  %v434_v43 = vld [vmem:[#allocation2 + $0x10] sm:$0xff] }
  0x24   : > { %421 = vmatpush.msra.mxu1 %v361_v44  ;;  %v450_v44 = vld [vmem:[#allocation2 + $0x90] sm:$0xff] }
  0x25   : > { %402 = vmatpush.msra.mxu0 %v358_v45  ;;  %v433_v45 = vld [vmem:[#allocation2 + $0x8] sm:$0xff] }
  0x26   : > { %422 = vmatpush.msra.mxu1 %v359_v46  ;;  %v449_v46 = vld [vmem:[#allocation2 + $0x88] sm:$0xff] }
  0x27   : > { %403 = vmatpush.msra.mxu0 %v356_v47  ;;  %v448_v47 = vld [vmem:[#allocation2 + $0x80] sm:$0xff] }
  0x28   : > { %423 = vmatpush.msra.mxu1 %v357_v48  ;;  %v384_v48 = vld [vmem:[%s857_s4] sm:$0x3] }
  0x29   : > { %404 = vmatpush.msra.mxu0 %v354_v50  ;;  %v387_v50 = vperm.slane %v384_v48, 1 }
  0x2a   : > { %424 = vmatpush.msra.mxu1 %v355_v51 }
  0x2b   : > { %405 = vmatpush.msra.mxu0 %v352_v53 }
  0x2c   : > { %425 = vmatpush.msra.mxu1 %v353_v54 }
  0x85   : > { %v295_v8 = vpop.xlane.xlu0 %294 }
  0x86   : > { %v303_v9 = vmul.f32 %v302_v7, %v295_v8  ;;  %v459_v7 = vld [vmem:[#allocation2 + $0xd8] sm:$0xff] }
  0x87   : > { %488 = vmatpush.msra.mxu3 %v459_v7 }
  0x88   : > { %v731_v10 = vsub.f32 %v727_v0, %v303_v9 }
  0x89   : > { %489 = vmatpush.msra.mxu3 %v458_v12 }
  0x8a   : > { %v305_v11 = vmul.f32 %v731_v10, %v731_v10  ;;  %v319_v37 = vmul.f32 %v610_v30, %v731_v10  ;;  %v432_v10 = vld [vmem:[#allocation2] sm:$0xff] }
  0x8b   : > { %490 = vmatpush.msra.mxu3 %v457_v15 }
  0x8c   : > { %306 = vadd.xlane.f32.xlu0 %v305_v11  ;;  %v442_v11 = vld [vmem:[#allocation2 + $0x50] sm:$0xff] }
  0x8d   : > { %469 = vmatpush.msra.mxu2 %v442_v11  ;;  %491 = vmatpush.msra.mxu3 %v456_v17 }
  0x8f   : > { %470 = vmatpush.msra.mxu2 %v441_v14  ;;  %492 = vmatpush.msra.mxu3 %v455_v19 }
  0x91   : > { %471 = vmatpush.msra.mxu2 %v440_v16  ;;  %493 = vmatpush.msra.mxu3 %v454_v21 }
  0x93   : > { %472 = vmatpush.msra.mxu2 %v439_v18  ;;  %494 = vmatpush.msra.mxu3 %v453_v25 }
  0x95   : > { %473 = vmatpush.msra.mxu2 %v438_v20  ;;  %495 = vmatpush.msra.mxu3 %v452_v28 }
  0x97   : > { %474 = vmatpush.msra.mxu2 %v437_v24  ;;  %496 = vmatpush.msra.mxu3 %v451_v34 }
  0x99   : > { %475 = vmatpush.msra.mxu2 %v436_v27  ;;  %497 = vmatpush.msra.mxu3 %v450_v44 }
  0x9b   : > { %476 = vmatpush.msra.mxu2 %v435_v33  ;;  %498 = vmatpush.msra.mxu3 %v449_v46 }
  0x9d   : > { %477 = vmatpush.msra.mxu2 %v434_v43  ;;  %499 = vmatpush.msra.mxu3 %v448_v47 }
  0x9f   : > { %478 = vmatpush.msra.mxu2 %v433_v45 }
  0xa1   : > { %479 = vmatpush.msra.mxu2 %v432_v10 }
  0xff   : > { %v307_v39 = vpop.xlane.xlu0 %306 }
 0x100   : > { %v315_v40 = vmul.f32 %v314_v36, %v307_v39  ;;  %v611_v39 = vld [vmem:[%s855_s2] ss:$0 sm:$0xff] }
 0x102   : > { %617 = vrsqrt.f32 %v315_v40  ;;  %vm327_vm2 = vcmp.eq.f32.partialorder %v315_v40, inf  ;;  %v330_v5 = vand.u32 2147483648, %v315_v40  ;;  %vm329_vm3 = vcmp.eq.f32.partialorder %v315_v40, 0.0 }
 0x108   : > { %v618_v49 = vpop.eup %617 }
 0x109   : > { %v321_v52 = vmul.f32 %v618_v49, %v315_v40 }
 0x10b   : > { %v322_v55 = vmul.f32 %v618_v49, %v321_v52 }
 0x10d   : > { %v323_v56 = vmul.f32 0.5, %v322_v55 }
 0x10f   : > { %v324_v60 = vsub.f32 1.5, %v323_v56 }
 0x111   : > { %v325_v1 = vmul.f32 %v618_v49, %v324_v60  ;;  %v386_v49 = vperm.slane %v384_v48, 0  ;;  %v612_v60 = vld [vmem:[%s859_s6] ss:$0 sm:$0xff] }
 0x113   : > { %v326_v4 = vmul.f32 %v325_v1, %v315_v40 }
 0x115   : > { %v328_v8 = vsel %vm327_vm2, %v315_v40, %v326_v4 }
 0x116   : > { %v331_v9 = vsel %vm329_vm3, %v330_v5, %v328_v8 }
 0x117   : > { %v332_v13 = vadd.f32 1e-06, %v331_v9 }
 0x119   : > { %619 = vrcp.f32 %v332_v13  ;;  %v344_v29 = vand.u32 2147483648, %v332_v13  ;;  %v342_v32 = vand.u32 2147483647, %v332_v13  ;;  %vm338_vm5 = vweird.f32 %v332_v13 }
 0x11b   : > { %v345_v36 = vor.u32 1.1754944e-38, %v344_v29  ;;  %vm343_vm7 = vcmp.eq.f32.partialorder %v342_v32, 8.507059e+37 }
 0x11f   : > { %v620_v22 = vpop.eup %619 }
 0x120   : > { %v334_v23 = vmul.f32 %v620_v22, %v332_v13  ;;  %vm339_vm4 = vweird.f32 %v620_v22 }
 0x121   : > { %vm340_vm6 = vmor %vm338_vm5, %vm339_vm4 }
 0x122   : > { %v335_v26 = vsub.f32 1.0, %v334_v23 }
 0x124   : > { %v336_v31 = vmul.f32 %v620_v22, %v335_v26 }
 0x126   : > { %v337_v35 = vadd.f32 %v620_v22, %v336_v31 }
 0x128   : > { %v341_v38 = vsel %vm340_vm6, %v620_v22, %v337_v35 }
 0x129   : > { %v346_v40 = vsel %vm343_vm7, %v345_v36, %v341_v38 }
 0x12a   : > { %v347_v41 = vmul.f32 %v346_v40, %v319_v37 }
 0x12c   : > { %v351_v42 = vadd.f32 %v611_v39, %v347_v41 }
 0x12e   : > { %406 = vmatmul.f32.vlgmr.msra.gmra.mxu0 %v351_v42  ;;  %426 = vmatmul.f32.vlgmr.msra.gmra.mxu1 %v351_v42 }
 0x1ab   : > { %v407_v51 = vpop.f32.mrf.mxu0  ;;  %v427_v52 = vpop.f32.mrf.mxu1 }
 0x1ac   : > { %v408_v53 = vadd.f32 %v407_v51, %v386_v49  ;;  %v428_v54 = vadd.f32 %v427_v52, %v387_v50 }
 0x1ae   : > { %v430_v55 = vmax.f32 %v408_v53, 0.0  ;;  %v431_v56 = vmax.f32 %v428_v54, 0.0 }
 0x1b0   : > { %480 = vmatmul.f32.vlgmr.msra.gmra.mxu2 %v430_v55  ;;  %500 = vmatmul.f32.vlgmr.msra.gmra.mxu3 %v431_v56 }
 0x233   : > { %v481_v57 = vpop.f32.mrf.mxu2  ;;  %v501_v58 = vpop.f32.mrf.mxu3 }
 0x234   : > { %v502_v59 = vadd.f32 %v501_v58, %v481_v57 }
 0x236   : > { %v504_v61 = vadd.f32 %v502_v59, %v727_v0 }
 0x238   : > { %v509_v62 = vadd.f32 %v612_v60, %v504_v61 }
 0x23a   : > { %510 = vst [vmem:[%s290_s30] sm:$0xff] %v509_v62 }
 0x23b PF: > { %s18_s24 = sadd.s32 1, %s661_s24  }
 0x23c   : > { %p15_p7 = scmp.ge.s32.totalorder %s18_s24, 4  }
 0x23e   :  { %17 = sbr.rel (!%p15_p7) target bundleno = 1 (0x1), region = 83 }
 0x243   :  { %530 = vsyncpa [#allocation3], 1 }
 0x244   :  { %532 = vsyncpa [#allocation3 + $0x1], 1 }

// kernel: encoder_decoder_forward.12
= control target key start
LH: loop header
LB: loop body
LE: loop exit
PB: predicated region body
PF: predicated region fallthrough
CT: control target
= control target key end

     0   :  { %13 = vsyncpa [#allocation3], 0  ;;  %s1263_s0 = inlined_call_operand.vmem [shape: f32[2,8,128], index: 0, kind: input, shape index: {}]   ;;  %s1264_s1 = inlined_call_operand.vmem [shape: f32[2,8,8], index: 1, kind: input, shape index: {}]   ;;  %s1265_s2 = inlined_call_operand.vmem [shape: f32[1,128], index: 2, kind: input, shape index: {}]   ;;  %s1266_s3 = inlined_call_operand.vmem [shape: f32[1,128], index: 3, kind: input, shape index: {}]   ;;  %s1267_s4 = inlined_call_operand.hbm [shape: f32[128,384], index: 4, kind: input, shape index: {}]   ;;  %s1268_s5 = inlined_call_operand.vmem [shape: f32[1,384], index: 5, kind: input, shape index: {}]   ;;  %s1269_s6 = inlined_call_operand.hbm [shape: f32[128,128], index: 6, kind: input, shape index: {}]   ;;  %s1270_s7 = inlined_call_operand.vmem [shape: f32[1,128], index: 7, kind: input, shape index: {}]   ;;  %s1271_s8 = inlined_call_operand.vmem [shape: f32[2,8,128], index: 8, kind: output, shape index: {}]  }
   0x1   :  { %14 = vsyncpa [#allocation5], 0  ;;  %s1158_s27 = smov 0  }
   0x2 LB: > { %s246_s30 = sshll.u32 %s1267_s4, 4  ;;  %s935_s9 = sadd.s32 4294967295, %s1100_s27   ;;  %s1100_s27 = sphi %s1158_s27, %s20_s27   ;;  %s247_s30 = int_to_ptr.hbm [resolvable:$true] %s246_s30 }
   0x3   : > { %p937_p0 = scmp.ge.s32.totalorder %s1100_s27, 1  ;;  %p229_p1 = scmp.lt.s32.totalorder %s1100_s27, 3 }
   0x4   : > { %p976_p2 = scmp.eq.s32.totalorder %s935_s9, 0  ;;  %s1102_s11 = smov [#allocation2]  }
   0x5   : > { %p1169_p3 = pnand %p937_p0, %p229_p1  ;;  %s248_s12 = sshll.u32 %s1102_s11, 4  ;;  %s249_s12 = int_to_ptr.vmem [resolvable:$true] %s248_s12 }
   0x6   : > { %s263_s15 = sshll.u32 %s1269_s6, 4  ;;  %s1103_s16 = smov [#allocation4]   ;;  %s264_s15 = int_to_ptr.hbm [resolvable:$true] %s263_s15 }
   0x7   : > { %p969_p4 = pneg %p1169_p3  ;;  %s265_s17 = sshll.u32 %s1103_s16, 4  ;;  %s266_s17 = int_to_ptr.vmem [resolvable:$true] %s265_s17 }
   0x8   : > { %s1104_s18 = smov 384   ;;  %s1105_s19 = smov 24  }
   0x9   : > { %p970_p5 = pnand %p976_p2, %p969_p4  ;;  %s1106_s20 = smov 128  }
   0xa   : > { %s1107_s21 = smov 8   ;;  %298 = sbr.rel (%p1169_p3) target bundleno = 1717 (0x6b5), region = 52 }
   0xb   : > { %972 = dma.hbm_to_vmem [thread:$0]  (!%p970_p5), %s247_s30, 6144, %s249_s12, [#allocation3], %s1104_s18, %s1104_s18, %s1105_s19  }
   0xc   : > { %975 = dma.hbm_to_vmem [thread:$0]  (!%p970_p5), %s264_s15, 2048, %s266_s17, [#allocation5], %s1106_s20, %s1106_s20, %s1107_s21  }
   0xf   : > { %1091 = dma.done.wait (%p976_p2), [#allocation3], 6144  }
  0x10   : > { %1093 = vsyncadd (%p976_p2), [#allocation3], 4294961152 }
  0x11   : > { %1095 = dma.done.wait (%p976_p2), [#allocation5], 2048  }
  0x12   : > { %1097 = vsyncadd (%p976_p2), [#allocation5], 4294965248  ;;  %p340_p6 = scmp.lt.s32.totalorder %s935_s9, 1  ;;  %v1108_v1 = vmov 128.0   ;;  %v1109_v12 = vmov 127.0   ;;  %v458_v15 = vld [vmem:[#allocation2 + $0x168] sm:$0xff] }
  0x13   : > { %1002 = vrcp.f32 %v1108_v1  ;;  %v459_v16 = vld [vmem:[#allocation2 + $0x170] sm:$0xff]  ;;  %v460_v17 = vld [vmem:[#allocation2 + $0x178] sm:$0xff]  ;;  %469 = vmatpush.msra.mxu0 %v458_v15  ;;  %v457_v20 = vld [vmem:[#allocation2 + $0x160] sm:$0xff]  ;;  %vm530_vm8 = vcmask 261120   ;;  %s1110_s11 = smov 96   ;;  %s1111_s12 = smov 64  }
  0x14   : > { %s1274_s9 = smov (!%p340_p6, %s935_s9), 1  ;;  %1004 = vrcp.f32 %v1109_v12  ;;  %489 = vmatpush.msra.mxu1 %v459_v16  ;;  %509 = vmatpush.msra.mxu2 %v460_v17  ;;  %v455_v18 = vld [vmem:[#allocation2 + $0x150] sm:$0xff]  ;;  %v456_v19 = vld [vmem:[#allocation2 + $0x158] sm:$0xff]  ;;  %v453_v23 = vld [vmem:[#allocation2 + $0x140] sm:$0xff]  ;;  %s1112_s13 = smov 32   ;;  %vm557_vm9 = vcmask 64512  }
  0x15   : > { %s1185_s22 = sshll.u32 %s1274_s9, 3  ;;  %470 = vmatpush.msra.mxu0 %v455_v18  ;;  %v452_v22 = vld [vmem:[#allocation2 + $0x138] sm:$0xff]  ;;  %v454_v24 = vld [vmem:[#allocation2 + $0x148] sm:$0xff]  ;;  %v449_v25 = vld [vmem:[#allocation2 + $0x120] sm:$0xff]  ;;  %vm801_vm10 = vcmask 523264   ;;  %vm803_vm11 = vcmask 785408  }
  0x16   : > { %s343_s25 = scalar_lea.vmem %s1263_s0, %s1185_s22  ;;  %490 = vmatpush.msra.mxu1 %v456_v19  ;;  %510 = vmatpush.msra.mxu2 %v457_v20  ;;  %v450_v26 = vld [vmem:[#allocation2 + $0x128] sm:$0xff]  ;;  %v451_v27 = vld [vmem:[#allocation2 + $0x130] sm:$0xff]  ;;  %v448_v31 = vld [vmem:[#allocation2 + $0x118] sm:$0xff]  ;;  %s347_s16 = scalar_lea.vmem %s1264_s1, %s1185_s22 }
  0x17   : > { %v1191_v0 = vld [vmem:[%s343_s25] sm:$0xff]  ;;  %471 = vmatpush.msra.mxu0 %v452_v22  ;;  %v446_v28 = vld [vmem:[#allocation2 + $0x108] sm:$0xff]  ;;  %v447_v29 = vld [vmem:[#allocation2 + $0x110] sm:$0xff]  ;;  %s351_s21 = scalar_lea.vmem %s1271_s8, %s1185_s22 }
  0x18   : > { %355 = vadd.xlane.f32.xlu0 %v1191_v0  ;;  %491 = vmatpush.msra.mxu1 %v453_v23  ;;  %v443_v32 = vld [vmem:[#allocation2 + $0xf0] sm:$0xff]  ;;  %v444_v33 = vld [vmem:[#allocation2 + $0xf8] sm:$0xff]  ;;  %v445_v34 = vld [vmem:[#allocation2 + $0x100] sm:$0xff] }
  0x19   : > { %v1003_v2 = vpop.eup %1002  ;;  %511 = vmatpush.msra.mxu2 %v454_v24  ;;  %472 = vmatpush.msra.mxu0 %v449_v25  ;;  %v440_v35 = vld [vmem:[#allocation2 + $0xd8] sm:$0xff]  ;;  %v441_v36 = vld [vmem:[#allocation2 + $0xe0] sm:$0xff]  ;;  %v442_v38 = vld [vmem:[#allocation2 + $0xe8] sm:$0xff] }
  0x1a   : > { %v358_v3 = vmul.f32 128.0, %v1003_v2  ;;  %vm362_vm0 = vweird.f32 %v1003_v2  ;;  %v1005_v13 = vpop.eup %1004  ;;  %492 = vmatpush.msra.mxu1 %v450_v26  ;;  %v437_v39 = vld [vmem:[#allocation2 + $0xc0] sm:$0xff]  ;;  %v438_v40 = vld [vmem:[#allocation2 + $0xc8] sm:$0xff]  ;;  %v439_v41 = vld [vmem:[#allocation2 + $0xd0] sm:$0xff] }
  0x1b   : > { %v370_v14 = vmul.f32 127.0, %v1005_v13  ;;  %512 = vmatpush.msra.mxu2 %v451_v27  ;;  %473 = vmatpush.msra.mxu0 %v446_v28  ;;  %vm374_vm1 = vweird.f32 %v1005_v13  ;;  %v434_v42 = vld [vmem:[#allocation2 + $0xa8] sm:$0xff]  ;;  %v435_v43 = vld [vmem:[#allocation2 + $0xb0] sm:$0xff]  ;;  %v436_v45 = vld [vmem:[#allocation2 + $0xb8] sm:$0xff] }
  0x1c   : > { %v359_v4 = vsub.f32 1.0, %v358_v3  ;;  %493 = vmatpush.msra.mxu1 %v447_v29  ;;  %v431_v46 = vld [vmem:[#allocation2 + $0x90] sm:$0xff]  ;;  %v432_v47 = vld [vmem:[#allocation2 + $0x98] sm:$0xff]  ;;  %v433_v49 = vld [vmem:[#allocation2 + $0xa0] sm:$0xff] }
  0x1d   : > { %v371_v21 = vsub.f32 1.0, %v370_v14  ;;  %513 = vmatpush.msra.mxu2 %v448_v31  ;;  %474 = vmatpush.msra.mxu0 %v443_v32  ;;  %v428_v51 = vld [vmem:[#allocation2 + $0x78] sm:$0xff]  ;;  %v429_v52 = vld [vmem:[#allocation2 + $0x80] sm:$0xff]  ;;  %v430_v53 = vld [vmem:[#allocation2 + $0x88] sm:$0xff] }
  0x1e   : > { %v360_v5 = vmul.f32 %v1003_v2, %v359_v4  ;;  %494 = vmatpush.msra.mxu1 %v444_v33  ;;  %v425_v54 = vld [vmem:[#allocation2 + $0x60] sm:$0xff]  ;;  %v426_v55 = vld [vmem:[#allocation2 + $0x68] sm:$0xff]  ;;  %v427_v56 = vld [vmem:[#allocation2 + $0x70] sm:$0xff] }
  0x1f   : > { %v372_v30 = vmul.f32 %v1005_v13, %v371_v21  ;;  %514 = vmatpush.msra.mxu2 %v445_v34  ;;  %475 = vmatpush.msra.mxu0 %v440_v35  ;;  %v422_v57 = vld [vmem:[#allocation2 + $0x48] sm:$0xff]  ;;  %v423_v58 = vld [vmem:[#allocation2 + $0x50] sm:$0xff]  ;;  %v424_v59 = vld [vmem:[#allocation2 + $0x58] sm:$0xff] }
  0x20   : > { %v361_v6 = vadd.f32 %v1003_v2, %v360_v5  ;;  %495 = vmatpush.msra.mxu1 %v441_v36  ;;  %v419_v60 = vld [vmem:[#allocation2 + $0x30] sm:$0xff]  ;;  %v420_v61 = vld [vmem:[#allocation2 + $0x38] sm:$0xff]  ;;  %v421_v62 = vld [vmem:[#allocation2 + $0x40] sm:$0xff] }
  0x21   : > { %v373_v37 = vadd.f32 %v1005_v13, %v372_v30  ;;  %515 = vmatpush.msra.mxu2 %v442_v38  ;;  %476 = vmatpush.msra.mxu0 %v437_v39  ;;  %v416_v1 = vld [vmem:[#allocation2 + $0x18] sm:$0xff]  ;;  %v418_v4 = vld [vmem:[#allocation2 + $0x28] sm:$0xff]  ;;  %v413_v5 = vld [vmem:[#allocation2] sm:$0xff] }
  0x22   : > { %v363_v7 = vsel %vm362_vm0, %v1003_v2, %v361_v6  ;;  %496 = vmatpush.msra.mxu1 %v438_v40  ;;  %v417_v2 = vld [vmem:[#allocation2 + $0x20] sm:$0xff]  ;;  %v414_v6 = vld [vmem:[#allocation2 + $0x8] sm:$0xff] }
  0x23   : > { %v375_v44 = vsel %vm374_vm1, %v1005_v13, %v373_v37  ;;  %516 = vmatpush.msra.mxu2 %v439_v41  ;;  %477 = vmatpush.msra.mxu0 %v434_v42  ;;  %v999_v22 = vld [vmem:[%s1265_s2] ss:$0 sm:$0xff] }
  0x24   : > { %497 = vmatpush.msra.mxu1 %v435_v43  ;;  %v1000_v29 = vld [vmem:[%s1266_s3] ss:$0 sm:$0xff] }
  0x25   : > { %517 = vmatpush.msra.mxu2 %v436_v45  ;;  %478 = vmatpush.msra.mxu0 %v431_v46  ;;  %v461_v33 = vld [vmem:[%s1268_s5] sm:$0x7] }
  0x26   : > { %498 = vmatpush.msra.mxu1 %v432_v47  ;;  %v464_v34 = vperm.slane %v461_v33, 1  ;;  %v463_v35 = vperm.slane %v461_v33, 0  ;;  %v465_v39 = vperm.slane %v461_v33, 2  ;;  %v529_v45 = vld [vmem:[%s347_s16] sm:$0xff] }
  0x27   : > { %518 = vmatpush.msra.mxu2 %v433_v49  ;;  %479 = vmatpush.msra.mxu0 %v428_v51 }
  0x28   : > { %499 = vmatpush.msra.mxu1 %v429_v52 }
  0x29   : > { %519 = vmatpush.msra.mxu2 %v430_v53  ;;  %480 = vmatpush.msra.mxu0 %v425_v54 }
  0x2a   : > { %500 = vmatpush.msra.mxu1 %v426_v55 }
  0x2b   : > { %520 = vmatpush.msra.mxu2 %v427_v56  ;;  %481 = vmatpush.msra.mxu0 %v422_v57 }
  0x2c   : > { %501 = vmatpush.msra.mxu1 %v423_v58 }
  0x2d   : > { %521 = vmatpush.msra.mxu2 %v424_v59  ;;  %482 = vmatpush.msra.mxu0 %v419_v60 }
  0x2e   : > { %502 = vmatpush.msra.mxu1 %v420_v61 }
  0x2f   : > { %522 = vmatpush.msra.mxu2 %v421_v62  ;;  %483 = vmatpush.msra.mxu0 %v416_v1 }
  0x30   : > { %503 = vmatpush.msra.mxu1 %v417_v2 }
  0x31   : > { %523 = vmatpush.msra.mxu2 %v418_v4  ;;  %484 = vmatpush.msra.mxu0 %v413_v5 }
  0x32   : > { %504 = vmatpush.msra.mxu1 %v414_v6 }
  0x8b   : > { %v356_v8 = vpop.xlane.xlu0 %355 }
  0x8c   : > { %v364_v9 = vmul.f32 %v363_v7, %v356_v8  ;;  %v415_v8 = vld [vmem:[#allocation2 + $0x10] sm:$0xff] }
  0x8d   : > { %524 = vmatpush.msra.mxu2 %v415_v8 }
  0x8e   : > { %v1195_v10 = vsub.f32 %v1191_v0, %v364_v9 }
  0x90   : > { %v366_v11 = vmul.f32 %v1195_v10, %v1195_v10  ;;  %v380_v27 = vmul.f32 %v999_v22, %v1195_v10 }
  0x92   : > { %367 = vadd.xlane.f32.xlu0 %v366_v11 }
 0x105   : > { %v368_v48 = vpop.xlane.xlu0 %367 }
 0x106   : > { %v376_v50 = vmul.f32 %v375_v44, %v368_v48 }
 0x108   : > { %1006 = vrsqrt.f32 %v376_v50  ;;  %vm388_vm2 = vcmp.eq.f32.partialorder %v376_v50, inf  ;;  %v391_v14 = vand.u32 2147483648, %v376_v50  ;;  %vm390_vm3 = vcmp.eq.f32.partialorder %v376_v50, 0.0 }
 0x10e   : > { %v1007_v63 = vpop.eup %1006 }
 0x10f   : > { %v382_v3 = vmul.f32 %v1007_v63, %v376_v50 }
 0x111   : > { %v383_v7 = vmul.f32 %v1007_v63, %v382_v3 }
 0x113   : > { %v384_v9 = vmul.f32 0.5, %v383_v7 }
 0x115   : > { %v385_v11 = vsub.f32 1.5, %v384_v9 }
 0x117   : > { %v386_v12 = vmul.f32 %v1007_v63, %v385_v11 }
 0x119   : > { %v387_v13 = vmul.f32 %v386_v12, %v376_v50 }
 0x11b   : > { %v389_v15 = vsel %vm388_vm2, %v376_v50, %v387_v13 }
 0x11c   : > { %v392_v16 = vsel %vm390_vm3, %v391_v14, %v389_v15 }
 0x11d   : > { %v393_v17 = vadd.f32 1e-06, %v392_v16 }
 0x11f   : > { %1008 = vrcp.f32 %v393_v17  ;;  %v405_v21 = vand.u32 2147483648, %v393_v17  ;;  %v403_v24 = vand.u32 2147483647, %v393_v17  ;;  %vm399_vm5 = vweird.f32 %v393_v17 }
 0x121   : > { %v406_v26 = vor.u32 1.1754944e-38, %v405_v21  ;;  %vm404_vm7 = vcmp.eq.f32.partialorder %v403_v24, 8.507059e+37 }
 0x125   : > { %v1009_v18 = vpop.eup %1008 }
 0x126   : > { %v395_v19 = vmul.f32 %v1009_v18, %v393_v17  ;;  %vm400_vm4 = vweird.f32 %v1009_v18 }
 0x127   : > { %vm401_vm6 = vmor %vm399_vm5, %vm400_vm4 }
 0x128   : > { %v396_v20 = vsub.f32 1.0, %v395_v19 }
 0x12a   : > { %v397_v23 = vmul.f32 %v1009_v18, %v396_v20 }
 0x12c   : > { %v398_v25 = vadd.f32 %v1009_v18, %v397_v23 }
 0x12e   : > { %v402_v28 = vsel %vm401_vm6, %v1009_v18, %v398_v25 }
 0x12f   : > { %v407_v30 = vsel %vm404_vm7, %v406_v26, %v402_v28 }
 0x130   : > { %v408_v31 = vmul.f32 %v407_v30, %v380_v27 }
 0x132   : > { %v412_v32 = vadd.f32 %v1000_v29, %v408_v31 }
 0x134   : > { %485 = vmatmul.f32.vlgmr.msra.gmra.mxu0 %v412_v32  ;;  %505 = vmatmul.f32.vlgmr.msra.gmra.mxu1 %v412_v32 }
 0x135   : > { %525 = vmatmul.f32.vlgmr.msra.gmra.mxu2 %v412_v32 }
 0x1b1   : > { %v506_v36 = vpop.f32.mrf.mxu1  ;;  %v486_v10 = vpop.f32.mrf.mxu0 }
 0x1b2   : > { %v507_v37 = vadd.f32 %v506_v36, %v464_v34  ;;  %v487_v38 = vadd.f32 %v486_v10, %v463_v35 }
 0x1b4   : > { %594 = vrot.lane.b32.xlu1 %v507_v37, %s1110_s11  ;;  %947 = vmatpush.xpose.msk.msrb.mxu0 %vm530_vm8, %v507_v37 }
 0x1b7   : > { %948 = vmatmul.msk.f32.vlgmr.msrb.gmra.mxu0 %vm530_vm8, %v487_v38 }
 0x1b8   : > { %v526_v40 = vpop.f32.mrf.mxu2 }
 0x1b9   : > { %v1212_v41 = vadd.f32 %v526_v40, %v465_v39  ;;  %v818_v39 = vld [vmem:[#allocation4 + $0x68] sm:$0xff]  ;;  %v817_v40 = vld [vmem:[#allocation4 + $0x60] sm:$0xff] }
 0x1bb   : > { %632 = vrot.lane.b32.xlu0 %v1212_v41, %s1110_s11  ;;  %587 = vmatpush.msrb.mxu2 %v1212_v41 }
 0x1bc   : > { %592 = vrot.lane.b32.xlu1 %v487_v38, %s1110_s11 }
 0x1c4   : > { %660 = vrot.lane.b32.xlu1 %v507_v37, %s1111_s12 }
 0x1cc   : > { %658 = vrot.lane.b32.xlu1 %v487_v38, %s1111_s12 }
 0x1d4   : > { %723 = vrot.lane.b32.xlu1 %v487_v38, %s1112_s13  ;;  %v819_v38 = vld [vmem:[#allocation4 + $0x70] sm:$0xff] }
 0x226   : > { %v595_v42 = vpop.permute.xlu1 %594 }
 0x227   : > { %950 = vmatpush.xpose.msk.msrb.mxu1 %vm530_vm8, %v595_v42  ;;  %v815_v42 = vld [vmem:[#allocation4 + $0x50] sm:$0xff] }
 0x22d   : > { %v633_v43 = vpop.permute.xlu0 %632 }
 0x22e   : > { %653 = vmatpush.msra.mxu3 %v633_v43  ;;  %v593_v44 = vpop.permute.xlu1 %592  ;;  %v814_v43 = vld [vmem:[#allocation4 + $0x48] sm:$0xff] }
 0x22f   : > { %951 = vmatmul.msk.f32.vlgmr.msrb.gmra.mxu1 %vm530_vm8, %v593_v44  ;;  %v813_v44 = vld [vmem:[#allocation4 + $0x40] sm:$0xff] }
 0x234   : > { %v554_v46 = vpop.f32.mrf.mxu0 }
 0x235   : > { %v555_v47 = vadd.f32 %v554_v46, %v529_v45  ;;  %v811_v46 = vld [vmem:[#allocation4 + $0x30] sm:$0xff] }
 0x236   : > { %v661_v48 = vpop.permute.xlu1 %660 }
 0x237   : > { %953 = vmatpush.xpose.msk.msrb.mxu3 %vm530_vm8, %v661_v48  ;;  %v558_v49 = vsel %vm557_vm9, %v555_v47, -inf  ;;  %v809_v48 = vld [vmem:[#allocation4 + $0x20] sm:$0xff] }
 0x238   : > { %559 = vmax.xlane.f32.xlu0 %v558_v49  ;;  %v808_v49 = vld [vmem:[#allocation4 + $0x18] sm:$0xff] }
 0x23e   : > { %v659_v5 = vpop.permute.xlu1 %658 }
 0x246   : > { %v724_v9 = vpop.permute.xlu1 %723 }
 0x2ab   : > { %v560_v50 = vpop.xlane.xlu0 %559 }
 0x2ac   : > { %v561_v51 = vsub.f32 %v555_v47, %v560_v50  ;;  %v617_v52 = vpop.f32.mrf.mxu1  ;;  %v810_v47 = vld [vmem:[#allocation4 + $0x28] sm:$0xff]  ;;  %v807_v50 = vld [vmem:[#allocation4 + $0x10] sm:$0xff] }
 0x2ad   : > { %v618_v53 = vadd.f32 %v617_v52, %v529_v45  ;;  %v805_v52 = vld [vmem:[#allocation4] sm:$0xff] }
 0x2ae   : > { %v562_v54 = vmul.f32 1.442695, %v561_v51  ;;  %v806_v51 = vld [vmem:[#allocation4 + $0x8] sm:$0xff] }
 0x2af   : > { %v620_v55 = vsel %vm557_vm9, %v618_v53, -inf }
 0x2b0   : > { %1010 = vpow2.f32 %v562_v54  ;;  %621 = vmax.xlane.f32.xlu2 %v620_v55 }
 0x2b6   : > { %v1011_v56 = vpop.eup %1010 }
 0x2b7   : > { %v564_v57 = vsel %vm557_vm9, %v1011_v56, 0.0 }
 0x2b8   : > { %565 = vadd.xlane.f32.xlu0 %v564_v57 }
 0x2cc   : > { %762 = vrot.lane.b32.xlu0 %v1212_v41, %s1112_s13 }
 0x323   : > { %v622_v58 = vpop.xlane.xlu2 %621 }
 0x324   : > { %v623_v59 = vsub.f32 %v618_v53, %v622_v58 }
 0x326   : > { %v624_v60 = vmul.f32 1.442695, %v623_v59  ;;  %v1001_v59 = vld [vmem:[%s1270_s7] ss:$0 sm:$0xff] }
 0x328   : > { %1012 = vpow2.f32 %v624_v60 }
 0x32b   : > { %v566_v61 = vpop.xlane.xlu0 %565 }
 0x32c   : > { %1014 = vrcp.f32 %v566_v61 }
 0x32e   : > { %v1013_v62 = vpop.eup %1012 }
 0x32f   : > { %v626_v63 = vsel %vm557_vm9, %v1013_v62, 0.0 }
 0x330   : > { %627 = vadd.xlane.f32.xlu2 %v626_v63 }
 0x332   : > { %v1015_v1 = vpop.eup %1014 }
 0x333   : > { %v568_v2 = vmul.f32 %v1015_v1, %v1011_v56 }
 0x335   : > { %949 = vmatmul.msk.f32.vlgmr.msrb.gmra.mxu2 %vm557_vm9, %v568_v2 }
 0x33e   : > { %v763_v3 = vpop.permute.xlu0 %762 }
 0x33f   : > { %783 = vmatpush.msra.mxu2 %v763_v3 }
 0x348   : > { %725 = vrot.lane.b32.xlu2 %v507_v37, %s1112_s13  ;;  %v820_v37 = vld [vmem:[#allocation4 + $0x78] sm:$0xff] }
 0x3a3   : > { %v628_v4 = vpop.xlane.xlu2 %627 }
 0x3a4   : > { %1016 = vrcp.f32 %v628_v4 }
 0x3aa   : > { %v1017_v6 = vpop.eup %1016 }
 0x3ab   : > { %v726_v7 = vpop.permute.xlu2 %725  ;;  %v630_v8 = vmul.f32 %v1017_v6, %v1013_v62 }
 0x3ac   : > { %956 = vmatpush.xpose.msk.msra.mxu1 %vm530_vm8, %v726_v7 }
 0x3ad   : > { %952 = vmatmul.msk.f32.vlgmr.msra.gmra.mxu3 %vm557_vm9, %v630_v8 }
 0x3ae   : > { %821 = vmatpush.msra.mxu3 %v820_v37 }
 0x3af   : > { %957 = vmatmul.msk.f32.vlgmr.msra.gmra.mxu1 %vm530_vm8, %v724_v9 }
 0x3b0   : > { %822 = vmatpush.msra.mxu3 %v819_v38 }
 0x3b2   : > { %823 = vmatpush.msra.mxu3 %v818_v39 }
 0x3b4   : > { %824 = vmatpush.msra.mxu3 %v817_v40 }
 0x3b5   : > { %954 = vmatmul.msk.f32.vlgmr.msrb.gmra.mxu3 %vm530_vm8, %v659_v5 }
 0x3b8   : > { %v589_v35 = vpop.f32.mrf.mxu2 }
 0x42c   : > { %v748_v11 = vpop.f32.mrf.mxu1 }
 0x42d   : > { %v749_v12 = vadd.f32 %v748_v11, %v529_v45 }
 0x42f   : > { %v751_v13 = vsel %vm557_vm9, %v749_v12, -inf }
 0x430   : > { %v655_v14 = vpop.f32.mrf.mxu3  ;;  %752 = vmax.xlane.f32.xlu1 %v751_v13 }
 0x438   : > { %v683_v15 = vpop.f32.mrf.mxu3 }
 0x439   : > { %v684_v16 = vadd.f32 %v683_v15, %v529_v45  ;;  %v812_v45 = vld [vmem:[#allocation4 + $0x38] sm:$0xff] }
 0x43b   : > { %v686_v17 = vsel %vm557_vm9, %v684_v16, -inf }
 0x43c   : > { %687 = vmax.xlane.f32.xlu2 %v686_v17 }
 0x4a3   : > { %v753_v18 = vpop.xlane.xlu1 %752 }
 0x4a4   : > { %v754_v19 = vsub.f32 %v749_v12, %v753_v18 }
 0x4a6   : > { %v755_v20 = vmul.f32 1.442695, %v754_v19 }
 0x4a8   : > { %1018 = vpow2.f32 %v755_v20 }
 0x4ae   : > { %v1019_v21 = vpop.eup %1018 }
 0x4af   : > { %v688_v22 = vpop.xlane.xlu2 %687  ;;  %v757_v23 = vsel %vm557_vm9, %v1019_v21, 0.0 }
 0x4b0   : > { %v689_v24 = vsub.f32 %v684_v16, %v688_v22  ;;  %758 = vadd.xlane.f32.xlu2 %v757_v23 }
 0x4b2   : > { %v690_v25 = vmul.f32 1.442695, %v689_v24 }
 0x4b4   : > { %1020 = vpow2.f32 %v690_v25 }
 0x4ba   : > { %v1021_v26 = vpop.eup %1020 }
 0x4bb   : > { %v692_v27 = vsel %vm557_vm9, %v1021_v26, 0.0 }
 0x4bc   : > { %693 = vadd.xlane.f32.xlu1 %v692_v27 }
 0x4c8   : > { %697 = vrot.lane.b32.xlu2 %v1212_v41, %s1111_s12  ;;  %v816_v41 = vld [vmem:[#allocation4 + $0x58] sm:$0xff] }
 0x4c9   : > { %825 = vmatpush.msra.mxu3 %v816_v41 }
 0x4cb   : > { %826 = vmatpush.msra.mxu3 %v815_v42 }
 0x4cd   : > { %827 = vmatpush.msra.mxu3 %v814_v43 }
 0x4cf   : > { %828 = vmatpush.msra.mxu3 %v813_v44 }
 0x4d1   : > { %829 = vmatpush.msra.mxu3 %v812_v45 }
 0x4d3   : > { %830 = vmatpush.msra.mxu3 %v811_v46 }
 0x4d5   : > { %789 = vrot.lane.b32.xlu1 %v655_v14, %s1112_s13  ;;  %831 = vmatpush.msra.mxu3 %v810_v47 }
 0x4d7   : > { %832 = vmatpush.msra.mxu3 %v809_v48 }
 0x4d9   : > { %833 = vmatpush.msra.mxu3 %v808_v49 }
 0x4db   : > { %834 = vmatpush.msra.mxu3 %v807_v50 }
 0x4dd   : > { %835 = vmatpush.msra.mxu3 %v806_v51 }
 0x4df   : > { %836 = vmatpush.msra.mxu3 %v805_v52 }
 0x523   : > { %v759_v28 = vpop.xlane.xlu2 %758 }
 0x524   : > { %1022 = vrcp.f32 %v759_v28 }
 0x52a   : > { %v1023_v29 = vpop.eup %1022 }
 0x52b   : > { %v761_v30 = vmul.f32 %v1023_v29, %v1019_v21  ;;  %v698_v31 = vpop.permute.xlu2 %697 }
 0x52c   : > { %718 = vmatpush.msra.mxu0 %v698_v31 }
 0x52d   : > { %958 = vmatmul.msk.f32.vlgmr.msra.gmra.mxu2 %vm557_vm9, %v761_v30 }
 0x52f   : > { %v694_v32 = vpop.xlane.xlu1 %693 }
 0x530   : > { %1024 = vrcp.f32 %v694_v32 }
 0x536   : > { %v1025_v33 = vpop.eup %1024 }
 0x537   : > { %v696_v34 = vmul.f32 %v1025_v33, %v1021_v26 }
 0x539   : > { %955 = vmatmul.msk.f32.vlgmr.msra.gmra.mxu0 %vm557_vm9, %v696_v34 }
 0x547   : > { %v790_v53 = vpop.permute.xlu1 %789 }
 0x548   : > { %v800_v54 = vsel %vm530_vm8, %v589_v35, %v790_v53 }
 0x5b0   : > { %v785_v36 = vpop.f32.mrf.mxu2 }
 0x5b1   : > { %797 = vrot.lane.b32.xlu2 %v785_v36, %s1110_s11 }
 0x5b6   : > { %v720_v10 = vpop.f32.mrf.mxu0 }
 0x5b7   : > { %793 = vrot.lane.b32.xlu0 %v720_v10, %s1111_s12 }
 0x60b   : > { %v798_v56 = vpop.permute.xlu2 %797 }
 0x629   : > { %v794_v55 = vpop.permute.xlu0 %793 }
 0x62a   : > { %v802_v57 = vsel %vm801_vm10, %v800_v54, %v794_v55 }
 0x62b   : > { %v804_v58 = vsel %vm803_vm11, %v802_v57, %v798_v56 }
 0x62c   : > { %837 = vmatmul.f32.vlgmr.msra.gmra.mxu3 %v804_v58 }
 0x6af   : > { %v838_v60 = vpop.f32.mrf.mxu3 }
 0x6b0   : > { %v841_v61 = vadd.f32 %v838_v60, %v1191_v0 }
 0x6b2   : > { %v846_v62 = vadd.f32 %v1001_v59, %v841_v61 }
 0x6b4   : > { %847 = vst [vmem:[%s351_s21] sm:$0xff] %v846_v62 }
 0x6b5 PF: > { %s20_s27 = sadd.s32 1, %s1100_s27  }
 0x6b6   : > { %p17_p7 = scmp.ge.s32.totalorder %s20_s27, 4  }
 0x6b8   :  { %19 = sbr.rel (!%p17_p7) target bundleno = 2 (0x2), region = 94 }
 0x6bd   :  { %867 = vsyncpa [#allocation3], 1 }
 0x6be   :  { %869 = vsyncpa [#allocation3 + $0x1], 1 }
 0x6bf   :  { %870 = vsyncpa [#allocation5], 1 }

// kernel: encoder_decoder_forward.23
= control target key start
LH: loop header
LB: loop body
LE: loop exit
PB: predicated region body
PF: predicated region fallthrough
CT: control target
= control target key end

     0   :  { %10 = vsyncpa [#allocation3], 0  ;;  %s759_s0 = inlined_call_operand.vmem [shape: f32[2,8,128], index: 0, kind: input, shape index: {}]   ;;  %s760_s1 = inlined_call_operand.vmem [shape: f32[1,128], index: 1, kind: input, shape index: {}]   ;;  %s761_s2 = inlined_call_operand.vmem [shape: f32[1,128], index: 2, kind: input, shape index: {}]   ;;  %s762_s3 = inlined_call_operand.hbm [shape: f32[128,128], index: 3, kind: input, shape index: {}]   ;;  %s763_s4 = inlined_call_operand.vmem [shape: f32[1,128], index: 4, kind: input, shape index: {}]   ;;  %s764_s5 = inlined_call_operand.hbm [shape: f32[2,8,128], index: 5, kind: output, shape index: {}]  }
   0x1   :  { %11 = vsyncpa [#allocation4], 0 }
   0x2   :  { %13 = vsyncpa [#allocation4 + $0x1], 0  ;;  %s650_s18 = smov 0   ;;  %s652_s19 = smov 0  }
   0x3   :  { %s654_s20 = smov 0   ;;  %s656_s21 = smov 0  }
   0x4 LB: > { %s671_s22 = sadd.s32 4294967295, %s613_s21   ;;  %s436_s23 = sadd.s32 4294967294, %s613_s21   ;;  %s613_s21 = sphi %s656_s21, %s770_s21   ;;  %s609_s20 = sphi %s654_s20, %s769_s20   ;;  %s605_s19 = sphi %s652_s19, %s768_s19   ;;  %s601_s18 = sphi %s650_s18, %s767_s18  }
   0x5   : > { %s675_s24 = sadd.s32 1, %s613_s21   ;;  %s136_s25 = sadd.s32 1, %s609_s20 }
   0x6   : > { %s133_s26 = ssub.s32 %s613_s21, %s675_s24  ;;  %p146_p0 = scmp.ne.s32.totalorder %s609_s20, %s605_s19 }
   0x7   : > { %p134_p1 = scmp.eq.s32.totalorder %s133_s26, 0  ;;  %p147_p2 = scmp.eq.s32.totalorder %s671_s22, 1 }
   0x8   : > { %p152_p3 = scmp.ne.s32.totalorder %s605_s19, %s601_s18  ;;  %p153_p4 = scmp.eq.s32.totalorder %s436_s23, 1 }
   0x9   : > { %s686_s27 = scalar_select %p134_p1, %s609_s20, %s136_s25  }
   0xa   : > { %p688_p5 = por %p147_p2, %p146_p0  ;;  %p692_p6 = por %p153_p4, %p152_p3 }
   0xb   : > { %p437_p7 = scmp.ge.s32.totalorder %s613_s21, 1  ;;  %p160_p8 = scmp.lt.s32.totalorder %s613_s21, 3 }
   0xc   : > { %p462_p9 = scmp.eq.s32.totalorder %s671_s22, 0  ;;  %s177_s7 = sshll.u32 %s762_s3, 4  ;;  %s178_s7 = int_to_ptr.hbm [resolvable:$true] %s177_s7 }
   0xd   : > { %p161_p10 = pnand %p437_p7, %p160_p8  ;;  %s615_s8 = smov [#allocation2]  }
   0xe   : > { %s179_s9 = sshll.u32 %s615_s8, 4  ;;  %s616_s10 = smov 128   ;;  %s180_s9 = int_to_ptr.vmem [resolvable:$true] %s179_s9 }
   0xf   : > { %p454_p11 = pneg %p161_p10  ;;  %s617_s11 = smov 8  }
  0x10   : > { %205 = sbr.rel (%p161_p10) target bundleno = 698 (0x2ba), region = 40 }
  0x11   : > { %p455_p12 = pnand %p462_p9, %p454_p11 }
  0x13   : > { %457 = dma.hbm_to_vmem [thread:$0]  (!%p455_p12), %s178_s7, 2048, %s180_s9, [#allocation3], %s616_s10, %s616_s10, %s617_s11  }
  0x15   : > { %592 = dma.done.wait (%p462_p9), [#allocation3], 2048  }
  0x16   : > { %594 = vsyncadd (%p462_p9), [#allocation3], 4294965248  ;;  %p233_p13 = scmp.lt.s32.totalorder %s671_s22, 1  ;;  %v618_v1 = vmov 128.0   ;;  %v619_v12 = vmov 127.0   ;;  %v313_v15 = vld [vmem:[#allocation2 + $0x78] sm:$0xff] }
  0x17   : > { %505 = vrcp.f32 %v618_v1  ;;  %318 = vmatpush.msra.mxu0 %v313_v15  ;;  %v312_v16 = vld [vmem:[#allocation2 + $0x70] sm:$0xff]  ;;  %v311_v18 = vld [vmem:[#allocation2 + $0x68] sm:$0xff]  ;;  %v310_v19 = vld [vmem:[#allocation2 + $0x60] sm:$0xff]  ;;  %s230_s7 = sand.u32 1, %s605_s19   ;;  %s445_s9 = sshll.u32 %s671_s22, 3 }
  0x18   : > { %s234_s12 = scalar_select %p233_p13, %s671_s22, 1  ;;  %507 = vrcp.f32 %v619_v12  ;;  %v309_v20 = vld [vmem:[#allocation2 + $0x58] sm:$0xff]  ;;  %v308_v22 = vld [vmem:[#allocation2 + $0x50] sm:$0xff]  ;;  %v307_v23 = vld [vmem:[#allocation2 + $0x48] sm:$0xff] }
  0x19   : > { %319 = vmatpush.msra.mxu0 %v312_v16  ;;  %v306_v25 = vld [vmem:[#allocation2 + $0x40] sm:$0xff]  ;;  %v305_v26 = vld [vmem:[#allocation2 + $0x38] sm:$0xff]  ;;  %v304_v28 = vld [vmem:[#allocation2 + $0x30] sm:$0xff]  ;;  %s442_s8 = sshll.u32 %s230_s7, 3  ;;  %s567_s26 = scalar_lea.hbm %s764_s5, 16 }
  0x1a   : > { %s443_s13 = sshll.u32 %s234_s12, 3  ;;  %v303_v31 = vld [vmem:[#allocation2 + $0x28] sm:$0xff]  ;;  %v302_v32 = vld [vmem:[#allocation2 + $0x20] sm:$0xff]  ;;  %v301_v33 = vld [vmem:[#allocation2 + $0x18] sm:$0xff]  ;;  %s360_s12 = scalar_lea.hbm %s764_s5, %s445_s9 }
  0x1b   : > { %s236_s16 = scalar_lea.vmem %s759_s0, %s443_s13  ;;  %320 = vmatpush.msra.mxu0 %v311_v18  ;;  %v300_v34 = vld [vmem:[#allocation2 + $0x10] sm:$0xff]  ;;  %v299_v36 = vld [vmem:[#allocation2 + $0x8] sm:$0xff]  ;;  %v298_v38 = vld [vmem:[#allocation2] sm:$0xff]  ;;  %s232_s13 = scalar_lea.vmem [#allocation5], %s442_s8 }
  0x1c   : > { %v237_v0 = vld [vmem:[%s236_s16] sm:$0xff]  ;;  %s362_s14 = sshll.u32 %s232_s13, 4  ;;  %s364_s15 = sshll.u32 %s360_s12, 4  ;;  %s363_s14 = int_to_ptr.vmem [resolvable:$true] %s362_s14  ;;  %s365_s15 = int_to_ptr.hbm [resolvable:$true] %s364_s15 }
  0x1d   : > { %240 = vadd.xlane.f32.xlu0 %v237_v0  ;;  %v506_v2 = vpop.eup %505  ;;  %321 = vmatpush.msra.mxu0 %v310_v19  ;;  %v502_v52 = vld [vmem:[%s760_s1] ss:$0 sm:$0xff]  ;;  %s350_s16 = scalar_lea.sflag [#allocation4], %s230_s7  ;;  %s561_s17 = sshra.s32 %s365_s15, 4  ;;  %s562_s17 = int_to_ptr.hbm [resolvable:$true] %s561_s17 }
  0x1e   : > { %v243_v3 = vmul.f32 128.0, %v506_v2  ;;  %vm247_vm0 = vweird.f32 %v506_v2  ;;  %v508_v13 = vpop.eup %507  ;;  %v503_v59 = vld [vmem:[%s761_s2] ss:$0 sm:$0xff]  ;;  %s563_s23 = scalar_lea.hbm %s562_s17, 8  ;;  %p568_p3 = scmp.lt.s32.totalorder %s562_s17, %s764_s5 }
  0x1f   : > { %v255_v14 = vmul.f32 127.0, %v508_v13  ;;  %322 = vmatpush.msra.mxu0 %v309_v20  ;;  %vm259_vm1 = vweird.f32 %v508_v13  ;;  %v504_v63 = vld [vmem:[%s763_s4] ss:$0 sm:$0xff]  ;;  %p564_p0 = scmp.ne.s32.totalorder %s562_s17, %s563_s23  ;;  %p569_p4 = scmp.lt.s32.totalorder %s567_s26, %s563_s23 }
  0x20   : > { %v244_v4 = vsub.f32 1.0, %v243_v3 }
  0x21   : > { %v256_v17 = vsub.f32 1.0, %v255_v14  ;;  %323 = vmatpush.msra.mxu0 %v308_v22  ;;  %p565_p1 = pnand %p564_p0, %p688_p5  ;;  %p570_p7 = por %p569_p4, %p568_p3 }
  0x22   : > { %v245_v5 = vmul.f32 %v506_v2, %v244_v4 }
  0x23   : > { %v257_v21 = vmul.f32 %v508_v13, %v256_v17  ;;  %324 = vmatpush.msra.mxu0 %v307_v23  ;;  %p566_p2 = pneg %p565_p1 }
  0x24   : > { %v246_v6 = vadd.f32 %v506_v2, %v245_v5 }
  0x25   : > { %v258_v24 = vadd.f32 %v508_v13, %v257_v21  ;;  %325 = vmatpush.msra.mxu0 %v306_v25  ;;  %p571_p8 = pnand %p570_p7, %p566_p2 }
  0x26   : > { %v248_v7 = vsel %vm247_vm0, %v506_v2, %v246_v6 }
  0x27   : > { %v260_v27 = vsel %vm259_vm1, %v508_v13, %v258_v24  ;;  %326 = vmatpush.msra.mxu0 %v305_v26 }
  0x29   : > { %327 = vmatpush.msra.mxu0 %v304_v28 }
  0x2b   : > { %328 = vmatpush.msra.mxu0 %v303_v31 }
  0x2d   : > { %329 = vmatpush.msra.mxu0 %v302_v32 }
  0x2f   : > { %330 = vmatpush.msra.mxu0 %v301_v33 }
  0x31   : > { %331 = vmatpush.msra.mxu0 %v300_v34 }
  0x33   : > { %332 = vmatpush.msra.mxu0 %v299_v36 }
  0x35   : > { %333 = vmatpush.msra.mxu0 %v298_v38 }
  0x90   : > { %v241_v8 = vpop.xlane.xlu0 %240 }
  0x91   : > { %v249_v9 = vmul.f32 %v248_v7, %v241_v8 }
  0x93   : > { %v713_v10 = vsub.f32 %v237_v0, %v249_v9 }
  0x95   : > { %v251_v11 = vmul.f32 %v713_v10, %v713_v10  ;;  %v265_v57 = vmul.f32 %v502_v52, %v713_v10 }
  0x97   : > { %252 = vadd.xlane.f32.xlu0 %v251_v11 }
 0x10a   : > { %v253_v29 = vpop.xlane.xlu0 %252 }
 0x10b   : > { %v261_v30 = vmul.f32 %v260_v27, %v253_v29 }
 0x10d   : > { %509 = vrsqrt.f32 %v261_v30  ;;  %vm273_vm2 = vcmp.eq.f32.partialorder %v261_v30, inf  ;;  %v276_v44 = vand.u32 2147483648, %v261_v30  ;;  %vm275_vm3 = vcmp.eq.f32.partialorder %v261_v30, 0.0 }
 0x113   : > { %v510_v35 = vpop.eup %509 }
 0x114   : > { %v267_v37 = vmul.f32 %v510_v35, %v261_v30 }
 0x116   : > { %v268_v39 = vmul.f32 %v510_v35, %v267_v37 }
 0x118   : > { %v269_v40 = vmul.f32 0.5, %v268_v39 }
 0x11a   : > { %v270_v41 = vsub.f32 1.5, %v269_v40 }
 0x11c   : > { %v271_v42 = vmul.f32 %v510_v35, %v270_v41 }
 0x11e   : > { %v272_v43 = vmul.f32 %v271_v42, %v261_v30 }
 0x120   : > { %v274_v45 = vsel %vm273_vm2, %v261_v30, %v272_v43 }
 0x121   : > { %v277_v46 = vsel %vm275_vm3, %v276_v44, %v274_v45 }
 0x122   : > { %v278_v47 = vadd.f32 1e-06, %v277_v46 }
 0x124   : > { %511 = vrcp.f32 %v278_v47  ;;  %v290_v51 = vand.u32 2147483648, %v278_v47  ;;  %v288_v54 = vand.u32 2147483647, %v278_v47  ;;  %vm284_vm5 = vweird.f32 %v278_v47 }
 0x126   : > { %v291_v56 = vor.u32 1.1754944e-38, %v290_v51  ;;  %vm289_vm7 = vcmp.eq.f32.partialorder %v288_v54, 8.507059e+37 }
 0x12a   : > { %v512_v48 = vpop.eup %511 }
 0x12b   : > { %v280_v49 = vmul.f32 %v512_v48, %v278_v47  ;;  %vm285_vm4 = vweird.f32 %v512_v48 }
 0x12c   : > { %vm286_vm6 = vmor %vm284_vm5, %vm285_vm4 }
 0x12d   : > { %v281_v50 = vsub.f32 1.0, %v280_v49 }
 0x12f   : > { %v282_v53 = vmul.f32 %v512_v48, %v281_v50 }
 0x131   : > { %v283_v55 = vadd.f32 %v512_v48, %v282_v53 }
 0x133   : > { %v287_v58 = vsel %vm286_vm6, %v512_v48, %v283_v55 }
 0x134   : > { %v292_v60 = vsel %vm289_vm7, %v291_v56, %v287_v58 }
 0x135   : > { %v293_v61 = vmul.f32 %v292_v60, %v265_v57 }
 0x137   : > { %v297_v62 = vadd.f32 %v503_v59, %v293_v61 }
 0x139   : > { %334 = vmatmul.f32.vlgmr.msra.gmra.mxu0 %v297_v62 }
 0x1b6   : > { %v335_v0 = vpop.f32.mrf.mxu0 }
 0x1b7   : > { %v336_v1 = vadd.f32 %v504_v63, %v335_v0 }
 0x1b9   : > { %338 = vmax.xlane.f32.xlu1 %v336_v1 }
 0x22c   : > { %v339_v2 = vpop.xlane.xlu1 %338 }
 0x22d   : > { %v340_v3 = vsub.f32 %v336_v1, %v339_v2 }
 0x22f   : > { %v341_v4 = vmul.f32 1.442695, %v340_v3 }
 0x231   : > { %513 = vpow2.f32 %v341_v4 }
 0x237   : > { %v514_v5 = vpop.eup %513 }
 0x238   : > { %343 = vadd.xlane.f32.xlu1 %v514_v5 }
 0x2ab   : > { %v344_v6 = vpop.xlane.xlu1 %343 }
 0x2ac   : > { %515 = vlog2.f32 %v344_v6 }
 0x2b2   : > { %v516_v7 = vpop.eup %515 }
 0x2b3   : > { %v346_v8 = vmul.f32 0.6931472, %v516_v7 }
 0x2b5   : > { %v347_v9 = vsub.f32 %v340_v3, %v346_v8 }
 0x2b7   : > { %348 = vst [vmem:[%s232_s13] sm:$0xff] %v347_v9 }
 0x2b8   : > { %574 = shalt.err (!%p571_p8)
}
 0x2b9   : > { %452 = dma.vmem_to_hbm [thread:$0]  (%p688_p5), %s363_s14, 128, %s365_s15, %s350_s16  }
 0x2ba PF: > { %p464_p9 = scmp.ge.s32.totalorder %s613_s21, 2  ;;  %s376_s7 = sand.u32 1, %s601_s18  }
 0x2bb   : > { %s377_s8 = scalar_lea.sflag [#allocation4], %s376_s7 }
 0x2bc   : > { %p459_p10 = pnand %p464_p9, %p692_p6 }
 0x2be   : > { %p460_p11 = pneg %p459_p10 }
 0x2c0   : > { %596 = dma.done.wait (%p460_p11), %s377_s8, 128  }
 0x2c1   : > { %598 = vsyncadd (%p460_p11), %s377_s8, 4294967168  ;;  %p16_p12 = scmp.ge.s32.totalorder %s675_s24, 4   ;;  %s767_s18 = smov %s605_s19 }
 0x2c2   : > { %s768_s19 = smov %s609_s20  ;;  %s769_s20 = smov %s686_s27 }
 0x2c3   : > { %s770_s21 = smov %s675_s24  ;;  %18 = sbr.rel (!%p16_p12) target bundleno = 4 (0x4), region = 80 }
 0x2c8   :  { %383 = vsyncpa [#allocation3], 1 }
 0x2c9   :  { %385 = vsyncpa [#allocation3 + $0x1], 1 }
 0x2ca   :  { %386 = vsyncpa [#allocation4], 1 }
 0x2cb   :  { %388 = vsyncpa [#allocation4 + $0x1], 1 }

// kernel: encoder_decoder_forward.18
= control target key start
LH: loop header
LB: loop body
LE: loop exit
PB: predicated region body
PF: predicated region fallthrough
CT: control target
= control target key end

     0   :  { %16 = vsyncpa [#allocation3], 0  ;;  %s1491_s0 = inlined_call_operand.vmem [shape: f32[2,8,128], index: 0, kind: input, shape index: {}]   ;;  %s1492_s1 = inlined_call_operand.vmem [shape: f32[2,8,128], index: 1, kind: input, shape index: {}]   ;;  %s1493_s2 = inlined_call_operand.vmem [shape: f32[2,8,8], index: 2, kind: input, shape index: {}]   ;;  %s1494_s3 = inlined_call_operand.vmem [shape: f32[1,128], index: 3, kind: input, shape index: {}]   ;;  %s1495_s4 = inlined_call_operand.vmem [shape: f32[1,128], index: 4, kind: input, shape index: {}]   ;;  %s1496_s5 = inlined_call_operand.hbm [shape: f32[128,128], index: 5, kind: input, shape index: {}]   ;;  %s1497_s6 = inlined_call_operand.vmem [shape: f32[1,128], index: 6, kind: input, shape index: {}]   ;;  %s1498_s7 = inlined_call_operand.hbm [shape: f32[128,256], index: 7, kind: input, shape index: {}]   ;;  %s1499_s8 = inlined_call_operand.vmem [shape: f32[1,256], index: 8, kind: input, shape index: {}]   ;;  %s1500_s9 = inlined_call_operand.hbm [shape: f32[128,128], index: 9, kind: input, shape index: {}]   ;;  %s1501_s10 = inlined_call_operand.vmem [shape: f32[1,128], index: 10, kind: input, shape index: {}]   ;;  %s1502_s11 = inlined_call_operand.vmem [shape: f32[2,8,128], index: 11, kind: output, shape index: {}]  }
   0x1   :  { %17 = vsyncpa [#allocation5], 0  ;;  %s1356_s17 = smov 0  }
   0x2 LB: > { %s334_s20 = sshll.u32 %s1498_s7, 4  ;;  %s1365_s21 = sadd.s32 4294967295, %s1282_s17   ;;  %s1282_s17 = sphi %s1356_s17, %s23_s17   ;;  %s335_s20 = int_to_ptr.hbm [resolvable:$true] %s334_s20 }
   0x3   : > { %p1075_p0 = scmp.ge.s32.totalorder %s1282_s17, 1  ;;  %p300_p1 = scmp.lt.s32.totalorder %s1282_s17, 3 }
   0x4   : > { %p1124_p2 = scmp.eq.s32.totalorder %s1365_s21, 0  ;;  %s1284_s23 = smov [#allocation4]  }
   0x5   : > { %p1370_p3 = pnand %p1075_p0, %p300_p1  ;;  %s336_s24 = sshll.u32 %s1284_s23, 4  ;;  %s337_s24 = int_to_ptr.vmem [resolvable:$true] %s336_s24 }
   0x6   : > { %s317_s27 = sshll.u32 %s1496_s5, 4  ;;  %s1285_s29 = smov [#allocation2]   ;;  %s318_s27 = int_to_ptr.hbm [resolvable:$true] %s317_s27 }
   0x7   : > { %p1114_p4 = pneg %p1370_p3  ;;  %s319_s30 = sshll.u32 %s1285_s29, 4  ;;  %s320_s30 = int_to_ptr.vmem [resolvable:$true] %s319_s30 }
   0x8   : > { %s1286_s12 = smov 256   ;;  %s1287_s13 = smov 16  }
   0x9   : > { %p1381_p5 = pnand %p1124_p2, %p1114_p4  ;;  %s351_s16 = sshll.u32 %s1500_s9, 4  ;;  %s352_s16 = int_to_ptr.hbm [resolvable:$true] %s351_s16 }
   0xa   : > { %s1288_s18 = smov 128   ;;  %s1289_s19 = smov 8  }
   0xb   : > { %1120 = dma.hbm_to_vmem [thread:$0]  (!%p1381_p5), %s335_s20, 4096, %s337_s24, [#allocation5], %s1286_s12, %s1286_s12, %s1287_s13  }
   0xc   : > { %1117 = dma.hbm_to_vmem [thread:$0]  (!%p1381_p5), %s318_s27, 2048, %s320_s30, [#allocation3], %s1288_s18, %s1288_s18, %s1289_s19  }
   0xd   : > { %s1290_s23 = smov [#allocation6]   ;;  %393 = sbr.rel (%p1370_p3) target bundleno = 1712 (0x6b0), region = 64 }
   0xe   : > { %s353_s25 = sshll.u32 %s1290_s23, 4  ;;  %s354_s25 = int_to_ptr.vmem [resolvable:$true] %s353_s25 }
   0xf   : > { %1123 = dma.hbm_to_vmem [thread:$0]  (!%p1381_p5), %s352_s16, 2048, %s354_s25, [#allocation5], %s1288_s18, %s1288_s18, %s1289_s19  }
  0x12   : > { %1273 = dma.done.wait (%p1124_p2), [#allocation3], 2048  }
  0x13   : > { %1275 = vsyncadd (%p1124_p2), [#allocation3], 4294965248 }
  0x14   : > { %1277 = dma.done.wait (%p1124_p2), [#allocation5], 6144  }
  0x15   : > { %1279 = vsyncadd (%p1124_p2), [#allocation5], 4294961152  ;;  %p450_p6 = scmp.lt.s32.totalorder %s1365_s21, 1  ;;  %v1291_v1 = vmov 128.0   ;;  %v1292_v12 = vmov 127.0   ;;  %v598_v13 = vld [vmem:[#allocation4 + $0xf0] sm:$0xff] }
  0x16   : > { %1154 = vrcp.f32 %v1291_v1  ;;  %606 = vmatpush.msra.mxu1 %v598_v13  ;;  %v596_v14 = vld [vmem:[#allocation4 + $0xe0] sm:$0xff]  ;;  %v594_v16 = vld [vmem:[#allocation4 + $0xd0] sm:$0xff]  ;;  %v542_v19 = vld [vmem:[#allocation2 + $0x78] sm:$0xff]  ;;  %vm647_vm8 = vcmask 261120   ;;  %s1293_s16 = smov 96   ;;  %s1294_s23 = smov 64  }
  0x17   : > { %s1506_s21 = smov (!%p450_p6, %s1365_s21), 1  ;;  %1156 = vrcp.f32 %v1292_v12  ;;  %v592_v17 = vld [vmem:[#allocation4 + $0xc0] sm:$0xff]  ;;  %v590_v20 = vld [vmem:[#allocation4 + $0xb0] sm:$0xff]  ;;  %547 = vmatpush.msra.mxu0 %v542_v19  ;;  %v599_v21 = vld [vmem:[#allocation4 + $0xf8] sm:$0xff]  ;;  %s1295_s25 = smov 32   ;;  %vm674_vm9 = vcmask 64512  }
  0x18   : > { %s1406_s20 = sshll.u32 %s1506_s21, 3  ;;  %607 = vmatpush.msra.mxu1 %v596_v14  ;;  %626 = vmatpush.msra.mxu2 %v599_v21  ;;  %v541_v22 = vld [vmem:[#allocation2 + $0x70] sm:$0xff]  ;;  %v588_v23 = vld [vmem:[#allocation4 + $0xa0] sm:$0xff]  ;;  %v597_v25 = vld [vmem:[#allocation4 + $0xe8] sm:$0xff]  ;;  %vm918_vm10 = vcmask 523264   ;;  %vm920_vm11 = vcmask 785408  }
  0x19   : > { %s453_s26 = scalar_lea.vmem %s1491_s0, %s1406_s20  ;;  %548 = vmatpush.msra.mxu0 %v541_v22  ;;  %v540_v26 = vld [vmem:[#allocation2 + $0x68] sm:$0xff]  ;;  %v586_v27 = vld [vmem:[#allocation4 + $0x90] sm:$0xff]  ;;  %v595_v28 = vld [vmem:[#allocation4 + $0xd8] sm:$0xff]  ;;  %s457_s28 = scalar_lea.vmem %s1492_s1, %s1406_s20 }
  0x1a   : > { %v1412_v0 = vld [vmem:[%s453_s26] sm:$0xff]  ;;  %608 = vmatpush.msra.mxu1 %v594_v16  ;;  %627 = vmatpush.msra.mxu2 %v597_v25  ;;  %v593_v31 = vld [vmem:[#allocation4 + $0xc8] sm:$0xff]  ;;  %v538_v32 = vld [vmem:[#allocation2 + $0x58] sm:$0xff]  ;;  %s461_s26 = scalar_lea.vmem %s1493_s2, %s1406_s20  ;;  %s465_s30 = scalar_lea.vmem %s1502_s11, %s1406_s20 }
  0x1b   : > { %469 = vadd.xlane.f32.xlu0 %v1412_v0  ;;  %549 = vmatpush.msra.mxu0 %v540_v26  ;;  %v539_v29 = vld [vmem:[#allocation2 + $0x60] sm:$0xff]  ;;  %v582_v33 = vld [vmem:[#allocation4 + $0x70] sm:$0xff]  ;;  %v591_v35 = vld [vmem:[#allocation4 + $0xb8] sm:$0xff] }
  0x1c   : > { %v1155_v2 = vpop.eup %1154  ;;  %609 = vmatpush.msra.mxu1 %v592_v17  ;;  %v584_v30 = vld [vmem:[#allocation4 + $0x80] sm:$0xff]  ;;  %628 = vmatpush.msra.mxu2 %v595_v28  ;;  %v537_v36 = vld [vmem:[#allocation2 + $0x50] sm:$0xff]  ;;  %v589_v38 = vld [vmem:[#allocation4 + $0xa8] sm:$0xff] }
  0x1d   : > { %v472_v3 = vmul.f32 128.0, %v1155_v2  ;;  %vm476_vm0 = vweird.f32 %v1155_v2  ;;  %v1157_v15 = vpop.eup %1156  ;;  %550 = vmatpush.msra.mxu0 %v539_v29  ;;  %v580_v37 = vld [vmem:[#allocation4 + $0x60] sm:$0xff]  ;;  %v536_v39 = vld [vmem:[#allocation2 + $0x48] sm:$0xff]  ;;  %v578_v40 = vld [vmem:[#allocation4 + $0x50] sm:$0xff] }
  0x1e   : > { %v484_v18 = vmul.f32 127.0, %v1157_v15  ;;  %610 = vmatpush.msra.mxu1 %v590_v20  ;;  %629 = vmatpush.msra.mxu2 %v593_v31  ;;  %v587_v42 = vld [vmem:[#allocation4 + $0x98] sm:$0xff]  ;;  %vm488_vm1 = vweird.f32 %v1157_v15  ;;  %v535_v43 = vld [vmem:[#allocation2 + $0x40] sm:$0xff]  ;;  %v585_v45 = vld [vmem:[#allocation4 + $0x88] sm:$0xff] }
  0x1f   : > { %v473_v4 = vsub.f32 1.0, %v472_v3  ;;  %551 = vmatpush.msra.mxu0 %v538_v32  ;;  %v576_v44 = vld [vmem:[#allocation4 + $0x40] sm:$0xff]  ;;  %v534_v46 = vld [vmem:[#allocation2 + $0x38] sm:$0xff]  ;;  %v574_v47 = vld [vmem:[#allocation4 + $0x30] sm:$0xff] }
  0x20   : > { %v485_v24 = vsub.f32 1.0, %v484_v18  ;;  %611 = vmatpush.msra.mxu1 %v588_v23  ;;  %630 = vmatpush.msra.mxu2 %v591_v35  ;;  %v583_v49 = vld [vmem:[#allocation4 + $0x78] sm:$0xff]  ;;  %v533_v50 = vld [vmem:[#allocation2 + $0x30] sm:$0xff]  ;;  %v572_v51 = vld [vmem:[#allocation4 + $0x20] sm:$0xff] }
  0x21   : > { %v474_v5 = vmul.f32 %v1155_v2, %v473_v4  ;;  %552 = vmatpush.msra.mxu0 %v537_v36  ;;  %v581_v53 = vld [vmem:[#allocation4 + $0x68] sm:$0xff]  ;;  %v570_v56 = vld [vmem:[#allocation4 + $0x10] sm:$0xff]  ;;  %v579_v57 = vld [vmem:[#allocation4 + $0x58] sm:$0xff] }
  0x22   : > { %612 = vmatpush.msra.mxu1 %v586_v27  ;;  %v486_v34 = vmul.f32 %v1157_v15, %v485_v24  ;;  %631 = vmatpush.msra.mxu2 %v589_v38  ;;  %v532_v55 = vld [vmem:[#allocation2 + $0x28] sm:$0xff]  ;;  %v531_v58 = vld [vmem:[#allocation2 + $0x20] sm:$0xff]  ;;  %v530_v62 = vld [vmem:[#allocation2 + $0x18] sm:$0xff] }
  0x23   : > { %v475_v6 = vadd.f32 %v1155_v2, %v474_v5  ;;  %553 = vmatpush.msra.mxu0 %v536_v39  ;;  %v568_v59 = vld [vmem:[#allocation4] sm:$0xff]  ;;  %v577_v61 = vld [vmem:[#allocation4 + $0x48] sm:$0xff]  ;;  %v575_v63 = vld [vmem:[#allocation4 + $0x38] sm:$0xff] }
  0x24   : > { %613 = vmatpush.msra.mxu1 %v584_v30  ;;  %v487_v41 = vadd.f32 %v1157_v15, %v486_v34  ;;  %632 = vmatpush.msra.mxu2 %v587_v42  ;;  %v567_v60 = vld [vmem:[%s457_s28] sm:$0xff]  ;;  %v529_v1 = vld [vmem:[#allocation2 + $0x10] sm:$0xff]  ;;  %v528_v4 = vld [vmem:[#allocation2 + $0x8] sm:$0xff] }
  0x25   : > { %v477_v7 = vsel %vm476_vm0, %v1155_v2, %v475_v6  ;;  %554 = vmatpush.msra.mxu0 %v535_v43  ;;  %v573_v2 = vld [vmem:[#allocation4 + $0x28] sm:$0xff]  ;;  %v571_v6 = vld [vmem:[#allocation4 + $0x18] sm:$0xff]  ;;  %v1150_v23 = vld [vmem:[%s1494_s3] ss:$0 sm:$0xff] }
  0x26   : > { %614 = vmatpush.msra.mxu1 %v582_v33  ;;  %v489_v48 = vsel %vm488_vm1, %v1157_v15, %v487_v41  ;;  %633 = vmatpush.msra.mxu2 %v585_v45  ;;  %v1151_v30 = vld [vmem:[%s1495_s4] ss:$0 sm:$0xff] }
  0x27   : > { %555 = vmatpush.msra.mxu0 %v534_v46  ;;  %v600_v34 = vld [vmem:[%s1499_s8] sm:$0x3] }
  0x28   : > { %615 = vmatpush.msra.mxu1 %v580_v37  ;;  %634 = vmatpush.msra.mxu2 %v583_v49  ;;  %v602_v35 = vperm.slane %v600_v34, 0 }
  0x29   : > { %556 = vmatpush.msra.mxu0 %v533_v50 }
  0x2a   : > { %616 = vmatpush.msra.mxu1 %v578_v40  ;;  %635 = vmatpush.msra.mxu2 %v581_v53  ;;  %v1152_v40 = vld [vmem:[%s1497_s6] ss:$0 sm:$0xff] }
  0x2b   : > { %557 = vmatpush.msra.mxu0 %v532_v55 }
  0x2c   : > { %617 = vmatpush.msra.mxu1 %v576_v44  ;;  %636 = vmatpush.msra.mxu2 %v579_v57 }
  0x2d   : > { %558 = vmatpush.msra.mxu0 %v531_v58 }
  0x2e   : > { %618 = vmatpush.msra.mxu1 %v574_v47  ;;  %637 = vmatpush.msra.mxu2 %v577_v61  ;;  %v646_v47 = vld [vmem:[%s461_s26] sm:$0xff] }
  0x2f   : > { %559 = vmatpush.msra.mxu0 %v530_v62 }
  0x30   : > { %619 = vmatpush.msra.mxu1 %v572_v51  ;;  %638 = vmatpush.msra.mxu2 %v575_v63 }
  0x31   : > { %560 = vmatpush.msra.mxu0 %v529_v1 }
  0x32   : > { %620 = vmatpush.msra.mxu1 %v570_v56  ;;  %639 = vmatpush.msra.mxu2 %v573_v2 }
  0x33   : > { %561 = vmatpush.msra.mxu0 %v528_v4 }
  0x34   : > { %621 = vmatpush.msra.mxu1 %v568_v59  ;;  %640 = vmatpush.msra.mxu2 %v571_v6 }
  0x35   : > { %622 = vmatmul.f32.vlgmr.msra.gmra.mxu1 %v567_v60 }
  0x8e   : > { %v470_v8 = vpop.xlane.xlu0 %469 }
  0x8f   : > { %v478_v9 = vmul.f32 %v477_v7, %v470_v8  ;;  %v527_v7 = vld [vmem:[#allocation2] sm:$0xff] }
  0x90   : > { %562 = vmatpush.msra.mxu0 %v527_v7 }
  0x91   : > { %v1416_v10 = vsub.f32 %v1412_v0, %v478_v9 }
  0x93   : > { %v480_v11 = vmul.f32 %v1416_v10, %v1416_v10  ;;  %v494_v28 = vmul.f32 %v1150_v23, %v1416_v10  ;;  %v603_v10 = vperm.slane %v600_v34, 1 }
  0x95   : > { %481 = vadd.xlane.f32.xlu0 %v480_v11  ;;  %v569_v11 = vld [vmem:[#allocation4 + $0x8] sm:$0xff] }
  0x96   : > { %641 = vmatpush.msra.mxu2 %v569_v11 }
  0x97   : > { %642 = vmatmul.f32.vlgmr.msra.gmra.mxu2 %v567_v60 }
  0xb2   : > { %v623_v36 = vpop.f32.mrf.mxu1 }
  0xb3   : > { %v624_v37 = vadd.f32 %v623_v36, %v602_v35 }
  0xb5   : > { %711 = vrot.lane.b32.xlu1 %v624_v37, %s1293_s16  ;;  %1088 = vmatpush.xpose.msk.msrb.mxu0 %vm647_vm8, %v624_v37 }
 0x108   : > { %v482_v52 = vpop.xlane.xlu0 %481 }
 0x109   : > { %v490_v54 = vmul.f32 %v489_v48, %v482_v52 }
 0x10b   : > { %1158 = vrsqrt.f32 %v490_v54  ;;  %vm502_vm2 = vcmp.eq.f32.partialorder %v490_v54, inf  ;;  %v505_v15 = vand.u32 2147483648, %v490_v54  ;;  %vm504_vm3 = vcmp.eq.f32.partialorder %v490_v54, 0.0 }
 0x111   : > { %v1159_v3 = vpop.eup %1158 }
 0x112   : > { %v496_v5 = vmul.f32 %v1159_v3, %v490_v54 }
 0x114   : > { %v497_v8 = vmul.f32 %v1159_v3, %v496_v5 }
 0x116   : > { %v498_v9 = vmul.f32 0.5, %v497_v8 }
 0x118   : > { %v499_v12 = vsub.f32 1.5, %v498_v9 }
 0x11a   : > { %v500_v13 = vmul.f32 %v1159_v3, %v499_v12  ;;  %v643_v38 = vpop.f32.mrf.mxu2 }
 0x11b   : > { %v1436_v39 = vadd.f32 %v643_v38, %v603_v10  ;;  %v937_v38 = vld [vmem:[#allocation6 + $0x78] sm:$0xff] }
 0x11c   : > { %v501_v14 = vmul.f32 %v500_v13, %v490_v54 }
 0x11d   : > { %749 = vrot.lane.b32.xlu0 %v1436_v39, %s1293_s16  ;;  %704 = vmatpush.msrb.mxu2 %v1436_v39 }
 0x11e   : > { %v503_v16 = vsel %vm502_vm2, %v490_v54, %v501_v14 }
 0x11f   : > { %v506_v17 = vsel %vm504_vm3, %v505_v15, %v503_v16 }
 0x120   : > { %v507_v18 = vadd.f32 1e-06, %v506_v17 }
 0x122   : > { %1160 = vrcp.f32 %v507_v18  ;;  %v519_v22 = vand.u32 2147483648, %v507_v18  ;;  %v517_v25 = vand.u32 2147483647, %v507_v18  ;;  %vm513_vm5 = vweird.f32 %v507_v18 }
 0x124   : > { %v520_v27 = vor.u32 1.1754944e-38, %v519_v22  ;;  %vm518_vm7 = vcmp.eq.f32.partialorder %v517_v25, 8.507059e+37 }
 0x127   : > { %v712_v43 = vpop.permute.xlu1 %711 }
 0x128   : > { %v1161_v19 = vpop.eup %1160  ;;  %1091 = vmatpush.xpose.msk.msrb.mxu1 %vm647_vm8, %v712_v43  ;;  %v932_v43 = vld [vmem:[#allocation6 + $0x50] sm:$0xff] }
 0x129   : > { %v509_v20 = vmul.f32 %v1161_v19, %v507_v18  ;;  %vm514_vm4 = vweird.f32 %v1161_v19 }
 0x12a   : > { %vm515_vm6 = vmor %vm513_vm5, %vm514_vm4 }
 0x12b   : > { %v510_v21 = vsub.f32 1.0, %v509_v20 }
 0x12d   : > { %v511_v24 = vmul.f32 %v1161_v19, %v510_v21 }
 0x12f   : > { %v512_v26 = vadd.f32 %v1161_v19, %v511_v24 }
 0x131   : > { %v516_v29 = vsel %vm515_vm6, %v1161_v19, %v512_v26 }
 0x132   : > { %v521_v31 = vsel %vm518_vm7, %v520_v27, %v516_v29 }
 0x133   : > { %v522_v32 = vmul.f32 %v521_v31, %v494_v28 }
 0x135   : > { %v526_v33 = vadd.f32 %v1151_v30, %v522_v32 }
 0x137   : > { %563 = vmatmul.f32.vlgmr.msra.gmra.mxu0 %v526_v33 }
 0x18f   : > { %v750_v44 = vpop.permute.xlu0 %749 }
 0x190   : > { %770 = vmatpush.msra.mxu3 %v750_v44  ;;  %v931_v44 = vld [vmem:[#allocation6 + $0x48] sm:$0xff] }
 0x1b4   : > { %v564_v41 = vpop.f32.mrf.mxu0 }
 0x1b5   : > { %v565_v42 = vadd.f32 %v1152_v40, %v564_v41  ;;  %v935_v40 = vld [vmem:[#allocation6 + $0x68] sm:$0xff]  ;;  %v934_v41 = vld [vmem:[#allocation6 + $0x60] sm:$0xff] }
 0x1b7   : > { %709 = vrot.lane.b32.xlu1 %v565_v42, %s1293_s16  ;;  %1089 = vmatmul.msk.f32.vlgmr.msrb.gmra.mxu0 %vm647_vm8, %v565_v42 }
 0x1bf   : > { %777 = vrot.lane.b32.xlu1 %v624_v37, %s1294_s23 }
 0x1c7   : > { %775 = vrot.lane.b32.xlu1 %v565_v42, %s1294_s23 }
 0x1cf   : > { %840 = vrot.lane.b32.xlu1 %v565_v42, %s1295_s25  ;;  %v933_v42 = vld [vmem:[#allocation6 + $0x58] sm:$0xff] }
 0x229   : > { %v710_v45 = vpop.permute.xlu1 %709 }
 0x22a   : > { %1092 = vmatmul.msk.f32.vlgmr.msrb.gmra.mxu1 %vm647_vm8, %v710_v45  ;;  %v930_v45 = vld [vmem:[#allocation6 + $0x40] sm:$0xff] }
 0x231   : > { %v778_v46 = vpop.permute.xlu1 %777 }
 0x232   : > { %1094 = vmatpush.xpose.msk.msrb.mxu3 %vm647_vm8, %v778_v46  ;;  %v929_v46 = vld [vmem:[#allocation6 + $0x38] sm:$0xff] }
 0x234   : > { %v671_v48 = vpop.f32.mrf.mxu0 }
 0x235   : > { %v672_v49 = vadd.f32 %v671_v48, %v646_v47  ;;  %v927_v48 = vld [vmem:[#allocation6 + $0x28] sm:$0xff] }
 0x237   : > { %v675_v50 = vsel %vm674_vm9, %v672_v49, -inf }
 0x238   : > { %676 = vmax.xlane.f32.xlu0 %v675_v50  ;;  %v925_v50 = vld [vmem:[#allocation6 + $0x18] sm:$0xff] }
 0x239   : > { %v776_v6 = vpop.permute.xlu1 %775 }
 0x241   : > { %v841_v11 = vpop.permute.xlu1 %840 }
 0x2a7   : > { %v734_v51 = vpop.f32.mrf.mxu1 }
 0x2a8   : > { %v735_v52 = vadd.f32 %v734_v51, %v646_v47  ;;  %v924_v51 = vld [vmem:[#allocation6 + $0x10] sm:$0xff] }
 0x2aa   : > { %v737_v53 = vsel %vm674_vm9, %v735_v52, -inf }
 0x2ab   : > { %738 = vmax.xlane.f32.xlu2 %v737_v53  ;;  %v677_v54 = vpop.xlane.xlu0 %676  ;;  %v922_v53 = vld [vmem:[#allocation6] sm:$0xff] }
 0x2ac   : > { %v678_v55 = vsub.f32 %v672_v49, %v677_v54  ;;  %v926_v49 = vld [vmem:[#allocation6 + $0x20] sm:$0xff] }
 0x2ae   : > { %v679_v56 = vmul.f32 1.442695, %v678_v55 }
 0x2b0   : > { %1162 = vpow2.f32 %v679_v56 }
 0x2b6   : > { %v1163_v57 = vpop.eup %1162 }
 0x2b7   : > { %v681_v58 = vsel %vm674_vm9, %v1163_v57, 0.0 }
 0x2b8   : > { %682 = vadd.xlane.f32.xlu0 %v681_v58 }
 0x2cc   : > { %879 = vrot.lane.b32.xlu0 %v1436_v39, %s1295_s25 }
 0x31e   : > { %v739_v59 = vpop.xlane.xlu2 %738 }
 0x31f   : > { %v740_v60 = vsub.f32 %v735_v52, %v739_v59  ;;  %v923_v52 = vld [vmem:[#allocation6 + $0x8] sm:$0xff] }
 0x321   : > { %v741_v61 = vmul.f32 1.442695, %v740_v60  ;;  %v1153_v60 = vld [vmem:[%s1501_s10] ss:$0 sm:$0xff] }
 0x323   : > { %1164 = vpow2.f32 %v741_v61 }
 0x329   : > { %v1165_v62 = vpop.eup %1164 }
 0x32a   : > { %v743_v63 = vsel %vm674_vm9, %v1165_v62, 0.0 }
 0x32b   : > { %744 = vadd.xlane.f32.xlu2 %v743_v63  ;;  %v683_v1 = vpop.xlane.xlu0 %682 }
 0x32c   : > { %1166 = vrcp.f32 %v683_v1 }
 0x332   : > { %v1167_v2 = vpop.eup %1166 }
 0x333   : > { %v685_v3 = vmul.f32 %v1167_v2, %v1163_v57 }
 0x335   : > { %1090 = vmatmul.msk.f32.vlgmr.msrb.gmra.mxu2 %vm674_vm9, %v685_v3 }
 0x33e   : > { %v880_v4 = vpop.permute.xlu0 %879 }
 0x33f   : > { %900 = vmatpush.msra.mxu2 %v880_v4 }
 0x343   : > { %842 = vrot.lane.b32.xlu2 %v624_v37, %s1295_s25 }
 0x39e   : > { %v745_v5 = vpop.xlane.xlu2 %744 }
 0x39f   : > { %1168 = vrcp.f32 %v745_v5 }
 0x3a5   : > { %v1169_v7 = vpop.eup %1168 }
 0x3a6   : > { %v843_v8 = vpop.permute.xlu2 %842  ;;  %v747_v9 = vmul.f32 %v1169_v7, %v1165_v62 }
 0x3a7   : > { %1097 = vmatpush.xpose.msk.msra.mxu1 %vm647_vm8, %v843_v8 }
 0x3a8   : > { %1093 = vmatmul.msk.f32.vlgmr.msra.gmra.mxu3 %vm674_vm9, %v747_v9 }
 0x3a9   : > { %938 = vmatpush.msra.mxu3 %v937_v38 }
 0x3aa   : > { %1098 = vmatmul.msk.f32.vlgmr.msra.gmra.mxu1 %vm647_vm8, %v841_v11 }
 0x3b0   : > { %1095 = vmatmul.msk.f32.vlgmr.msrb.gmra.mxu3 %vm647_vm8, %v776_v6 }
 0x3b8   : > { %v706_v36 = vpop.f32.mrf.mxu2 }
 0x427   : > { %v865_v12 = vpop.f32.mrf.mxu1 }
 0x428   : > { %v866_v13 = vadd.f32 %v865_v12, %v646_v47 }
 0x42a   : > { %v868_v14 = vsel %vm674_vm9, %v866_v13, -inf }
 0x42b   : > { %869 = vmax.xlane.f32.xlu1 %v868_v14  ;;  %v772_v15 = vpop.f32.mrf.mxu3 }
 0x433   : > { %v800_v16 = vpop.f32.mrf.mxu3 }
 0x434   : > { %v801_v17 = vadd.f32 %v800_v16, %v646_v47  ;;  %v928_v47 = vld [vmem:[#allocation6 + $0x30] sm:$0xff] }
 0x436   : > { %v803_v18 = vsel %vm674_vm9, %v801_v17, -inf }
 0x437   : > { %804 = vmax.xlane.f32.xlu2 %v803_v18 }
 0x49e   : > { %v870_v19 = vpop.xlane.xlu1 %869 }
 0x49f   : > { %v871_v20 = vsub.f32 %v866_v13, %v870_v19 }
 0x4a1   : > { %v872_v21 = vmul.f32 1.442695, %v871_v20 }
 0x4a3   : > { %1170 = vpow2.f32 %v872_v21 }
 0x4a9   : > { %v1171_v22 = vpop.eup %1170 }
 0x4aa   : > { %v805_v23 = vpop.xlane.xlu2 %804  ;;  %v874_v24 = vsel %vm674_vm9, %v1171_v22, 0.0 }
 0x4ab   : > { %v806_v25 = vsub.f32 %v801_v17, %v805_v23  ;;  %875 = vadd.xlane.f32.xlu2 %v874_v24 }
 0x4ad   : > { %v807_v26 = vmul.f32 1.442695, %v806_v25 }
 0x4af   : > { %1172 = vpow2.f32 %v807_v26 }
 0x4b5   : > { %v1173_v27 = vpop.eup %1172 }
 0x4b6   : > { %v809_v28 = vsel %vm674_vm9, %v1173_v27, 0.0 }
 0x4b7   : > { %810 = vadd.xlane.f32.xlu1 %v809_v28 }
 0x4c3   : > { %814 = vrot.lane.b32.xlu2 %v1436_v39, %s1294_s23  ;;  %v936_v39 = vld [vmem:[#allocation6 + $0x70] sm:$0xff] }
 0x4c4   : > { %939 = vmatpush.msra.mxu3 %v936_v39 }
 0x4c6   : > { %940 = vmatpush.msra.mxu3 %v935_v40 }
 0x4c8   : > { %941 = vmatpush.msra.mxu3 %v934_v41 }
 0x4ca   : > { %942 = vmatpush.msra.mxu3 %v933_v42 }
 0x4cc   : > { %943 = vmatpush.msra.mxu3 %v932_v43 }
 0x4ce   : > { %944 = vmatpush.msra.mxu3 %v931_v44 }
 0x4d0   : > { %906 = vrot.lane.b32.xlu1 %v772_v15, %s1295_s25  ;;  %945 = vmatpush.msra.mxu3 %v930_v45 }
 0x4d2   : > { %946 = vmatpush.msra.mxu3 %v929_v46 }
 0x4d4   : > { %947 = vmatpush.msra.mxu3 %v928_v47 }
 0x4d6   : > { %948 = vmatpush.msra.mxu3 %v927_v48 }
 0x4d8   : > { %949 = vmatpush.msra.mxu3 %v926_v49 }
 0x4da   : > { %950 = vmatpush.msra.mxu3 %v925_v50 }
 0x4dc   : > { %951 = vmatpush.msra.mxu3 %v924_v51 }
 0x4de   : > { %952 = vmatpush.msra.mxu3 %v923_v52 }
 0x4e0   : > { %953 = vmatpush.msra.mxu3 %v922_v53 }
 0x51e   : > { %v876_v29 = vpop.xlane.xlu2 %875 }
 0x51f   : > { %1174 = vrcp.f32 %v876_v29 }
 0x525   : > { %v1175_v30 = vpop.eup %1174 }
 0x526   : > { %v878_v31 = vmul.f32 %v1175_v30, %v1171_v22  ;;  %v815_v32 = vpop.permute.xlu2 %814 }
 0x527   : > { %835 = vmatpush.msra.mxu0 %v815_v32 }
 0x528   : > { %1099 = vmatmul.msk.f32.vlgmr.msra.gmra.mxu2 %vm674_vm9, %v878_v31 }
 0x52a   : > { %v811_v33 = vpop.xlane.xlu1 %810 }
 0x52b   : > { %1176 = vrcp.f32 %v811_v33 }
 0x531   : > { %v1177_v34 = vpop.eup %1176 }
 0x532   : > { %v813_v35 = vmul.f32 %v1177_v34, %v1173_v27 }
 0x534   : > { %1096 = vmatmul.msk.f32.vlgmr.msra.gmra.mxu0 %vm674_vm9, %v813_v35 }
 0x542   : > { %v907_v54 = vpop.permute.xlu1 %906 }
 0x543   : > { %v917_v55 = vsel %vm647_vm8, %v706_v36, %v907_v54 }
 0x5ab   : > { %v902_v37 = vpop.f32.mrf.mxu2 }
 0x5ac   : > { %914 = vrot.lane.b32.xlu2 %v902_v37, %s1293_s16 }
 0x5b1   : > { %v837_v10 = vpop.f32.mrf.mxu0 }
 0x5b2   : > { %910 = vrot.lane.b32.xlu0 %v837_v10, %s1294_s23 }
 0x606   : > { %v915_v57 = vpop.permute.xlu2 %914 }
 0x624   : > { %v911_v56 = vpop.permute.xlu0 %910 }
 0x625   : > { %v919_v58 = vsel %vm918_vm10, %v917_v55, %v911_v56 }
 0x626   : > { %v921_v59 = vsel %vm920_vm11, %v919_v58, %v915_v57 }
 0x627   : > { %954 = vmatmul.f32.vlgmr.msra.gmra.mxu3 %v921_v59 }
 0x6aa   : > { %v955_v61 = vpop.f32.mrf.mxu3 }
 0x6ab   : > { %v958_v62 = vadd.f32 %v955_v61, %v1412_v0 }
 0x6ad   : > { %v963_v63 = vadd.f32 %v1153_v60, %v958_v62 }
 0x6af   : > { %964 = vst [vmem:[%s465_s30] sm:$0xff] %v963_v63 }
 0x6b0 PF: > { %s23_s17 = sadd.s32 1, %s1282_s17  }
 0x6b1   : > { %p20_p7 = scmp.ge.s32.totalorder %s23_s17, 4  }
 0x6b3   :  { %22 = sbr.rel (!%p20_p7) target bundleno = 2 (0x2), region = 113 }
 0x6b8   :  { %984 = vsyncpa [#allocation3], 1 }
 0x6b9   :  { %986 = vsyncpa [#allocation3 + $0x1], 1 }
 0x6ba   :  { %987 = vsyncpa [#allocation5], 1 }

</bundles_post_ra>
